<compile_context>
chip_gen: v5e
topology: v5e:2x2
jax: 0.10.0
libtpu: 0.0.40
codegen_flags: <defaults>
</compile_context>

<pallas_src>
import functools

import jax
import jax.numpy as jnp
from jax.experimental import pallas as pl
from jax.experimental.pallas import tpu as pltpu


# ----------------------------------------------------------------------------
# tiling helpers
# ----------------------------------------------------------------------------
_TK_SINGLE_MAX = 2048   # keep K as a single block below this
_TK = 512               # K tile when the reduction axis is tiled
_TM = 256               # row tile


def _round_up(a, b):
    return (a + b - 1) // b * b


def _choose_k(k):
    """Return (padded K, K tile)."""
    if k <= _TK_SINGLE_MAX:
        return k, k
    return _round_up(k, _TK), _TK


def _choose_tn(c):
    if c % 128 == 0:
        for tn in (512, 256, 128):
            if c % tn == 0:
                return tn
    return c            # small channel counts: full-extent lane block


def _choose_tm(m):
    return _TM if m >= _TM else m


# ----------------------------------------------------------------------------
# Pallas kernels
# ----------------------------------------------------------------------------
def _matmul_kernel(lhs_ref, w_ref, b_ref, o_ref, acc_ref, *, out_act):
    """K-tiled matmul with f32 accumulator; bias (+tanh) only at the last K step."""
    @pl.when(pl.program_id(2) == 0)
    def _():
        acc_ref[...] = jnp.zeros_like(acc_ref)

    acc_ref[...] += jnp.dot(lhs_ref[...], w_ref[...],
                            preferred_element_type=jnp.float32)

    @pl.when(pl.program_id(2) == pl.num_programs(2) - 1)
    def _():
        y = acc_ref[...] + b_ref[...]
        if out_act == "tanh":
            y = jnp.tanh(y)
        o_ref[...] = y.astype(o_ref.dtype)


def pallas_matmul(lhs, w, bias, out_act="none"):
    """lhs @ w + bias (optional tanh).  lhs:(M,K) bf16, w:(K,C) bf16, bias:(C,) f32."""
    m, k = lhs.shape
    k2, c = w.shape
    assert k == k2, (k, k2)
    tm = _choose_tm(m)
    tn = _choose_tn(c)
    _, tk = _choose_k(k)
    assert k % tk == 0 and c % tn == 0
    grid = (pl.cdiv(m, tm), c // tn, k // tk)
    return pl.pallas_call(
        functools.partial(_matmul_kernel, out_act=out_act),
        out_shape=jax.ShapeDtypeStruct((m, c), jnp.float32),
        grid=grid,
        in_specs=[
            pl.BlockSpec((tm, tk), lambda i, j, kk: (i, kk)),
            pl.BlockSpec((tk, tn), lambda i, j, kk: (kk, j)),
            pl.BlockSpec((1, tn), lambda i, j, kk: (0, j)),
        ],
        out_specs=pl.BlockSpec((tm, tn), lambda i, j, kk: (i, j)),
        scratch_shapes=[pltpu.VMEM((tm, tn), jnp.float32)],
        compiler_params=pltpu.CompilerParams(
            dimension_semantics=("parallel", "parallel", "arbitrary"),
            vmem_limit_bytes=32 * 1024 * 1024),
    )(lhs, w, bias.reshape(1, c))


def _affine_kernel(x_ref, s_ref, t_ref, o_ref):
    o_ref[...] = x_ref[...] * s_ref[...] + t_ref[...]


def pallas_batchnorm(x, gamma, beta, eps=1e-5):
    """Training-mode BatchNorm2d (batch stats over N,H,W) on NHWC input.
    Stats via a jnp reduction; per-channel scale/shift in a row-tiled kernel."""
    n, h, w, c = x.shape
    m = n * h * w
    flat = x.reshape(m, c)
    s1 = jnp.sum(flat, axis=0)
    s2 = jnp.sum(flat * flat, axis=0)
    mean = s1 / m
    var = jnp.maximum(s2 / m - mean * mean, 0.0)      # biased var (PyTorch train)
    scale = gamma * jax.lax.rsqrt(var + eps)
    shift = beta - mean * scale
    tm = 512 if m >= 512 else m
    out = pl.pallas_call(
        _affine_kernel,
        out_shape=jax.ShapeDtypeStruct((m, c), jnp.float32),
        grid=(pl.cdiv(m, tm),),
        in_specs=[
            pl.BlockSpec((tm, c), lambda i: (i, 0)),
            pl.BlockSpec((1, c), lambda i: (0, 0)),
            pl.BlockSpec((1, c), lambda i: (0, 0)),
        ],
        out_specs=pl.BlockSpec((tm, c), lambda i: (i, 0)),
        compiler_params=pltpu.CompilerParams(
            dimension_semantics=("parallel",)),
    )(flat, scale.reshape(1, c), shift.reshape(1, c))
    return out.reshape(n, h, w, c)


# ----------------------------------------------------------------------------
# conv lowering (patch extraction in JAX; matmul / epilogue in Pallas)
# ----------------------------------------------------------------------------
def _activate(x, act):
    if act == "lrelu":
        return jnp.where(x >= 0, x, 0.2 * x)
    if act == "relu":
        return jnp.maximum(x, 0.0)
    return x


def conv4x4s2(x, w_mat, bias, pre_act):
    """Conv2d(k=4, s=2, p=1).  Activation applied once per element, patches in bf16."""
    x = _activate(x, pre_act)
    n, h, w, c = x.shape
    ho, wo = h // 2, w // 2
    xp = jnp.pad(x.astype(jnp.bfloat16), ((0, 0), (1, 1), (1, 1), (0, 0)))
    taps = [xp[:, kh:kh + 2 * ho:2, kw:kw + 2 * wo:2, :]
            for kh in range(4) for kw in range(4)]
    k = 16 * c
    k_pad, _ = _choose_k(k)
    if k_pad > k:
        taps.append(jnp.zeros((n, ho, wo, k_pad - k), jnp.bfloat16))
    lhs = jnp.concatenate(taps, axis=-1).reshape(n * ho * wo, k_pad)
    out = pallas_matmul(lhs, w_mat, bias)
    return out.reshape(n, ho, wo, -1)


def convT4x4s2(y, w_mat, bias4, pre_act, out_act):
    """ConvTranspose2d(k=4, s=2, p=1) via sub-pixel decomposition: one matmul over
    a 3x3 tap window yields all four 2x2 output phases, then depth-to-space."""
    y = _activate(y, pre_act)
    n, h, w, c = y.shape
    yp = jnp.pad(y.astype(jnp.bfloat16), ((0, 0), (1, 1), (1, 1), (0, 0)))
    taps = [yp[:, ty:ty + h, tx:tx + w, :] for ty in range(3) for tx in range(3)]
    k = 9 * c
    k_pad, _ = _choose_k(k)
    if k_pad > k:
        taps.append(jnp.zeros((n, h, w, k_pad - k), jnp.bfloat16))
    lhs = jnp.concatenate(taps, axis=-1).reshape(n * h * w, k_pad)
    out = pallas_matmul(lhs, w_mat, bias4, out_act=out_act)     # (M, 4*Cout)
    cout = out.shape[-1] // 4
    out = out.reshape(n, h, w, 2, 2, cout)            # (..., phase_a, phase_b, cout)
    out = jnp.transpose(out, (0, 1, 3, 2, 4, 5))      # (n, h, a, w, b, cout)
    return out.reshape(n, 2 * h, 2 * w, cout)


# ----------------------------------------------------------------------------
# weight layout converters (PyTorch param shapes -> matmul matrices, bf16)
# ----------------------------------------------------------------------------
def _conv_w_to_mat(w):
    """Conv2d weight (Cout, Cin, 4, 4) -> (K_pad, Cout)."""
    cout, cin = w.shape[0], w.shape[1]
    mat = jnp.transpose(w, (2, 3, 1, 0)).reshape(16 * cin, cout)
    k_pad, _ = _choose_k(16 * cin)
    if k_pad > 16 * cin:
        mat = jnp.pad(mat, ((0, k_pad - 16 * cin), (0, 0)))
    return mat.astype(jnp.bfloat16)


_KH_TAB = ((3, 1), (2, 0))   # kernel index for (output phase a, tap offset dy)


def _convT_w_to_mat(w):
    """ConvTranspose2d weight (Cin, Cout, 4, 4) -> sub-pixel matrix (K_pad, 4*Cout)
    mapping a 3x3 input tap window to the four 2x2 output phases."""
    cin, cout = w.shape[0], w.shape[1]
    mat = jnp.zeros((9 * cin, 4 * cout), jnp.float32)
    for a in range(2):
        for b in range(2):
            ph = 2 * a + b
            for dy in range(2):
                for dx in range(2):
                    ty, tx = a + dy, b + dx
                    kh, kw = _KH_TAB[a][dy], _KH_TAB[b][dx]
                    tap = 3 * ty + tx
                    mat = mat.at[tap * cin:(tap + 1) * cin,
                                 ph * cout:(ph + 1) * cout].set(w[:, :, kh, kw])
    k_pad, _ = _choose_k(9 * cin)
    if k_pad > 9 * cin:
        mat = jnp.pad(mat, ((0, k_pad - 9 * cin), (0, 0)))
    return mat.astype(jnp.bfloat16)


# ----------------------------------------------------------------------------
# U-Net construction (mirrors UnetGenerator.__init__, outermost first)
# ----------------------------------------------------------------------------
def make_unet_configs(input_nc, output_nc, num_downs, ngf):
    inner = [dict(outer_nc=ngf * 8, inner_nc=ngf * 8, input_nc=ngf * 8,
                  outermost=False, innermost=True)]
    for _ in range(num_downs - 5):
        inner.append(dict(outer_nc=ngf * 8, inner_nc=ngf * 8, input_nc=ngf * 8,
                          outermost=False, innermost=False))
    inner.append(dict(outer_nc=ngf * 4, inner_nc=ngf * 8, input_nc=ngf * 4,
                      outermost=False, innermost=False))
    inner.append(dict(outer_nc=ngf * 2, inner_nc=ngf * 4, input_nc=ngf * 2,
                      outermost=False, innermost=False))
    inner.append(dict(outer_nc=ngf, inner_nc=ngf * 2, input_nc=ngf,
                      outermost=False, innermost=False))
    inner.append(dict(outer_nc=output_nc, inner_nc=ngf, input_nc=input_nc,
                      outermost=True, innermost=False))
    return list(reversed(inner))


def init_unet_params(key, cfgs):
    params = []
    for cfg in cfgs:
        outer, inner, in_c = cfg["outer_nc"], cfg["inner_nc"], cfg["input_nc"]
        up_in = inner if cfg["innermost"] else inner * 2
        key, k1, k2, k3 = jax.random.split(key, 4)
        # downconv: Conv2d(in_c, inner, 4, 2, 1, bias=False)  (BatchNorm norm layer)
        dw = jax.random.normal(k1, (inner, in_c, 4, 4), jnp.float32) * 0.02
        # upconv: ConvTranspose2d(up_in, outer, 4, 2, 1, bias = outermost only)
        uw = jax.random.normal(k2, (up_in, outer, 4, 4), jnp.float32) * 0.02
        ub = (jax.random.normal(k3, (outer,), jnp.float32) * 0.02
              if cfg["outermost"] else jnp.zeros((outer,), jnp.float32))
        p = dict(
            dw=_conv_w_to_mat(dw),
            db=jnp.zeros((inner,), jnp.float32),
            uw=_convT_w_to_mat(uw),
            ub=jnp.tile(ub, 4),          # one bias copy per output phase
        )
        if (not cfg["outermost"]) and (not cfg["innermost"]):
            p["dn_g"] = jnp.ones((inner,), jnp.float32)    # BN(inner) after downconv
            p["dn_b"] = jnp.zeros((inner,), jnp.float32)
        if not cfg["outermost"]:
            p["un_g"] = jnp.ones((outer,), jnp.float32)    # BN(outer) after upconv
            p["un_b"] = jnp.zeros((outer,), jnp.float32)
        params.append(p)
    return params


def unet_block_forward(x, cfgs, params, idx):
    cfg, p = cfgs[idx], params[idx]
    # --- down path ---
    pre = "none" if cfg["outermost"] else "lrelu"
    y = conv4x4s2(x, p["dw"], p["db"], pre_act=pre)
    if (not cfg["outermost"]) and (not cfg["innermost"]):
        y = pallas_batchnorm(y, p["dn_g"], p["dn_b"])
    # --- submodule ---
    if not cfg["innermost"]:
        y = unet_block_forward(y, cfgs, params, idx + 1)
    # --- up path ---
    out_act = "tanh" if cfg["outermost"] else "none"
    z = convT4x4s2(y, p["uw"], p["ub"], pre_act="relu", out_act=out_act)
    if cfg["outermost"]:
        return z
    z = pallas_batchnorm(z, p["un_g"], p["un_b"])
    return jnp.concatenate([x, z], axis=-1)       # skip connection (channel concat)


def unet_generator_forward(x_nchw, cfgs, params):
    x = jnp.transpose(x_nchw, (0, 2, 3, 1)).astype(jnp.float32)    # NCHW -> NHWC
    y = unet_block_forward(x, cfgs, params, 0)
    return jnp.transpose(y, (0, 3, 1, 2))                           # NHWC -> NCHW


# ----------------------------------------------------------------------------
if __name__ == "__main__":
    # Small deterministic configuration: UnetGenerator(3, 3, num_downs=5, ngf=8)
    input_nc, output_nc, num_downs, ngf = 3, 3, 5, 8
    n, h, w = 2, 32, 32          # H, W must be divisible by 2**num_downs

    key = jax.random.PRNGKey(0)
    kx, kp = jax.random.split(key)
    x = jax.random.normal(kx, (n, input_nc, h, w), jnp.float32)

    cfgs = make_unet_configs(input_nc, output_nc, num_downs, ngf)
    params = init_unet_params(kp, cfgs)

    fwd = jax.jit(lambda inp: unet_generator_forward(inp, cfgs, params))
    out = jax.block_until_ready(fwd(x))

    assert out.shape == (n, output_nc, h, w), out.shape
    assert bool(jnp.all(jnp.isfinite(out)))
    assert bool(jnp.all(jnp.abs(out) <= 1.0))    # final Tanh
    print("KERNEL_OK")
</pallas_src>

<mosaic_0001>
module attributes {stable_mosaic.version = 11 : i64} {
  func.func @_matmul_kernel(%arg0: i32, %arg1: i32, %arg2: i32, %arg3: memref<256x48xbf16, #tpu.memory_space<vmem>>, %arg4: memref<48x8xbf16, #tpu.memory_space<vmem>>, %arg5: memref<1x8xf32, #tpu.memory_space<vmem>>, %arg6: memref<256x8xf32, #tpu.memory_space<vmem>>, %arg7: memref<256x8xf32, #tpu.memory_space<vmem>>) attributes {dimension_semantics = [#tpu.dimension_semantics<parallel>, #tpu.dimension_semantics<parallel>, #tpu.dimension_semantics<arbitrary>], iteration_bounds = array<i64: 2, 1, 1>, scalar_prefetch = 0 : i64, scratch_operands = 1 : i64, tpu.core_type = #tpu.core_type<tc>, window_params = [{transform_indices = @transform_0, window_bounds = array<i64: 256, 48>}, {transform_indices = @transform_1, window_bounds = array<i64: 48, 8>}, {transform_indices = @transform_2, window_bounds = array<i64: 1, 8>}, {transform_indices = @transform_3, window_bounds = array<i64: 256, 8>}]} {
    %c0_i32 = arith.constant 0 : i32
    %0 = arith.cmpi eq, %arg2, %c0_i32 : i32
    %1 = arith.extui %0 : i1 to i32
    %c0_i32_0 = arith.constant 0 : i32
    %2 = arith.cmpi ne, %1, %c0_i32_0 : i32
    scf.if %2 {
      %cst_10 = arith.constant 0.000000e+00 : f32
      %12 = vector.broadcast %cst_10 : f32 to vector<256x8xf32>
      %c0_11 = arith.constant 0 : index
      %c0_12 = arith.constant 0 : index
      %13 = vector.load %arg7[%c0_11, %c0_12] : memref<256x8xf32, #tpu.memory_space<vmem>>, vector<256x8xf32>
      tpu.vector_store %arg7[%c0_11, %c0_12], %12 {strides = array<i32>} : memref<256x8xf32, #tpu.memory_space<vmem>>, vector<256x8xf32>,
    } else {
    }
    %c0 = arith.constant 0 : index
    %c0_1 = arith.constant 0 : index
    %3 = vector.load %arg7[%c0, %c0_1] : memref<256x8xf32, #tpu.memory_space<vmem>>, vector<256x8xf32>
    %c0_2 = arith.constant 0 : index
    %c0_3 = arith.constant 0 : index
    %4 = vector.load %arg3[%c0_2, %c0_3] : memref<256x48xbf16, #tpu.memory_space<vmem>>, vector<256x48xbf16>
    %c0_4 = arith.constant 0 : index
    %c0_5 = arith.constant 0 : index
    %5 = vector.load %arg4[%c0_4, %c0_5] : memref<48x8xbf16, #tpu.memory_space<vmem>>, vector<48x8xbf16>
    %cst = arith.constant dense<0.000000e+00> : vector<256x8xf32>
    %6 = tpu.matmul %4, %5, %cst {dimension_numbers = #tpu.dot_dimension_numbers<[1], [0], [0], [1], [0, 0, 1, 1], [], []>} : vector<256x48xbf16>, vector<48x8xbf16>, vector<256x8xf32> -> vector<256x8xf32>
    %7 = arith.addf %3, %6 : vector<256x8xf32>
    %c0_6 = arith.constant 0 : index
    %c0_7 = arith.constant 0 : index
    %8 = vector.load %arg7[%c0_6, %c0_7] : memref<256x8xf32, #tpu.memory_space<vmem>>, vector<256x8xf32>
    tpu.vector_store %arg7[%c0_6, %c0_7], %7 {strides = array<i32>} : memref<256x8xf32, #tpu.memory_space<vmem>>, vector<256x8xf32>,
    %c0_i32_8 = arith.constant 0 : i32
    %9 = arith.cmpi eq, %arg2, %c0_i32_8 : i32
    %10 = arith.extui %9 : i1 to i32
    %c0_i32_9 = arith.constant 0 : i32
    %11 = arith.cmpi ne, %10, %c0_i32_9 : i32
    scf.if %11 {
      %c0_10 = arith.constant 0 : index
      %c0_11 = arith.constant 0 : index
      %12 = vector.load %arg7[%c0_10, %c0_11] : memref<256x8xf32, #tpu.memory_space<vmem>>, vector<256x8xf32>
      %c0_12 = arith.constant 0 : index
      %c0_13 = arith.constant 0 : index
      %13 = vector.load %arg5[%c0_12, %c0_13] : memref<1x8xf32, #tpu.memory_space<vmem>>, vector<1x8xf32>
      %14 = vector.broadcast %13 : vector<1x8xf32> to vector<256x8xf32>
      %15 = arith.addf %12, %14 : vector<256x8xf32>
      %c0_14 = arith.constant 0 : index
      %c0_15 = arith.constant 0 : index
      %16 = vector.load %arg6[%c0_14, %c0_15] : memref<256x8xf32, #tpu.memory_space<vmem>>, vector<256x8xf32>
      tpu.vector_store %arg6[%c0_14, %c0_15], %15 {strides = array<i32>} : memref<256x8xf32, #tpu.memory_space<vmem>>, vector<256x8xf32>,
    } else {
    }
    return
  }
  func.func @transform_0(%arg0: i32, %arg1: i32, %arg2: i32) -> (i32, i32) {
    %c0_i32 = arith.constant 0 : i32
    return %arg0, %arg2 : i32, i32
  }
  func.func @transform_1(%arg0: i32, %arg1: i32, %arg2: i32) -> (i32, i32) {
    %c0_i32 = arith.constant 0 : i32
    return %arg2, %arg1 : i32, i32
  }
  func.func @transform_2(%arg0: i32, %arg1: i32, %arg2: i32) -> (i32, i32) {
    %c0_i32 = arith.constant 0 : i32
    %c0_i32_0 = arith.constant 0 : i32
    return %c0_i32, %arg1 : i32, i32
  }
  func.func @transform_3(%arg0: i32, %arg1: i32, %arg2: i32) -> (i32, i32) {
    %c0_i32 = arith.constant 0 : i32
    return %arg0, %arg1 : i32, i32
  }
}

module attributes {stable_mosaic.version = 11 : i64} {
  func.func @_matmul_kernel(%arg0: i32, %arg1: i32, %arg2: i32, %arg3: memref<128x128xbf16, #tpu.memory_space<vmem>>, %arg4: memref<128x16xbf16, #tpu.memory_space<vmem>>, %arg5: memref<1x16xf32, #tpu.memory_space<vmem>>, %arg6: memref<128x16xf32, #tpu.memory_space<vmem>>, %arg7: memref<128x16xf32, #tpu.memory_space<vmem>>) attributes {dimension_semantics = [#tpu.dimension_semantics<parallel>, #tpu.dimension_semantics<parallel>, #tpu.dimension_semantics<arbitrary>], iteration_bounds = array<i64: 1, 1, 1>, scalar_prefetch = 0 : i64, scratch_operands = 1 : i64, tpu.core_type = #tpu.core_type<tc>, window_params = [{transform_indices = @transform_0, window_bounds = array<i64: 128, 128>}, {transform_indices = @transform_1, window_bounds = array<i64: 128, 16>}, {transform_indices = @transform_2, window_bounds = array<i64: 1, 16>}, {transform_indices = @transform_3, window_bounds = array<i64: 128, 16>}]} {
    %c0_i32 = arith.constant 0 : i32
    %0 = arith.cmpi eq, %arg2, %c0_i32 : i32
    %1 = arith.extui %0 : i1 to i32
    %c0_i32_0 = arith.constant 0 : i32
    %2 = arith.cmpi ne, %1, %c0_i32_0 : i32
    scf.if %2 {
      %cst_10 = arith.constant 0.000000e+00 : f32
      %12 = vector.broadcast %cst_10 : f32 to vector<128x16xf32>
      %c0_11 = arith.constant 0 : index
      %c0_12 = arith.constant 0 : index
      %13 = vector.load %arg7[%c0_11, %c0_12] : memref<128x16xf32, #tpu.memory_space<vmem>>, vector<128x16xf32>
      tpu.vector_store %arg7[%c0_11, %c0_12], %12 {strides = array<i32>} : memref<128x16xf32, #tpu.memory_space<vmem>>, vector<128x16xf32>,
    } else {
    }
    %c0 = arith.constant 0 : index
    %c0_1 = arith.constant 0 : index
    %3 = vector.load %arg7[%c0, %c0_1] : memref<128x16xf32, #tpu.memory_space<vmem>>, vector<128x16xf32>
    %c0_2 = arith.constant 0 : index
    %c0_3 = arith.constant 0 : index
    %4 = vector.load %arg3[%c0_2, %c0_3] : memref<128x128xbf16, #tpu.memory_space<vmem>>, vector<128x128xbf16>
    %c0_4 = arith.constant 0 : index
    %c0_5 = arith.constant 0 : index
    %5 = vector.load %arg4[%c0_4, %c0_5] : memref<128x16xbf16, #tpu.memory_space<vmem>>, vector<128x16xbf16>
    %cst = arith.constant dense<0.000000e+00> : vector<128x16xf32>
    %6 = tpu.matmul %4, %5, %cst {dimension_numbers = #tpu.dot_dimension_numbers<[1], [0], [0], [1], [0, 0, 1, 1], [], []>} : vector<128x128xbf16>, vector<128x16xbf16>, vector<128x16xf32> -> vector<128x16xf32>
    %7 = arith.addf %3, %6 : vector<128x16xf32>
    %c0_6 = arith.constant 0 : index
    %c0_7 = arith.constant 0 : index
    %8 = vector.load %arg7[%c0_6, %c0_7] : memref<128x16xf32, #tpu.memory_space<vmem>>, vector<128x16xf32>
    tpu.vector_store %arg7[%c0_6, %c0_7], %7 {strides = array<i32>} : memref<128x16xf32, #tpu.memory_space<vmem>>, vector<128x16xf32>,
    %c0_i32_8 = arith.constant 0 : i32
    %9 = arith.cmpi eq, %arg2, %c0_i32_8 : i32
    %10 = arith.extui %9 : i1 to i32
    %c0_i32_9 = arith.constant 0 : i32
    %11 = arith.cmpi ne, %10, %c0_i32_9 : i32
    scf.if %11 {
      %c0_10 = arith.constant 0 : index
      %c0_11 = arith.constant 0 : index
      %12 = vector.load %arg7[%c0_10, %c0_11] : memref<128x16xf32, #tpu.memory_space<vmem>>, vector<128x16xf32>
      %c0_12 = arith.constant 0 : index
      %c0_13 = arith.constant 0 : index
      %13 = vector.load %arg5[%c0_12, %c0_13] : memref<1x16xf32, #tpu.memory_space<vmem>>, vector<1x16xf32>
      %14 = vector.broadcast %13 : vector<1x16xf32> to vector<128x16xf32>
      %15 = arith.addf %12, %14 : vector<128x16xf32>
      %c0_14 = arith.constant 0 : index
      %c0_15 = arith.constant 0 : index
      %16 = vector.load %arg6[%c0_14, %c0_15] : memref<128x16xf32, #tpu.memory_space<vmem>>, vector<128x16xf32>
      tpu.vector_store %arg6[%c0_14, %c0_15], %15 {strides = array<i32>} : memref<128x16xf32, #tpu.memory_space<vmem>>, vector<128x16xf32>,
    } else {
    }
    return
  }
  func.func @transform_0(%arg0: i32, %arg1: i32, %arg2: i32) -> (i32, i32) {
    %c0_i32 = arith.constant 0 : i32
    return %arg0, %arg2 : i32, i32
  }
  func.func @transform_1(%arg0: i32, %arg1: i32, %arg2: i32) -> (i32, i32) {
    %c0_i32 = arith.constant 0 : i32
    return %arg2, %arg1 : i32, i32
  }
  func.func @transform_2(%arg0: i32, %arg1: i32, %arg2: i32) -> (i32, i32) {
    %c0_i32 = arith.constant 0 : i32
    %c0_i32_0 = arith.constant 0 : i32
    return %c0_i32, %arg1 : i32, i32
  }
  func.func @transform_3(%arg0: i32, %arg1: i32, %arg2: i32) -> (i32, i32) {
    %c0_i32 = arith.constant 0 : i32
    return %arg0, %arg1 : i32, i32
  }
}

module attributes {stable_mosaic.version = 11 : i64} {
  func.func @_affine_kernel(%arg0: i32, %arg1: memref<128x16xf32, #tpu.memory_space<vmem>>, %arg2: memref<1x16xf32, #tpu.memory_space<vmem>>, %arg3: memref<1x16xf32, #tpu.memory_space<vmem>>, %arg4: memref<128x16xf32, #tpu.memory_space<vmem>>) attributes {dimension_semantics = [#tpu.dimension_semantics<parallel>], iteration_bounds = array<i64: 1>, scalar_prefetch = 0 : i64, scratch_operands = 0 : i64, tpu.core_type = #tpu.core_type<tc>, window_params = [{transform_indices = @transform_0, window_bounds = array<i64: 128, 16>}, {pipeline_mode = #tpu.pipeline_mode<synchronous>, transform_indices = @transform_1, window_bounds = array<i64: 1, 16>}, {pipeline_mode = #tpu.pipeline_mode<synchronous>, transform_indices = @transform_2, window_bounds = array<i64: 1, 16>}, {transform_indices = @transform_3, window_bounds = array<i64: 128, 16>}]} {
    %c0 = arith.constant 0 : index
    %c0_0 = arith.constant 0 : index
    %0 = vector.load %arg1[%c0, %c0_0] : memref<128x16xf32, #tpu.memory_space<vmem>>, vector<128x16xf32>
    %c0_1 = arith.constant 0 : index
    %c0_2 = arith.constant 0 : index
    %1 = vector.load %arg2[%c0_1, %c0_2] : memref<1x16xf32, #tpu.memory_space<vmem>>, vector<1x16xf32>
    %2 = vector.broadcast %1 : vector<1x16xf32> to vector<128x16xf32>
    %3 = arith.mulf %0, %2 : vector<128x16xf32>
    %c0_3 = arith.constant 0 : index
    %c0_4 = arith.constant 0 : index
    %4 = vector.load %arg3[%c0_3, %c0_4] : memref<1x16xf32, #tpu.memory_space<vmem>>, vector<1x16xf32>
    %5 = vector.broadcast %4 : vector<1x16xf32> to vector<128x16xf32>
    %6 = arith.addf %3, %5 : vector<128x16xf32>
    %c0_5 = arith.constant 0 : index
    %c0_6 = arith.constant 0 : index
    %7 = vector.load %arg4[%c0_5, %c0_6] : memref<128x16xf32, #tpu.memory_space<vmem>>, vector<128x16xf32>
    tpu.vector_store %arg4[%c0_5, %c0_6], %6 {strides = array<i32>} : memref<128x16xf32, #tpu.memory_space<vmem>>, vector<128x16xf32>,
    return
  }
  func.func @transform_0(%arg0: i32) -> (i32, i32) {
    %c0_i32 = arith.constant 0 : i32
    %c0_i32_0 = arith.constant 0 : i32
    return %arg0, %c0_i32 : i32, i32
  }
  func.func @transform_1(%arg0: i32) -> (i32, i32) {
    %c0_i32 = arith.constant 0 : i32
    %c0_i32_0 = arith.constant 0 : i32
    %c0_i32_1 = arith.constant 0 : i32
    return %c0_i32, %c0_i32_0 : i32, i32
  }
  func.func @transform_2(%arg0: i32) -> (i32, i32) {
    %c0_i32 = arith.constant 0 : i32
    %c0_i32_0 = arith.constant 0 : i32
    %c0_i32_1 = arith.constant 0 : i32
    return %c0_i32, %c0_i32_0 : i32, i32
  }
  func.func @transform_3(%arg0: i32) -> (i32, i32) {
    %c0_i32 = arith.constant 0 : i32
    %c0_i32_0 = arith.constant 0 : i32
    return %arg0, %c0_i32 : i32, i32
  }
}

module attributes {stable_mosaic.version = 11 : i64} {
  func.func @_matmul_kernel(%arg0: i32, %arg1: i32, %arg2: i32, %arg3: memref<32x256xbf16, #tpu.memory_space<vmem>>, %arg4: memref<256x32xbf16, #tpu.memory_space<vmem>>, %arg5: memref<1x32xf32, #tpu.memory_space<vmem>>, %arg6: memref<32x32xf32, #tpu.memory_space<vmem>>, %arg7: memref<32x32xf32, #tpu.memory_space<vmem>>) attributes {dimension_semantics = [#tpu.dimension_semantics<parallel>, #tpu.dimension_semantics<parallel>, #tpu.dimension_semantics<arbitrary>], iteration_bounds = array<i64: 1, 1, 1>, scalar_prefetch = 0 : i64, scratch_operands = 1 : i64, tpu.core_type = #tpu.core_type<tc>, window_params = [{transform_indices = @transform_0, window_bounds = array<i64: 32, 256>}, {transform_indices = @transform_1, window_bounds = array<i64: 256, 32>}, {transform_indices = @transform_2, window_bounds = array<i64: 1, 32>}, {transform_indices = @transform_3, window_bounds = array<i64: 32, 32>}]} {
    %c0_i32 = arith.constant 0 : i32
    %0 = arith.cmpi eq, %arg2, %c0_i32 : i32
    %1 = arith.extui %0 : i1 to i32
    %c0_i32_0 = arith.constant 0 : i32
    %2 = arith.cmpi ne, %1, %c0_i32_0 : i32
    scf.if %2 {
      %cst_10 = arith.constant 0.000000e+00 : f32
      %12 = vector.broadcast %cst_10 : f32 to vector<32x32xf32>
      %c0_11 = arith.constant 0 : index
      %c0_12 = arith.constant 0 : index
      %13 = vector.load %arg7[%c0_11, %c0_12] : memref<32x32xf32, #tpu.memory_space<vmem>>, vector<32x32xf32>
      tpu.vector_store %arg7[%c0_11, %c0_12], %12 {strides = array<i32>} : memref<32x32xf32, #tpu.memory_space<vmem>>, vector<32x32xf32>,
    } else {
    }
    %c0 = arith.constant 0 : index
    %c0_1 = arith.constant 0 : index
    %3 = vector.load %arg7[%c0, %c0_1] : memref<32x32xf32, #tpu.memory_space<vmem>>, vector<32x32xf32>
    %c0_2 = arith.constant 0 : index
    %c0_3 = arith.constant 0 : index
    %4 = vector.load %arg3[%c0_2, %c0_3] : memref<32x256xbf16, #tpu.memory_space<vmem>>, vector<32x256xbf16>
    %c0_4 = arith.constant 0 : index
    %c0_5 = arith.constant 0 : index
    %5 = vector.load %arg4[%c0_4, %c0_5] : memref<256x32xbf16, #tpu.memory_space<vmem>>, vector<256x32xbf16>
    %cst = arith.constant dense<0.000000e+00> : vector<32x32xf32>
    %6 = tpu.matmul %4, %5, %cst {dimension_numbers = #tpu.dot_dimension_numbers<[1], [0], [0], [1], [0, 0, 1, 1], [], []>} : vector<32x256xbf16>, vector<256x32xbf16>, vector<32x32xf32> -> vector<32x32xf32>
    %7 = arith.addf %3, %6 : vector<32x32xf32>
    %c0_6 = arith.constant 0 : index
    %c0_7 = arith.constant 0 : index
    %8 = vector.load %arg7[%c0_6, %c0_7] : memref<32x32xf32, #tpu.memory_space<vmem>>, vector<32x32xf32>
    tpu.vector_store %arg7[%c0_6, %c0_7], %7 {strides = array<i32>} : memref<32x32xf32, #tpu.memory_space<vmem>>, vector<32x32xf32>,
    %c0_i32_8 = arith.constant 0 : i32
    %9 = arith.cmpi eq, %arg2, %c0_i32_8 : i32
    %10 = arith.extui %9 : i1 to i32
    %c0_i32_9 = arith.constant 0 : i32
    %11 = arith.cmpi ne, %10, %c0_i32_9 : i32
    scf.if %11 {
      %c0_10 = arith.constant 0 : index
      %c0_11 = arith.constant 0 : index
      %12 = vector.load %arg7[%c0_10, %c0_11] : memref<32x32xf32, #tpu.memory_space<vmem>>, vector<32x32xf32>
      %c0_12 = arith.constant 0 : index
      %c0_13 = arith.constant 0 : index
      %13 = vector.load %arg5[%c0_12, %c0_13] : memref<1x32xf32, #tpu.memory_space<vmem>>, vector<1x32xf32>
      %14 = vector.broadcast %13 : vector<1x32xf32> to vector<32x32xf32>
      %15 = arith.addf %12, %14 : vector<32x32xf32>
      %c0_14 = arith.constant 0 : index
      %c0_15 = arith.constant 0 : index
      %16 = vector.load %arg6[%c0_14, %c0_15] : memref<32x32xf32, #tpu.memory_space<vmem>>, vector<32x32xf32>
      tpu.vector_store %arg6[%c0_14, %c0_15], %15 {strides = array<i32>} : memref<32x32xf32, #tpu.memory_space<vmem>>, vector<32x32xf32>,
    } else {
    }
    return
  }
  func.func @transform_0(%arg0: i32, %arg1: i32, %arg2: i32) -> (i32, i32) {
    %c0_i32 = arith.constant 0 : i32
    return %arg0, %arg2 : i32, i32
  }
  func.func @transform_1(%arg0: i32, %arg1: i32, %arg2: i32) -> (i32, i32) {
    %c0_i32 = arith.constant 0 : i32
    return %arg2, %arg1 : i32, i32
  }
  func.func @transform_2(%arg0: i32, %arg1: i32, %arg2: i32) -> (i32, i32) {
    %c0_i32 = arith.constant 0 : i32
    %c0_i32_0 = arith.constant 0 : i32
    return %c0_i32, %arg1 : i32, i32
  }
  func.func @transform_3(%arg0: i32, %arg1: i32, %arg2: i32) -> (i32, i32) {
    %c0_i32 = arith.constant 0 : i32
    return %arg0, %arg1 : i32, i32
  }
}

module attributes {stable_mosaic.version = 11 : i64} {
  func.func @_affine_kernel(%arg0: i32, %arg1: memref<32x32xf32, #tpu.memory_space<vmem>>, %arg2: memref<1x32xf32, #tpu.memory_space<vmem>>, %arg3: memref<1x32xf32, #tpu.memory_space<vmem>>, %arg4: memref<32x32xf32, #tpu.memory_space<vmem>>) attributes {dimension_semantics = [#tpu.dimension_semantics<parallel>], iteration_bounds = array<i64: 1>, scalar_prefetch = 0 : i64, scratch_operands = 0 : i64, tpu.core_type = #tpu.core_type<tc>, window_params = [{transform_indices = @transform_0, window_bounds = array<i64: 32, 32>}, {pipeline_mode = #tpu.pipeline_mode<synchronous>, transform_indices = @transform_1, window_bounds = array<i64: 1, 32>}, {pipeline_mode = #tpu.pipeline_mode<synchronous>, transform_indices = @transform_2, window_bounds = array<i64: 1, 32>}, {transform_indices = @transform_3, window_bounds = array<i64: 32, 32>}]} {
    %c0 = arith.constant 0 : index
    %c0_0 = arith.constant 0 : index
    %0 = vector.load %arg1[%c0, %c0_0] : memref<32x32xf32, #tpu.memory_space<vmem>>, vector<32x32xf32>
    %c0_1 = arith.constant 0 : index
    %c0_2 = arith.constant 0 : index
    %1 = vector.load %arg2[%c0_1, %c0_2] : memref<1x32xf32, #tpu.memory_space<vmem>>, vector<1x32xf32>
    %2 = vector.broadcast %1 : vector<1x32xf32> to vector<32x32xf32>
    %3 = arith.mulf %0, %2 : vector<32x32xf32>
    %c0_3 = arith.constant 0 : index
    %c0_4 = arith.constant 0 : index
    %4 = vector.load %arg3[%c0_3, %c0_4] : memref<1x32xf32, #tpu.memory_space<vmem>>, vector<1x32xf32>
    %5 = vector.broadcast %4 : vector<1x32xf32> to vector<32x32xf32>
    %6 = arith.addf %3, %5 : vector<32x32xf32>
    %c0_5 = arith.constant 0 : index
    %c0_6 = arith.constant 0 : index
    %7 = vector.load %arg4[%c0_5, %c0_6] : memref<32x32xf32, #tpu.memory_space<vmem>>, vector<32x32xf32>
    tpu.vector_store %arg4[%c0_5, %c0_6], %6 {strides = array<i32>} : memref<32x32xf32, #tpu.memory_space<vmem>>, vector<32x32xf32>,
    return
  }
  func.func @transform_0(%arg0: i32) -> (i32, i32) {
    %c0_i32 = arith.constant 0 : i32
    %c0_i32_0 = arith.constant 0 : i32
    return %arg0, %c0_i32 : i32, i32
  }
  func.func @transform_1(%arg0: i32) -> (i32, i32) {
    %c0_i32 = arith.constant 0 : i32
    %c0_i32_0 = arith.constant 0 : i32
    %c0_i32_1 = arith.constant 0 : i32
    return %c0_i32, %c0_i32_0 : i32, i32
  }
  func.func @transform_2(%arg0: i32) -> (i32, i32) {
    %c0_i32 = arith.constant 0 : i32
    %c0_i32_0 = arith.constant 0 : i32
    %c0_i32_1 = arith.constant 0 : i32
    return %c0_i32, %c0_i32_0 : i32, i32
  }
  func.func @transform_3(%arg0: i32) -> (i32, i32) {
    %c0_i32 = arith.constant 0 : i32
    %c0_i32_0 = arith.constant 0 : i32
    return %arg0, %c0_i32 : i32, i32
  }
}

module attributes {stable_mosaic.version = 11 : i64} {
  func.func @_matmul_kernel(%arg0: i32, %arg1: i32, %arg2: i32, %arg3: memref<8x512xbf16, #tpu.memory_space<vmem>>, %arg4: memref<512x64xbf16, #tpu.memory_space<vmem>>, %arg5: memref<1x64xf32, #tpu.memory_space<vmem>>, %arg6: memref<8x64xf32, #tpu.memory_space<vmem>>, %arg7: memref<8x64xf32, #tpu.memory_space<vmem>>) attributes {dimension_semantics = [#tpu.dimension_semantics<parallel>, #tpu.dimension_semantics<parallel>, #tpu.dimension_semantics<arbitrary>], iteration_bounds = array<i64: 1, 1, 1>, scalar_prefetch = 0 : i64, scratch_operands = 1 : i64, tpu.core_type = #tpu.core_type<tc>, window_params = [{transform_indices = @transform_0, window_bounds = array<i64: 8, 512>}, {transform_indices = @transform_1, window_bounds = array<i64: 512, 64>}, {transform_indices = @transform_2, window_bounds = array<i64: 1, 64>}, {transform_indices = @transform_3, window_bounds = array<i64: 8, 64>}]} {
    %c0_i32 = arith.constant 0 : i32
    %0 = arith.cmpi eq, %arg2, %c0_i32 : i32
    %1 = arith.extui %0 : i1 to i32
    %c0_i32_0 = arith.constant 0 : i32
    %2 = arith.cmpi ne, %1, %c0_i32_0 : i32
    scf.if %2 {
      %cst_10 = arith.constant 0.000000e+00 : f32
      %12 = vector.broadcast %cst_10 : f32 to vector<8x64xf32>
      %c0_11 = arith.constant 0 : index
      %c0_12 = arith.constant 0 : index
      %13 = vector.load %arg7[%c0_11, %c0_12] : memref<8x64xf32, #tpu.memory_space<vmem>>, vector<8x64xf32>
      tpu.vector_store %arg7[%c0_11, %c0_12], %12 {strides = array<i32>} : memref<8x64xf32, #tpu.memory_space<vmem>>, vector<8x64xf32>,
    } else {
    }
    %c0 = arith.constant 0 : index
    %c0_1 = arith.constant 0 : index
    %3 = vector.load %arg7[%c0, %c0_1] : memref<8x64xf32, #tpu.memory_space<vmem>>, vector<8x64xf32>
    %c0_2 = arith.constant 0 : index
    %c0_3 = arith.constant 0 : index
    %4 = vector.load %arg3[%c0_2, %c0_3] : memref<8x512xbf16, #tpu.memory_space<vmem>>, vector<8x512xbf16>
    %c0_4 = arith.constant 0 : index
    %c0_5 = arith.constant 0 : index
    %5 = vector.load %arg4[%c0_4, %c0_5] : memref<512x64xbf16, #tpu.memory_space<vmem>>, vector<512x64xbf16>
    %cst = arith.constant dense<0.000000e+00> : vector<8x64xf32>
    %6 = tpu.matmul %4, %5, %cst {dimension_numbers = #tpu.dot_dimension_numbers<[1], [0], [0], [1], [0, 0, 1, 1], [], []>} : vector<8x512xbf16>, vector<512x64xbf16>, vector<8x64xf32> -> vector<8x64xf32>
    %7 = arith.addf %3, %6 : vector<8x64xf32>
    %c0_6 = arith.constant 0 : index
    %c0_7 = arith.constant 0 : index
    %8 = vector.load %arg7[%c0_6, %c0_7] : memref<8x64xf32, #tpu.memory_space<vmem>>, vector<8x64xf32>
    tpu.vector_store %arg7[%c0_6, %c0_7], %7 {strides = array<i32>} : memref<8x64xf32, #tpu.memory_space<vmem>>, vector<8x64xf32>,
    %c0_i32_8 = arith.constant 0 : i32
    %9 = arith.cmpi eq, %arg2, %c0_i32_8 : i32
    %10 = arith.extui %9 : i1 to i32
    %c0_i32_9 = arith.constant 0 : i32
    %11 = arith.cmpi ne, %10, %c0_i32_9 : i32
    scf.if %11 {
      %c0_10 = arith.constant 0 : index
      %c0_11 = arith.constant 0 : index
      %12 = vector.load %arg7[%c0_10, %c0_11] : memref<8x64xf32, #tpu.memory_space<vmem>>, vector<8x64xf32>
      %c0_12 = arith.constant 0 : index
      %c0_13 = arith.constant 0 : index
      %13 = vector.load %arg5[%c0_12, %c0_13] : memref<1x64xf32, #tpu.memory_space<vmem>>, vector<1x64xf32>
      %14 = vector.broadcast %13 : vector<1x64xf32> to vector<8x64xf32>
      %15 = arith.addf %12, %14 : vector<8x64xf32>
      %c0_14 = arith.constant 0 : index
      %c0_15 = arith.constant 0 : index
      %16 = vector.load %arg6[%c0_14, %c0_15] : memref<8x64xf32, #tpu.memory_space<vmem>>, vector<8x64xf32>
      tpu.vector_store %arg6[%c0_14, %c0_15], %15 {strides = array<i32>} : memref<8x64xf32, #tpu.memory_space<vmem>>, vector<8x64xf32>,
    } else {
    }
    return
  }
  func.func @transform_0(%arg0: i32, %arg1: i32, %arg2: i32) -> (i32, i32) {
    %c0_i32 = arith.constant 0 : i32
    return %arg0, %arg2 : i32, i32
  }
  func.func @transform_1(%arg0: i32, %arg1: i32, %arg2: i32) -> (i32, i32) {
    %c0_i32 = arith.constant 0 : i32
    return %arg2, %arg1 : i32, i32
  }
  func.func @transform_2(%arg0: i32, %arg1: i32, %arg2: i32) -> (i32, i32) {
    %c0_i32 = arith.constant 0 : i32
    %c0_i32_0 = arith.constant 0 : i32
    return %c0_i32, %arg1 : i32, i32
  }
  func.func @transform_3(%arg0: i32, %arg1: i32, %arg2: i32) -> (i32, i32) {
    %c0_i32 = arith.constant 0 : i32
    return %arg0, %arg1 : i32, i32
  }
}

module attributes {stable_mosaic.version = 11 : i64} {
  func.func @_affine_kernel(%arg0: i32, %arg1: memref<8x64xf32, #tpu.memory_space<vmem>>, %arg2: memref<1x64xf32, #tpu.memory_space<vmem>>, %arg3: memref<1x64xf32, #tpu.memory_space<vmem>>, %arg4: memref<8x64xf32, #tpu.memory_space<vmem>>) attributes {dimension_semantics = [#tpu.dimension_semantics<parallel>], iteration_bounds = array<i64: 1>, scalar_prefetch = 0 : i64, scratch_operands = 0 : i64, tpu.core_type = #tpu.core_type<tc>, window_params = [{transform_indices = @transform_0, window_bounds = array<i64: 8, 64>}, {pipeline_mode = #tpu.pipeline_mode<synchronous>, transform_indices = @transform_1, window_bounds = array<i64: 1, 64>}, {pipeline_mode = #tpu.pipeline_mode<synchronous>, transform_indices = @transform_2, window_bounds = array<i64: 1, 64>}, {transform_indices = @transform_3, window_bounds = array<i64: 8, 64>}]} {
    %c0 = arith.constant 0 : index
    %c0_0 = arith.constant 0 : index
    %0 = vector.load %arg1[%c0, %c0_0] : memref<8x64xf32, #tpu.memory_space<vmem>>, vector<8x64xf32>
    %c0_1 = arith.constant 0 : index
    %c0_2 = arith.constant 0 : index
    %1 = vector.load %arg2[%c0_1, %c0_2] : memref<1x64xf32, #tpu.memory_space<vmem>>, vector<1x64xf32>
    %2 = vector.broadcast %1 : vector<1x64xf32> to vector<8x64xf32>
    %3 = arith.mulf %0, %2 : vector<8x64xf32>
    %c0_3 = arith.constant 0 : index
    %c0_4 = arith.constant 0 : index
    %4 = vector.load %arg3[%c0_3, %c0_4] : memref<1x64xf32, #tpu.memory_space<vmem>>, vector<1x64xf32>
    %5 = vector.broadcast %4 : vector<1x64xf32> to vector<8x64xf32>
    %6 = arith.addf %3, %5 : vector<8x64xf32>
    %c0_5 = arith.constant 0 : index
    %c0_6 = arith.constant 0 : index
    %7 = vector.load %arg4[%c0_5, %c0_6] : memref<8x64xf32, #tpu.memory_space<vmem>>, vector<8x64xf32>
    tpu.vector_store %arg4[%c0_5, %c0_6], %6 {strides = array<i32>} : memref<8x64xf32, #tpu.memory_space<vmem>>, vector<8x64xf32>,
    return
  }
  func.func @transform_0(%arg0: i32) -> (i32, i32) {
    %c0_i32 = arith.constant 0 : i32
    %c0_i32_0 = arith.constant 0 : i32
    return %arg0, %c0_i32 : i32, i32
  }
  func.func @transform_1(%arg0: i32) -> (i32, i32) {
    %c0_i32 = arith.constant 0 : i32
    %c0_i32_0 = arith.constant 0 : i32
    %c0_i32_1 = arith.constant 0 : i32
    return %c0_i32, %c0_i32_0 : i32, i32
  }
  func.func @transform_2(%arg0: i32) -> (i32, i32) {
    %c0_i32 = arith.constant 0 : i32
    %c0_i32_0 = arith.constant 0 : i32
    %c0_i32_1 = arith.constant 0 : i32
    return %c0_i32, %c0_i32_0 : i32, i32
  }
  func.func @transform_3(%arg0: i32) -> (i32, i32) {
    %c0_i32 = arith.constant 0 : i32
    %c0_i32_0 = arith.constant 0 : i32
    return %arg0, %c0_i32 : i32, i32
  }
}

module attributes {stable_mosaic.version = 11 : i64} {
  func.func @_matmul_kernel(%arg0: i32, %arg1: i32, %arg2: i32, %arg3: memref<2x1024xbf16, #tpu.memory_space<vmem>>, %arg4: memref<1024x64xbf16, #tpu.memory_space<vmem>>, %arg5: memref<1x64xf32, #tpu.memory_space<vmem>>, %arg6: memref<2x64xf32, #tpu.memory_space<vmem>>, %arg7: memref<2x64xf32, #tpu.memory_space<vmem>>) attributes {dimension_semantics = [#tpu.dimension_semantics<parallel>, #tpu.dimension_semantics<parallel>, #tpu.dimension_semantics<arbitrary>], iteration_bounds = array<i64: 1, 1, 1>, scalar_prefetch = 0 : i64, scratch_operands = 1 : i64, tpu.core_type = #tpu.core_type<tc>, window_params = [{transform_indices = @transform_0, window_bounds = array<i64: 2, 1024>}, {transform_indices = @transform_1, window_bounds = array<i64: 1024, 64>}, {transform_indices = @transform_2, window_bounds = array<i64: 1, 64>}, {transform_indices = @transform_3, window_bounds = array<i64: 2, 64>}]} {
    %c0_i32 = arith.constant 0 : i32
    %0 = arith.cmpi eq, %arg2, %c0_i32 : i32
    %1 = arith.extui %0 : i1 to i32
    %c0_i32_0 = arith.constant 0 : i32
    %2 = arith.cmpi ne, %1, %c0_i32_0 : i32
    scf.if %2 {
      %cst_10 = arith.constant 0.000000e+00 : f32
      %12 = vector.broadcast %cst_10 : f32 to vector<2x64xf32>
      %c0_11 = arith.constant 0 : index
      %c0_12 = arith.constant 0 : index
      %13 = vector.load %arg7[%c0_11, %c0_12] : memref<2x64xf32, #tpu.memory_space<vmem>>, vector<2x64xf32>
      tpu.vector_store %arg7[%c0_11, %c0_12], %12 {strides = array<i32>} : memref<2x64xf32, #tpu.memory_space<vmem>>, vector<2x64xf32>,
    } else {
    }
    %c0 = arith.constant 0 : index
    %c0_1 = arith.constant 0 : index
    %3 = vector.load %arg7[%c0, %c0_1] : memref<2x64xf32, #tpu.memory_space<vmem>>, vector<2x64xf32>
    %c0_2 = arith.constant 0 : index
    %c0_3 = arith.constant 0 : index
    %4 = vector.load %arg3[%c0_2, %c0_3] : memref<2x1024xbf16, #tpu.memory_space<vmem>>, vector<2x1024xbf16>
    %c0_4 = arith.constant 0 : index
    %c0_5 = arith.constant 0 : index
    %5 = vector.load %arg4[%c0_4, %c0_5] : memref<1024x64xbf16, #tpu.memory_space<vmem>>, vector<1024x64xbf16>
    %cst = arith.constant dense<0.000000e+00> : vector<2x64xf32>
    %6 = tpu.matmul %4, %5, %cst {dimension_numbers = #tpu.dot_dimension_numbers<[1], [0], [0], [1], [0, 0, 1, 1], [], []>} : vector<2x1024xbf16>, vector<1024x64xbf16>, vector<2x64xf32> -> vector<2x64xf32>
    %7 = arith.addf %3, %6 : vector<2x64xf32>
    %c0_6 = arith.constant 0 : index
    %c0_7 = arith.constant 0 : index
    %8 = vector.load %arg7[%c0_6, %c0_7] : memref<2x64xf32, #tpu.memory_space<vmem>>, vector<2x64xf32>
    tpu.vector_store %arg7[%c0_6, %c0_7], %7 {strides = array<i32>} : memref<2x64xf32, #tpu.memory_space<vmem>>, vector<2x64xf32>,
    %c0_i32_8 = arith.constant 0 : i32
    %9 = arith.cmpi eq, %arg2, %c0_i32_8 : i32
    %10 = arith.extui %9 : i1 to i32
    %c0_i32_9 = arith.constant 0 : i32
    %11 = arith.cmpi ne, %10, %c0_i32_9 : i32
    scf.if %11 {
      %c0_10 = arith.constant 0 : index
      %c0_11 = arith.constant 0 : index
      %12 = vector.load %arg7[%c0_10, %c0_11] : memref<2x64xf32, #tpu.memory_space<vmem>>, vector<2x64xf32>
      %c0_12 = arith.constant 0 : index
      %c0_13 = arith.constant 0 : index
      %13 = vector.load %arg5[%c0_12, %c0_13] : memref<1x64xf32, #tpu.memory_space<vmem>>, vector<1x64xf32>
      %14 = vector.broadcast %13 : vector<1x64xf32> to vector<2x64xf32>
      %15 = arith.addf %12, %14 : vector<2x64xf32>
      %c0_14 = arith.constant 0 : index
      %c0_15 = arith.constant 0 : index
      %16 = vector.load %arg6[%c0_14, %c0_15] : memref<2x64xf32, #tpu.memory_space<vmem>>, vector<2x64xf32>
      tpu.vector_store %arg6[%c0_14, %c0_15], %15 {strides = array<i32>} : memref<2x64xf32, #tpu.memory_space<vmem>>, vector<2x64xf32>,
    } else {
    }
    return
  }
  func.func @transform_0(%arg0: i32, %arg1: i32, %arg2: i32) -> (i32, i32) {
    %c0_i32 = arith.constant 0 : i32
    return %arg0, %arg2 : i32, i32
  }
  func.func @transform_1(%arg0: i32, %arg1: i32, %arg2: i32) -> (i32, i32) {
    %c0_i32 = arith.constant 0 : i32
    return %arg2, %arg1 : i32, i32
  }
  func.func @transform_2(%arg0: i32, %arg1: i32, %arg2: i32) -> (i32, i32) {
    %c0_i32 = arith.constant 0 : i32
    %c0_i32_0 = arith.constant 0 : i32
    return %c0_i32, %arg1 : i32, i32
  }
  func.func @transform_3(%arg0: i32, %arg1: i32, %arg2: i32) -> (i32, i32) {
    %c0_i32 = arith.constant 0 : i32
    return %arg0, %arg1 : i32, i32
  }
}

module attributes {stable_mosaic.version = 11 : i64} {
  func.func @_matmul_kernel(%arg0: i32, %arg1: i32, %arg2: i32, %arg3: memref<2x576xbf16, #tpu.memory_space<vmem>>, %arg4: memref<576x256xbf16, #tpu.memory_space<vmem>>, %arg5: memref<1x256xf32, #tpu.memory_space<vmem>>, %arg6: memref<2x256xf32, #tpu.memory_space<vmem>>, %arg7: memref<2x256xf32, #tpu.memory_space<vmem>>) attributes {dimension_semantics = [#tpu.dimension_semantics<parallel>, #tpu.dimension_semantics<parallel>, #tpu.dimension_semantics<arbitrary>], iteration_bounds = array<i64: 1, 1, 1>, scalar_prefetch = 0 : i64, scratch_operands = 1 : i64, tpu.core_type = #tpu.core_type<tc>, window_params = [{transform_indices = @transform_0, window_bounds = array<i64: 2, 576>}, {transform_indices = @transform_1, window_bounds = array<i64: 576, 256>}, {transform_indices = @transform_2, window_bounds = array<i64: 1, 256>}, {transform_indices = @transform_3, window_bounds = array<i64: 2, 256>}]} {
    %c0_i32 = arith.constant 0 : i32
    %0 = arith.cmpi eq, %arg2, %c0_i32 : i32
    %1 = arith.extui %0 : i1 to i32
    %c0_i32_0 = arith.constant 0 : i32
    %2 = arith.cmpi ne, %1, %c0_i32_0 : i32
    scf.if %2 {
      %cst_10 = arith.constant 0.000000e+00 : f32
      %12 = vector.broadcast %cst_10 : f32 to vector<2x256xf32>
      %c0_11 = arith.constant 0 : index
      %c0_12 = arith.constant 0 : index
      %13 = vector.load %arg7[%c0_11, %c0_12] : memref<2x256xf32, #tpu.memory_space<vmem>>, vector<2x256xf32>
      tpu.vector_store %arg7[%c0_11, %c0_12], %12 {strides = array<i32>} : memref<2x256xf32, #tpu.memory_space<vmem>>, vector<2x256xf32>,
    } else {
    }
    %c0 = arith.constant 0 : index
    %c0_1 = arith.constant 0 : index
    %3 = vector.load %arg7[%c0, %c0_1] : memref<2x256xf32, #tpu.memory_space<vmem>>, vector<2x256xf32>
    %c0_2 = arith.constant 0 : index
    %c0_3 = arith.constant 0 : index
    %4 = vector.load %arg3[%c0_2, %c0_3] : memref<2x576xbf16, #tpu.memory_space<vmem>>, vector<2x576xbf16>
    %c0_4 = arith.constant 0 : index
    %c0_5 = arith.constant 0 : index
    %5 = vector.load %arg4[%c0_4, %c0_5] : memref<576x256xbf16, #tpu.memory_space<vmem>>, vector<576x256xbf16>
    %cst = arith.constant dense<0.000000e+00> : vector<2x256xf32>
    %6 = tpu.matmul %4, %5, %cst {dimension_numbers = #tpu.dot_dimension_numbers<[1], [0], [0], [1], [0, 0, 1, 1], [], []>} : vector<2x576xbf16>, vector<576x256xbf16>, vector<2x256xf32> -> vector<2x256xf32>
    %7 = arith.addf %3, %6 : vector<2x256xf32>
    %c0_6 = arith.constant 0 : index
    %c0_7 = arith.constant 0 : index
    %8 = vector.load %arg7[%c0_6, %c0_7] : memref<2x256xf32, #tpu.memory_space<vmem>>, vector<2x256xf32>
    tpu.vector_store %arg7[%c0_6, %c0_7], %7 {strides = array<i32>} : memref<2x256xf32, #tpu.memory_space<vmem>>, vector<2x256xf32>,
    %c0_i32_8 = arith.constant 0 : i32
    %9 = arith.cmpi eq, %arg2, %c0_i32_8 : i32
    %10 = arith.extui %9 : i1 to i32
    %c0_i32_9 = arith.constant 0 : i32
    %11 = arith.cmpi ne, %10, %c0_i32_9 : i32
    scf.if %11 {
      %c0_10 = arith.constant 0 : index
      %c0_11 = arith.constant 0 : index
      %12 = vector.load %arg7[%c0_10, %c0_11] : memref<2x256xf32, #tpu.memory_space<vmem>>, vector<2x256xf32>
      %c0_12 = arith.constant 0 : index
      %c0_13 = arith.constant 0 : index
      %13 = vector.load %arg5[%c0_12, %c0_13] : memref<1x256xf32, #tpu.memory_space<vmem>>, vector<1x256xf32>
      %14 = vector.broadcast %13 : vector<1x256xf32> to vector<2x256xf32>
      %15 = arith.addf %12, %14 : vector<2x256xf32>
      %c0_14 = arith.constant 0 : index
      %c0_15 = arith.constant 0 : index
      %16 = vector.load %arg6[%c0_14, %c0_15] : memref<2x256xf32, #tpu.memory_space<vmem>>, vector<2x256xf32>
      tpu.vector_store %arg6[%c0_14, %c0_15], %15 {strides = array<i32>} : memref<2x256xf32, #tpu.memory_space<vmem>>, vector<2x256xf32>,
    } else {
    }
    return
  }
  func.func @transform_0(%arg0: i32, %arg1: i32, %arg2: i32) -> (i32, i32) {
    %c0_i32 = arith.constant 0 : i32
    return %arg0, %arg2 : i32, i32
  }
  func.func @transform_1(%arg0: i32, %arg1: i32, %arg2: i32) -> (i32, i32) {
    %c0_i32 = arith.constant 0 : i32
    return %arg2, %arg1 : i32, i32
  }
  func.func @transform_2(%arg0: i32, %arg1: i32, %arg2: i32) -> (i32, i32) {
    %c0_i32 = arith.constant 0 : i32
    %c0_i32_0 = arith.constant 0 : i32
    return %c0_i32, %arg1 : i32, i32
  }
  func.func @transform_3(%arg0: i32, %arg1: i32, %arg2: i32) -> (i32, i32) {
    %c0_i32 = arith.constant 0 : i32
    return %arg0, %arg1 : i32, i32
  }
}

module attributes {stable_mosaic.version = 11 : i64} {
  func.func @_matmul_kernel(%arg0: i32, %arg1: i32, %arg2: i32, %arg3: memref<8x1152xbf16, #tpu.memory_space<vmem>>, %arg4: memref<1152x128xbf16, #tpu.memory_space<vmem>>, %arg5: memref<1x128xf32, #tpu.memory_space<vmem>>, %arg6: memref<8x128xf32, #tpu.memory_space<vmem>>, %arg7: memref<8x128xf32, #tpu.memory_space<vmem>>) attributes {dimension_semantics = [#tpu.dimension_semantics<parallel>, #tpu.dimension_semantics<parallel>, #tpu.dimension_semantics<arbitrary>], iteration_bounds = array<i64: 1, 1, 1>, scalar_prefetch = 0 : i64, scratch_operands = 1 : i64, tpu.core_type = #tpu.core_type<tc>, window_params = [{transform_indices = @transform_0, window_bounds = array<i64: 8, 1152>}, {transform_indices = @transform_1, window_bounds = array<i64: 1152, 128>}, {transform_indices = @transform_2, window_bounds = array<i64: 1, 128>}, {transform_indices = @transform_3, window_bounds = array<i64: 8, 128>}]} {
    %c0_i32 = arith.constant 0 : i32
    %0 = arith.cmpi eq, %arg2, %c0_i32 : i32
    %1 = arith.extui %0 : i1 to i32
    %c0_i32_0 = arith.constant 0 : i32
    %2 = arith.cmpi ne, %1, %c0_i32_0 : i32
    scf.if %2 {
      %cst_10 = arith.constant 0.000000e+00 : f32
      %12 = vector.broadcast %cst_10 : f32 to vector<8x128xf32>
      %c0_11 = arith.constant 0 : index
      %c0_12 = arith.constant 0 : index
      %13 = vector.load %arg7[%c0_11, %c0_12] : memref<8x128xf32, #tpu.memory_space<vmem>>, vector<8x128xf32>
      tpu.vector_store %arg7[%c0_11, %c0_12], %12 {strides = array<i32>} : memref<8x128xf32, #tpu.memory_space<vmem>>, vector<8x128xf32>,
    } else {
    }
    %c0 = arith.constant 0 : index
    %c0_1 = arith.constant 0 : index
    %3 = vector.load %arg7[%c0, %c0_1] : memref<8x128xf32, #tpu.memory_space<vmem>>, vector<8x128xf32>
    %c0_2 = arith.constant 0 : index
    %c0_3 = arith.constant 0 : index
    %4 = vector.load %arg3[%c0_2, %c0_3] : memref<8x1152xbf16, #tpu.memory_space<vmem>>, vector<8x1152xbf16>
    %c0_4 = arith.constant 0 : index
    %c0_5 = arith.constant 0 : index
    %5 = vector.load %arg4[%c0_4, %c0_5] : memref<1152x128xbf16, #tpu.memory_space<vmem>>, vector<1152x128xbf16>
    %cst = arith.constant dense<0.000000e+00> : vector<8x128xf32>
    %6 = tpu.matmul %4, %5, %cst {dimension_numbers = #tpu.dot_dimension_numbers<[1], [0], [0], [1], [0, 0, 1, 1], [], []>} : vector<8x1152xbf16>, vector<1152x128xbf16>, vector<8x128xf32> -> vector<8x128xf32>
    %7 = arith.addf %3, %6 : vector<8x128xf32>
    %c0_6 = arith.constant 0 : index
    %c0_7 = arith.constant 0 : index
    %8 = vector.load %arg7[%c0_6, %c0_7] : memref<8x128xf32, #tpu.memory_space<vmem>>, vector<8x128xf32>
    tpu.vector_store %arg7[%c0_6, %c0_7], %7 {strides = array<i32>} : memref<8x128xf32, #tpu.memory_space<vmem>>, vector<8x128xf32>,
    %c0_i32_8 = arith.constant 0 : i32
    %9 = arith.cmpi eq, %arg2, %c0_i32_8 : i32
    %10 = arith.extui %9 : i1 to i32
    %c0_i32_9 = arith.constant 0 : i32
    %11 = arith.cmpi ne, %10, %c0_i32_9 : i32
    scf.if %11 {
      %c0_10 = arith.constant 0 : index
      %c0_11 = arith.constant 0 : index
      %12 = vector.load %arg7[%c0_10, %c0_11] : memref<8x128xf32, #tpu.memory_space<vmem>>, vector<8x128xf32>
      %c0_12 = arith.constant 0 : index
      %c0_13 = arith.constant 0 : index
      %13 = vector.load %arg5[%c0_12, %c0_13] : memref<1x128xf32, #tpu.memory_space<vmem>>, vector<1x128xf32>
      %14 = vector.broadcast %13 : vector<1x128xf32> to vector<8x128xf32>
      %15 = arith.addf %12, %14 : vector<8x128xf32>
      %c0_14 = arith.constant 0 : index
      %c0_15 = arith.constant 0 : index
      %16 = vector.load %arg6[%c0_14, %c0_15] : memref<8x128xf32, #tpu.memory_space<vmem>>, vector<8x128xf32>
      tpu.vector_store %arg6[%c0_14, %c0_15], %15 {strides = array<i32>} : memref<8x128xf32, #tpu.memory_space<vmem>>, vector<8x128xf32>,
    } else {
    }
    return
  }
  func.func @transform_0(%arg0: i32, %arg1: i32, %arg2: i32) -> (i32, i32) {
    %c0_i32 = arith.constant 0 : i32
    return %arg0, %arg2 : i32, i32
  }
  func.func @transform_1(%arg0: i32, %arg1: i32, %arg2: i32) -> (i32, i32) {
    %c0_i32 = arith.constant 0 : i32
    return %arg2, %arg1 : i32, i32
  }
  func.func @transform_2(%arg0: i32, %arg1: i32, %arg2: i32) -> (i32, i32) {
    %c0_i32 = arith.constant 0 : i32
    %c0_i32_0 = arith.constant 0 : i32
    return %c0_i32, %arg1 : i32, i32
  }
  func.func @transform_3(%arg0: i32, %arg1: i32, %arg2: i32) -> (i32, i32) {
    %c0_i32 = arith.constant 0 : i32
    return %arg0, %arg1 : i32, i32
  }
}

module attributes {stable_mosaic.version = 11 : i64} {
  func.func @_matmul_kernel(%arg0: i32, %arg1: i32, %arg2: i32, %arg3: memref<32x576xbf16, #tpu.memory_space<vmem>>, %arg4: memref<576x64xbf16, #tpu.memory_space<vmem>>, %arg5: memref<1x64xf32, #tpu.memory_space<vmem>>, %arg6: memref<32x64xf32, #tpu.memory_space<vmem>>, %arg7: memref<32x64xf32, #tpu.memory_space<vmem>>) attributes {dimension_semantics = [#tpu.dimension_semantics<parallel>, #tpu.dimension_semantics<parallel>, #tpu.dimension_semantics<arbitrary>], iteration_bounds = array<i64: 1, 1, 1>, scalar_prefetch = 0 : i64, scratch_operands = 1 : i64, tpu.core_type = #tpu.core_type<tc>, window_params = [{transform_indices = @transform_0, window_bounds = array<i64: 32, 576>}, {transform_indices = @transform_1, window_bounds = array<i64: 576, 64>}, {transform_indices = @transform_2, window_bounds = array<i64: 1, 64>}, {transform_indices = @transform_3, window_bounds = array<i64: 32, 64>}]} {
    %c0_i32 = arith.constant 0 : i32
    %0 = arith.cmpi eq, %arg2, %c0_i32 : i32
    %1 = arith.extui %0 : i1 to i32
    %c0_i32_0 = arith.constant 0 : i32
    %2 = arith.cmpi ne, %1, %c0_i32_0 : i32
    scf.if %2 {
      %cst_10 = arith.constant 0.000000e+00 : f32
      %12 = vector.broadcast %cst_10 : f32 to vector<32x64xf32>
      %c0_11 = arith.constant 0 : index
      %c0_12 = arith.constant 0 : index
      %13 = vector.load %arg7[%c0_11, %c0_12] : memref<32x64xf32, #tpu.memory_space<vmem>>, vector<32x64xf32>
      tpu.vector_store %arg7[%c0_11, %c0_12], %12 {strides = array<i32>} : memref<32x64xf32, #tpu.memory_space<vmem>>, vector<32x64xf32>,
    } else {
    }
    %c0 = arith.constant 0 : index
    %c0_1 = arith.constant 0 : index
    %3 = vector.load %arg7[%c0, %c0_1] : memref<32x64xf32, #tpu.memory_space<vmem>>, vector<32x64xf32>
    %c0_2 = arith.constant 0 : index
    %c0_3 = arith.constant 0 : index
    %4 = vector.load %arg3[%c0_2, %c0_3] : memref<32x576xbf16, #tpu.memory_space<vmem>>, vector<32x576xbf16>
    %c0_4 = arith.constant 0 : index
    %c0_5 = arith.constant 0 : index
    %5 = vector.load %arg4[%c0_4, %c0_5] : memref<576x64xbf16, #tpu.memory_space<vmem>>, vector<576x64xbf16>
    %cst = arith.constant dense<0.000000e+00> : vector<32x64xf32>
    %6 = tpu.matmul %4, %5, %cst {dimension_numbers = #tpu.dot_dimension_numbers<[1], [0], [0], [1], [0, 0, 1, 1], [], []>} : vector<32x576xbf16>, vector<576x64xbf16>, vector<32x64xf32> -> vector<32x64xf32>
    %7 = arith.addf %3, %6 : vector<32x64xf32>
    %c0_6 = arith.constant 0 : index
    %c0_7 = arith.constant 0 : index
    %8 = vector.load %arg7[%c0_6, %c0_7] : memref<32x64xf32, #tpu.memory_space<vmem>>, vector<32x64xf32>
    tpu.vector_store %arg7[%c0_6, %c0_7], %7 {strides = array<i32>} : memref<32x64xf32, #tpu.memory_space<vmem>>, vector<32x64xf32>,
    %c0_i32_8 = arith.constant 0 : i32
    %9 = arith.cmpi eq, %arg2, %c0_i32_8 : i32
    %10 = arith.extui %9 : i1 to i32
    %c0_i32_9 = arith.constant 0 : i32
    %11 = arith.cmpi ne, %10, %c0_i32_9 : i32
    scf.if %11 {
      %c0_10 = arith.constant 0 : index
      %c0_11 = arith.constant 0 : index
      %12 = vector.load %arg7[%c0_10, %c0_11] : memref<32x64xf32, #tpu.memory_space<vmem>>, vector<32x64xf32>
      %c0_12 = arith.constant 0 : index
      %c0_13 = arith.constant 0 : index
      %13 = vector.load %arg5[%c0_12, %c0_13] : memref<1x64xf32, #tpu.memory_space<vmem>>, vector<1x64xf32>
      %14 = vector.broadcast %13 : vector<1x64xf32> to vector<32x64xf32>
      %15 = arith.addf %12, %14 : vector<32x64xf32>
      %c0_14 = arith.constant 0 : index
      %c0_15 = arith.constant 0 : index
      %16 = vector.load %arg6[%c0_14, %c0_15] : memref<32x64xf32, #tpu.memory_space<vmem>>, vector<32x64xf32>
      tpu.vector_store %arg6[%c0_14, %c0_15], %15 {strides = array<i32>} : memref<32x64xf32, #tpu.memory_space<vmem>>, vector<32x64xf32>,
    } else {
    }
    return
  }
  func.func @transform_0(%arg0: i32, %arg1: i32, %arg2: i32) -> (i32, i32) {
    %c0_i32 = arith.constant 0 : i32
    return %arg0, %arg2 : i32, i32
  }
  func.func @transform_1(%arg0: i32, %arg1: i32, %arg2: i32) -> (i32, i32) {
    %c0_i32 = arith.constant 0 : i32
    return %arg2, %arg1 : i32, i32
  }
  func.func @transform_2(%arg0: i32, %arg1: i32, %arg2: i32) -> (i32, i32) {
    %c0_i32 = arith.constant 0 : i32
    %c0_i32_0 = arith.constant 0 : i32
    return %c0_i32, %arg1 : i32, i32
  }
  func.func @transform_3(%arg0: i32, %arg1: i32, %arg2: i32) -> (i32, i32) {
    %c0_i32 = arith.constant 0 : i32
    return %arg0, %arg1 : i32, i32
  }
}

module attributes {stable_mosaic.version = 11 : i64} {
  func.func @_matmul_kernel(%arg0: i32, %arg1: i32, %arg2: i32, %arg3: memref<128x288xbf16, #tpu.memory_space<vmem>>, %arg4: memref<288x32xbf16, #tpu.memory_space<vmem>>, %arg5: memref<1x32xf32, #tpu.memory_space<vmem>>, %arg6: memref<128x32xf32, #tpu.memory_space<vmem>>, %arg7: memref<128x32xf32, #tpu.memory_space<vmem>>) attributes {dimension_semantics = [#tpu.dimension_semantics<parallel>, #tpu.dimension_semantics<parallel>, #tpu.dimension_semantics<arbitrary>], iteration_bounds = array<i64: 1, 1, 1>, scalar_prefetch = 0 : i64, scratch_operands = 1 : i64, tpu.core_type = #tpu.core_type<tc>, window_params = [{transform_indices = @transform_0, window_bounds = array<i64: 128, 288>}, {transform_indices = @transform_1, window_bounds = array<i64: 288, 32>}, {transform_indices = @transform_2, window_bounds = array<i64: 1, 32>}, {transform_indices = @transform_3, window_bounds = array<i64: 128, 32>}]} {
    %c0_i32 = arith.constant 0 : i32
    %0 = arith.cmpi eq, %arg2, %c0_i32 : i32
    %1 = arith.extui %0 : i1 to i32
    %c0_i32_0 = arith.constant 0 : i32
    %2 = arith.cmpi ne, %1, %c0_i32_0 : i32
    scf.if %2 {
      %cst_10 = arith.constant 0.000000e+00 : f32
      %12 = vector.broadcast %cst_10 : f32 to vector<128x32xf32>
      %c0_11 = arith.constant 0 : index
      %c0_12 = arith.constant 0 : index
      %13 = vector.load %arg7[%c0_11, %c0_12] : memref<128x32xf32, #tpu.memory_space<vmem>>, vector<128x32xf32>
      tpu.vector_store %arg7[%c0_11, %c0_12], %12 {strides = array<i32>} : memref<128x32xf32, #tpu.memory_space<vmem>>, vector<128x32xf32>,
    } else {
    }
    %c0 = arith.constant 0 : index
    %c0_1 = arith.constant 0 : index
    %3 = vector.load %arg7[%c0, %c0_1] : memref<128x32xf32, #tpu.memory_space<vmem>>, vector<128x32xf32>
    %c0_2 = arith.constant 0 : index
    %c0_3 = arith.constant 0 : index
    %4 = vector.load %arg3[%c0_2, %c0_3] : memref<128x288xbf16, #tpu.memory_space<vmem>>, vector<128x288xbf16>
    %c0_4 = arith.constant 0 : index
    %c0_5 = arith.constant 0 : index
    %5 = vector.load %arg4[%c0_4, %c0_5] : memref<288x32xbf16, #tpu.memory_space<vmem>>, vector<288x32xbf16>
    %cst = arith.constant dense<0.000000e+00> : vector<128x32xf32>
    %6 = tpu.matmul %4, %5, %cst {dimension_numbers = #tpu.dot_dimension_numbers<[1], [0], [0], [1], [0, 0, 1, 1], [], []>} : vector<128x288xbf16>, vector<288x32xbf16>, vector<128x32xf32> -> vector<128x32xf32>
    %7 = arith.addf %3, %6 : vector<128x32xf32>
    %c0_6 = arith.constant 0 : index
    %c0_7 = arith.constant 0 : index
    %8 = vector.load %arg7[%c0_6, %c0_7] : memref<128x32xf32, #tpu.memory_space<vmem>>, vector<128x32xf32>
    tpu.vector_store %arg7[%c0_6, %c0_7], %7 {strides = array<i32>} : memref<128x32xf32, #tpu.memory_space<vmem>>, vector<128x32xf32>,
    %c0_i32_8 = arith.constant 0 : i32
    %9 = arith.cmpi eq, %arg2, %c0_i32_8 : i32
    %10 = arith.extui %9 : i1 to i32
    %c0_i32_9 = arith.constant 0 : i32
    %11 = arith.cmpi ne, %10, %c0_i32_9 : i32
    scf.if %11 {
      %c0_10 = arith.constant 0 : index
      %c0_11 = arith.constant 0 : index
      %12 = vector.load %arg7[%c0_10, %c0_11] : memref<128x32xf32, #tpu.memory_space<vmem>>, vector<128x32xf32>
      %c0_12 = arith.constant 0 : index
      %c0_13 = arith.constant 0 : index
      %13 = vector.load %arg5[%c0_12, %c0_13] : memref<1x32xf32, #tpu.memory_space<vmem>>, vector<1x32xf32>
      %14 = vector.broadcast %13 : vector<1x32xf32> to vector<128x32xf32>
      %15 = arith.addf %12, %14 : vector<128x32xf32>
      %c0_14 = arith.constant 0 : index
      %c0_15 = arith.constant 0 : index
      %16 = vector.load %arg6[%c0_14, %c0_15] : memref<128x32xf32, #tpu.memory_space<vmem>>, vector<128x32xf32>
      tpu.vector_store %arg6[%c0_14, %c0_15], %15 {strides = array<i32>} : memref<128x32xf32, #tpu.memory_space<vmem>>, vector<128x32xf32>,
    } else {
    }
    return
  }
  func.func @transform_0(%arg0: i32, %arg1: i32, %arg2: i32) -> (i32, i32) {
    %c0_i32 = arith.constant 0 : i32
    return %arg0, %arg2 : i32, i32
  }
  func.func @transform_1(%arg0: i32, %arg1: i32, %arg2: i32) -> (i32, i32) {
    %c0_i32 = arith.constant 0 : i32
    return %arg2, %arg1 : i32, i32
  }
  func.func @transform_2(%arg0: i32, %arg1: i32, %arg2: i32) -> (i32, i32) {
    %c0_i32 = arith.constant 0 : i32
    %c0_i32_0 = arith.constant 0 : i32
    return %c0_i32, %arg1 : i32, i32
  }
  func.func @transform_3(%arg0: i32, %arg1: i32, %arg2: i32) -> (i32, i32) {
    %c0_i32 = arith.constant 0 : i32
    return %arg0, %arg1 : i32, i32
  }
}

module attributes {stable_mosaic.version = 11 : i64} {
  func.func @_affine_kernel(%arg0: i32, %arg1: memref<512x8xf32, #tpu.memory_space<vmem>>, %arg2: memref<1x8xf32, #tpu.memory_space<vmem>>, %arg3: memref<1x8xf32, #tpu.memory_space<vmem>>, %arg4: memref<512x8xf32, #tpu.memory_space<vmem>>) attributes {dimension_semantics = [#tpu.dimension_semantics<parallel>], iteration_bounds = array<i64: 1>, scalar_prefetch = 0 : i64, scratch_operands = 0 : i64, tpu.core_type = #tpu.core_type<tc>, window_params = [{transform_indices = @transform_0, window_bounds = array<i64: 512, 8>}, {pipeline_mode = #tpu.pipeline_mode<synchronous>, transform_indices = @transform_1, window_bounds = array<i64: 1, 8>}, {pipeline_mode = #tpu.pipeline_mode<synchronous>, transform_indices = @transform_2, window_bounds = array<i64: 1, 8>}, {transform_indices = @transform_3, window_bounds = array<i64: 512, 8>}]} {
    %c0 = arith.constant 0 : index
    %c0_0 = arith.constant 0 : index
    %0 = vector.load %arg1[%c0, %c0_0] : memref<512x8xf32, #tpu.memory_space<vmem>>, vector<512x8xf32>
    %c0_1 = arith.constant 0 : index
    %c0_2 = arith.constant 0 : index
    %1 = vector.load %arg2[%c0_1, %c0_2] : memref<1x8xf32, #tpu.memory_space<vmem>>, vector<1x8xf32>
    %2 = vector.broadcast %1 : vector<1x8xf32> to vector<512x8xf32>
    %3 = arith.mulf %0, %2 : vector<512x8xf32>
    %c0_3 = arith.constant 0 : index
    %c0_4 = arith.constant 0 : index
    %4 = vector.load %arg3[%c0_3, %c0_4] : memref<1x8xf32, #tpu.memory_space<vmem>>, vector<1x8xf32>
    %5 = vector.broadcast %4 : vector<1x8xf32> to vector<512x8xf32>
    %6 = arith.addf %3, %5 : vector<512x8xf32>
    %c0_5 = arith.constant 0 : index
    %c0_6 = arith.constant 0 : index
    %7 = vector.load %arg4[%c0_5, %c0_6] : memref<512x8xf32, #tpu.memory_space<vmem>>, vector<512x8xf32>
    tpu.vector_store %arg4[%c0_5, %c0_6], %6 {strides = array<i32>} : memref<512x8xf32, #tpu.memory_space<vmem>>, vector<512x8xf32>,
    return
  }
  func.func @transform_0(%arg0: i32) -> (i32, i32) {
    %c0_i32 = arith.constant 0 : i32
    %c0_i32_0 = arith.constant 0 : i32
    return %arg0, %c0_i32 : i32, i32
  }
  func.func @transform_1(%arg0: i32) -> (i32, i32) {
    %c0_i32 = arith.constant 0 : i32
    %c0_i32_0 = arith.constant 0 : i32
    %c0_i32_1 = arith.constant 0 : i32
    return %c0_i32, %c0_i32_0 : i32, i32
  }
  func.func @transform_2(%arg0: i32) -> (i32, i32) {
    %c0_i32 = arith.constant 0 : i32
    %c0_i32_0 = arith.constant 0 : i32
    %c0_i32_1 = arith.constant 0 : i32
    return %c0_i32, %c0_i32_0 : i32, i32
  }
  func.func @transform_3(%arg0: i32) -> (i32, i32) {
    %c0_i32 = arith.constant 0 : i32
    %c0_i32_0 = arith.constant 0 : i32
    return %arg0, %c0_i32 : i32, i32
  }
}

module attributes {stable_mosaic.version = 11 : i64} {
  func.func @_matmul_kernel(%arg0: i32, %arg1: i32, %arg2: i32, %arg3: memref<256x144xbf16, #tpu.memory_space<vmem>>, %arg4: memref<144x12xbf16, #tpu.memory_space<vmem>>, %arg5: memref<1x12xf32, #tpu.memory_space<vmem>>, %arg6: memref<256x12xf32, #tpu.memory_space<vmem>>, %arg7: memref<256x12xf32, #tpu.memory_space<vmem>>) attributes {dimension_semantics = [#tpu.dimension_semantics<parallel>, #tpu.dimension_semantics<parallel>, #tpu.dimension_semantics<arbitrary>], iteration_bounds = array<i64: 2, 1, 1>, scalar_prefetch = 0 : i64, scratch_operands = 1 : i64, tpu.core_type = #tpu.core_type<tc>, window_params = [{transform_indices = @transform_0, window_bounds = array<i64: 256, 144>}, {transform_indices = @transform_1, window_bounds = array<i64: 144, 12>}, {transform_indices = @transform_2, window_bounds = array<i64: 1, 12>}, {transform_indices = @transform_3, window_bounds = array<i64: 256, 12>}]} {
    %c0_i32 = arith.constant 0 : i32
    %0 = arith.cmpi eq, %arg2, %c0_i32 : i32
    %1 = arith.extui %0 : i1 to i32
    %c0_i32_0 = arith.constant 0 : i32
    %2 = arith.cmpi ne, %1, %c0_i32_0 : i32
    scf.if %2 {
      %cst_10 = arith.constant 0.000000e+00 : f32
      %12 = vector.broadcast %cst_10 : f32 to vector<256x12xf32>
      %c0_11 = arith.constant 0 : index
      %c0_12 = arith.constant 0 : index
      %13 = vector.load %arg7[%c0_11, %c0_12] : memref<256x12xf32, #tpu.memory_space<vmem>>, vector<256x12xf32>
      tpu.vector_store %arg7[%c0_11, %c0_12], %12 {strides = array<i32>} : memref<256x12xf32, #tpu.memory_space<vmem>>, vector<256x12xf32>,
    } else {
    }
    %c0 = arith.constant 0 : index
    %c0_1 = arith.constant 0 : index
    %3 = vector.load %arg7[%c0, %c0_1] : memref<256x12xf32, #tpu.memory_space<vmem>>, vector<256x12xf32>
    %c0_2 = arith.constant 0 : index
    %c0_3 = arith.constant 0 : index
    %4 = vector.load %arg3[%c0_2, %c0_3] : memref<256x144xbf16, #tpu.memory_space<vmem>>, vector<256x144xbf16>
    %c0_4 = arith.constant 0 : index
    %c0_5 = arith.constant 0 : index
    %5 = vector.load %arg4[%c0_4, %c0_5] : memref<144x12xbf16, #tpu.memory_space<vmem>>, vector<144x12xbf16>
    %cst = arith.constant dense<0.000000e+00> : vector<256x12xf32>
    %6 = tpu.matmul %4, %5, %cst {dimension_numbers = #tpu.dot_dimension_numbers<[1], [0], [0], [1], [0, 0, 1, 1], [], []>} : vector<256x144xbf16>, vector<144x12xbf16>, vector<256x12xf32> -> vector<256x12xf32>
    %7 = arith.addf %3, %6 : vector<256x12xf32>
    %c0_6 = arith.constant 0 : index
    %c0_7 = arith.constant 0 : index
    %8 = vector.load %arg7[%c0_6, %c0_7] : memref<256x12xf32, #tpu.memory_space<vmem>>, vector<256x12xf32>
    tpu.vector_store %arg7[%c0_6, %c0_7], %7 {strides = array<i32>} : memref<256x12xf32, #tpu.memory_space<vmem>>, vector<256x12xf32>,
    %c0_i32_8 = arith.constant 0 : i32
    %9 = arith.cmpi eq, %arg2, %c0_i32_8 : i32
    %10 = arith.extui %9 : i1 to i32
    %c0_i32_9 = arith.constant 0 : i32
    %11 = arith.cmpi ne, %10, %c0_i32_9 : i32
    scf.if %11 {
      %c0_10 = arith.constant 0 : index
      %c0_11 = arith.constant 0 : index
      %12 = vector.load %arg7[%c0_10, %c0_11] : memref<256x12xf32, #tpu.memory_space<vmem>>, vector<256x12xf32>
      %c0_12 = arith.constant 0 : index
      %c0_13 = arith.constant 0 : index
      %13 = vector.load %arg5[%c0_12, %c0_13] : memref<1x12xf32, #tpu.memory_space<vmem>>, vector<1x12xf32>
      %14 = vector.broadcast %13 : vector<1x12xf32> to vector<256x12xf32>
      %15 = arith.addf %12, %14 : vector<256x12xf32>
      %16 = math.tanh %15 : vector<256x12xf32>
      %c0_14 = arith.constant 0 : index
      %c0_15 = arith.constant 0 : index
      %17 = vector.load %arg6[%c0_14, %c0_15] : memref<256x12xf32, #tpu.memory_space<vmem>>, vector<256x12xf32>
      tpu.vector_store %arg6[%c0_14, %c0_15], %16 {strides = array<i32>} : memref<256x12xf32, #tpu.memory_space<vmem>>, vector<256x12xf32>,
    } else {
    }
    return
  }
  func.func @transform_0(%arg0: i32, %arg1: i32, %arg2: i32) -> (i32, i32) {
    %c0_i32 = arith.constant 0 : i32
    return %arg0, %arg2 : i32, i32
  }
  func.func @transform_1(%arg0: i32, %arg1: i32, %arg2: i32) -> (i32, i32) {
    %c0_i32 = arith.constant 0 : i32
    return %arg2, %arg1 : i32, i32
  }
  func.func @transform_2(%arg0: i32, %arg1: i32, %arg2: i32) -> (i32, i32) {
    %c0_i32 = arith.constant 0 : i32
    %c0_i32_0 = arith.constant 0 : i32
    return %c0_i32, %arg1 : i32, i32
  }
  func.func @transform_3(%arg0: i32, %arg1: i32, %arg2: i32) -> (i32, i32) {
    %c0_i32 = arith.constant 0 : i32
    return %arg0, %arg1 : i32, i32
  }
}

</mosaic_0001>

<bundles_post_ra>
// kernel: _lambda_.17
= control target key start
LH: loop header
LB: loop body
LE: loop exit
PB: predicated region body
PF: predicated region fallthrough
CT: control target
= control target key end

     0   :  { %s1086_s12 = smov 0   ;;  %s1088_s13 = smov 0   ;;  %s1333_s0 = inlined_call_operand.vmem [shape: bf16[512,48], index: 0, kind: input, shape index: {}]   ;;  %s1334_s1 = inlined_call_operand.vmem [shape: bf16[48,8], index: 1, kind: input, shape index: {}]   ;;  %s1335_s2 = inlined_call_operand.vmem [shape: f32[1,8], index: 2, kind: input, shape index: {}]   ;;  %s1336_s3 = inlined_call_operand.vmem [shape: f32[512,8], index: 3, kind: output, shape index: {}]  }
   0x1   :  { %s1090_s14 = smov 0  }
   0x2 LB: > { %s32_s15 = sadd.s32 1, %s1059_s13  ;;  %p888_p0 = scmp.ge.s32.totalorder %s1063_s14, 1  ;;  %s1063_s14 = sphi %s1090_s14, %s13_s14   ;;  %s1059_s13 = sphi %s1088_s13, %s1338_s13   ;;  %s1055_s12 = sphi %s1086_s12, %s1337_s12  }
   0x3   : > { %p34_p1 = scmp.ge.s32.totalorder %s32_s15, 2  ;;  %p188_p2 = scmp.lt.s32.totalorder %s1063_s14, 3 }
   0x5   : > { %s1340_s15 = smov (%p34_p1, %s32_s15), 0  ;;  %p189_p3 = pnand %p888_p0, %p188_p2 }
   0x6   : > { %s889_s18 = sshll.u32 (!%p189_p3), %s1055_s12, 5 }
   0x7   : > { %192 = sbr.rel (%p189_p3) target bundleno = 227 (0xe3), region = 32  ;;  %p230_p4 = scmp.lt.s32.totalorder (!%p189_p3), %s889_s18, 63 }
   0xc   : > { %v1005_v0 = vld [vmem:[%s1334_s1 + $0x10] sm:$0xff]  ;;  %v1004_v1 = vld [vmem:[%s1334_s1 + $0x8] sm:$0xff]  ;;  %s1342_s18 = smov (!%p230_p4, %s889_s18), 63  ;;  %v1003_v2 = vld [vmem:[%s1334_s1] sm:$0xff]  ;;  %vm465_vm0 = vcmask 392192   ;;  %vm264_vm1 = vcmask 64512  }
   0xd   : > { %519 = vmatpush.bf16.msra.mxu0 %v1005_v0  ;;  %1006 = vmatpush.bf16.msra.mxu1 %v1005_v0  ;;  %s890_s21 = sshll.u32 %s1342_s18, 2  ;;  %v1065_v11 = vmov 0.0   ;;  %s892_s27 = sshll.u32 %s1342_s18, 3  ;;  %v1191_v29 = vld [vmem:[%s1335_s2] ss:$0 sm:$0xff] }
   0xe   : > { %1007 = vmatpush.bf16.msra.mxu2 %v1005_v0  ;;  %1008 = vmatpush.bf16.msra.mxu3 %v1005_v0  ;;  %s1119_s26 = scalar_lea.vmem %s1333_s0, %s890_s21  ;;  %265 = vst.msk [vmem:[#allocation2] sm:$0xff] %vm264_vm1, %v1065_v11  ;;  %s1196_s5 = scalar_lea.vmem %s1336_s3, %s892_s27 }
   0xf   : > { %v987_v3 = vld [vmem:[%s1119_s26] sm:$0xff]  ;;  %v988_v7 = vld [vmem:[%s1119_s26 + $0x8] sm:$0xff]  ;;  %266 = vst.msk [vmem:[#allocation2 + $0x8] sm:$0xff] %vm264_vm1, %v1065_v11  ;;  %v989_v12 = vld [vmem:[%s1119_s26 + $0x10] sm:$0xff] }
  0x10   : > { %v991_v4 = vld [vmem:[%s1119_s26 + $0x20] sm:$0xff]  ;;  %v992_v8 = vld [vmem:[%s1119_s26 + $0x28] sm:$0xff]  ;;  %267 = vst.msk [vmem:[#allocation2 + $0x10] sm:$0xff] %vm264_vm1, %v1065_v11  ;;  %v993_v13 = vld [vmem:[%s1119_s26 + $0x30] sm:$0xff] }
  0x11   : > { %520 = vmatpush.bf16.msra.mxu0 %v1004_v1  ;;  %1009 = vmatpush.bf16.msra.mxu1 %v1004_v1  ;;  %v995_v5 = vld [vmem:[%s1119_s26 + $0x40] sm:$0xff]  ;;  %v996_v9 = vld [vmem:[%s1119_s26 + $0x48] sm:$0xff]  ;;  %268 = vst.msk [vmem:[#allocation2 + $0x18] sm:$0xff] %vm264_vm1, %v1065_v11  ;;  %v997_v14 = vld [vmem:[%s1119_s26 + $0x50] sm:$0xff] }
  0x12   : > { %1010 = vmatpush.bf16.msra.mxu2 %v1004_v1  ;;  %1011 = vmatpush.bf16.msra.mxu3 %v1004_v1  ;;  %v999_v6 = vld [vmem:[%s1119_s26 + $0x60] sm:$0xff]  ;;  %v1000_v10 = vld [vmem:[%s1119_s26 + $0x68] sm:$0xff]  ;;  %269 = vst.msk [vmem:[#allocation2 + $0x20] sm:$0xff] %vm264_vm1, %v1065_v11  ;;  %v1001_v15 = vld [vmem:[%s1119_s26 + $0x70] sm:$0xff] }
  0x13   : > { %270 = vst.msk [vmem:[#allocation2 + $0x28] sm:$0xff] %vm264_vm1, %v1065_v11  ;;  %v990_v16 = vld [vmem:[%s1119_s26 + $0x18] sm:$0xff] }
  0x14   : > { %271 = vst.msk [vmem:[#allocation2 + $0x30] sm:$0xff] %vm264_vm1, %v1065_v11  ;;  %v994_v17 = vld [vmem:[%s1119_s26 + $0x38] sm:$0xff] }
  0x15   : > { %521 = vmatpush.bf16.msra.mxu0 %v1003_v2  ;;  %1012 = vmatpush.bf16.msra.mxu1 %v1003_v2  ;;  %272 = vst.msk [vmem:[#allocation2 + $0x38] sm:$0xff] %vm264_vm1, %v1065_v11  ;;  %v998_v18 = vld [vmem:[%s1119_s26 + $0x58] sm:$0xff]  ;;  %v297_v20 = vld [vmem:[#allocation2] sm:$0xff] }
  0x16   : > { %1013 = vmatpush.bf16.msra.mxu2 %v1003_v2  ;;  %1014 = vmatpush.bf16.msra.mxu3 %v1003_v2  ;;  %273 = vst.msk [vmem:[#allocation2 + $0x40] sm:$0xff] %vm264_vm1, %v1065_v11  ;;  %v1002_v19 = vld [vmem:[%s1119_s26 + $0x78] sm:$0xff]  ;;  %v298_v28 = vld [vmem:[#allocation2 + $0x8] sm:$0xff] }
  0x17   : > { %274 = vst.msk [vmem:[#allocation2 + $0x48] sm:$0xff] %vm264_vm1, %v1065_v11  ;;  %v299_v49 = vld [vmem:[#allocation2 + $0x10] sm:$0xff] }
  0x18   : > { %969 = vmatmul.msk.bf16.vlgmr.msra.gmra.mxu0 %vm465_vm0, %v987_v3  ;;  %973 = vmatmul.msk.bf16.vlgmr.msra.gmra.mxu1 %vm465_vm0, %v991_v4  ;;  %275 = vst.msk [vmem:[#allocation2 + $0x50] sm:$0xff] %vm264_vm1, %v1065_v11  ;;  %v300_v3 = vld [vmem:[#allocation2 + $0x18] sm:$0xff] }
  0x19   : > { %977 = vmatmul.msk.bf16.vlgmr.msra.gmra.mxu2 %vm465_vm0, %v995_v5  ;;  %981 = vmatmul.msk.bf16.vlgmr.msra.gmra.mxu3 %vm465_vm0, %v999_v6  ;;  %276 = vst.msk [vmem:[#allocation2 + $0x58] sm:$0xff] %vm264_vm1, %v1065_v11 }
  0x1a   : > { %277 = vst.msk [vmem:[#allocation2 + $0x60] sm:$0xff] %vm264_vm1, %v1065_v11 }
  0x1b   : > { %278 = vst.msk [vmem:[#allocation2 + $0x68] sm:$0xff] %vm264_vm1, %v1065_v11 }
  0x1c   : > { %279 = vst.msk [vmem:[#allocation2 + $0x70] sm:$0xff] %vm264_vm1, %v1065_v11 }
  0x1d   : > { %280 = vst.msk [vmem:[#allocation2 + $0x78] sm:$0xff] %vm264_vm1, %v1065_v11  ;;  %v305_v21 = vld [vmem:[#allocation2 + $0x40] sm:$0xff] }
  0x1e   : > { %281 = vst.msk [vmem:[#allocation2 + $0x80] sm:$0xff] %vm264_vm1, %v1065_v11  ;;  %v306_v35 = vld [vmem:[#allocation2 + $0x48] sm:$0xff] }
  0x1f   : > { %282 = vst.msk [vmem:[#allocation2 + $0x88] sm:$0xff] %vm264_vm1, %v1065_v11  ;;  %v307_v53 = vld [vmem:[#allocation2 + $0x50] sm:$0xff] }
  0x20   : > { %283 = vst.msk [vmem:[#allocation2 + $0x90] sm:$0xff] %vm264_vm1, %v1065_v11 }
  0x21   : > { %284 = vst.msk [vmem:[#allocation2 + $0x98] sm:$0xff] %vm264_vm1, %v1065_v11 }
  0x22   : > { %285 = vst.msk [vmem:[#allocation2 + $0xa0] sm:$0xff] %vm264_vm1, %v1065_v11 }
  0x23   : > { %286 = vst.msk [vmem:[#allocation2 + $0xa8] sm:$0xff] %vm264_vm1, %v1065_v11 }
  0x24   : > { %287 = vst.msk [vmem:[#allocation2 + $0xb0] sm:$0xff] %vm264_vm1, %v1065_v11 }
  0x25   : > { %288 = vst.msk [vmem:[#allocation2 + $0xb8] sm:$0xff] %vm264_vm1, %v1065_v11  ;;  %v313_v26 = vld [vmem:[#allocation2 + $0x80] sm:$0xff] }
  0x26   : > { %289 = vst.msk [vmem:[#allocation2 + $0xc0] sm:$0xff] %vm264_vm1, %v1065_v11  ;;  %v314_v43 = vld [vmem:[#allocation2 + $0x88] sm:$0xff] }
  0x27   : > { %290 = vst.msk [vmem:[#allocation2 + $0xc8] sm:$0xff] %vm264_vm1, %v1065_v11  ;;  %v315_v61 = vld [vmem:[#allocation2 + $0x90] sm:$0xff] }
  0x28   : > { %970 = vmatmul.msk.bf16.gmra.mxu0 %vm465_vm0, %v988_v7  ;;  %974 = vmatmul.msk.bf16.gmra.mxu1 %vm465_vm0, %v992_v8  ;;  %291 = vst.msk [vmem:[#allocation2 + $0xd0] sm:$0xff] %vm264_vm1, %v1065_v11  ;;  %v308_v7 = vld [vmem:[#allocation2 + $0x58] sm:$0xff] }
  0x29   : > { %978 = vmatmul.msk.bf16.gmra.mxu2 %vm465_vm0, %v996_v9  ;;  %982 = vmatmul.msk.bf16.gmra.mxu3 %vm465_vm0, %v1000_v10  ;;  %292 = vst.msk [vmem:[#allocation2 + $0xd8] sm:$0xff] %vm264_vm1, %v1065_v11 }
  0x2a   : > { %293 = vst.msk [vmem:[#allocation2 + $0xe0] sm:$0xff] %vm264_vm1, %v1065_v11 }
  0x2b   : > { %294 = vst.msk [vmem:[#allocation2 + $0xe8] sm:$0xff] %vm264_vm1, %v1065_v11 }
  0x2c   : > { %295 = vst.msk [vmem:[#allocation2 + $0xf0] sm:$0xff] %vm264_vm1, %v1065_v11 }
  0x2d   : > { %296 = vst.msk [vmem:[#allocation2 + $0xf8] sm:$0xff] %vm264_vm1, %v1065_v11  ;;  %v321_v27 = vld [vmem:[#allocation2 + $0xc0] sm:$0xff] }
  0x2e   : > { %v322_v44 = vld [vmem:[#allocation2 + $0xc8] sm:$0xff] }
  0x2f   : > { %v323_v62 = vld [vmem:[#allocation2 + $0xd0] sm:$0xff] }
  0x38   : > { %971 = vmatmul.msk.bf16.gmra.mxu0 %vm465_vm0, %v989_v12  ;;  %975 = vmatmul.msk.bf16.gmra.mxu1 %vm465_vm0, %v993_v13 }
  0x39   : > { %979 = vmatmul.msk.bf16.gmra.mxu2 %vm465_vm0, %v997_v14  ;;  %983 = vmatmul.msk.bf16.gmra.mxu3 %vm465_vm0, %v1001_v15  ;;  %v316_v15 = vld [vmem:[#allocation2 + $0x98] sm:$0xff] }
  0x48   : > { %972 = vmatmul.msk.bf16.gmra.mxu0 %vm465_vm0, %v990_v16  ;;  %976 = vmatmul.msk.bf16.gmra.mxu1 %vm465_vm0, %v994_v17 }
  0x49   : > { %980 = vmatmul.msk.bf16.gmra.mxu2 %vm465_vm0, %v998_v18  ;;  %984 = vmatmul.msk.bf16.gmra.mxu3 %vm465_vm0, %v1002_v19 }
  0x95   : > { %v523_v22 = vpop.f32.mrf.mxu0  ;;  %v543_v23 = vpop.f32.mrf.mxu1 }
  0x96   : > { %v603_v24 = vadd.f32 %v523_v22, %v297_v20  ;;  %v611_v25 = vadd.f32 %v543_v23, %v305_v21  ;;  %v324_v20 = vld [vmem:[#allocation2 + $0xd8] sm:$0xff] }
  0x98   : > { %636 = vst.msk [vmem:[#allocation2] sm:$0xff] %vm264_vm1, %v603_v24  ;;  %v301_v24 = vld [vmem:[#allocation2 + $0x20] sm:$0xff] }
  0x99   : > { %644 = vst.msk [vmem:[#allocation2 + $0x40] sm:$0xff] %vm264_vm1, %v611_v25 }
  0x9c   : > { %v563_v30 = vpop.f32.mrf.mxu2  ;;  %v583_v31 = vpop.f32.mrf.mxu3 }
  0x9d   : > { %v619_v32 = vadd.f32 %v563_v30, %v313_v26  ;;  %v627_v33 = vadd.f32 %v583_v31, %v321_v27  ;;  %v525_v34 = vpop.f32.mrf.mxu0  ;;  %v545_v36 = vpop.f32.mrf.mxu1 }
  0x9e   : > { %v604_v37 = vadd.f32 %v525_v34, %v298_v28  ;;  %v612_v41 = vadd.f32 %v545_v36, %v306_v35  ;;  %v309_v34 = vld [vmem:[#allocation2 + $0x60] sm:$0xff] }
  0x9f   : > { %v671_v38 = vld [vmem:[#allocation2] sm:$0xff]  ;;  %652 = vst.msk [vmem:[#allocation2 + $0x80] sm:$0xff] %vm264_vm1, %v619_v32 }
  0xa0   : > { %v707_v39 = vadd.f32 %v1191_v29, %v671_v38  ;;  %v679_v40 = vld [vmem:[#allocation2 + $0x40] sm:$0xff]  ;;  %660 = vst.msk [vmem:[#allocation2 + $0xc0] sm:$0xff] %vm264_vm1, %v627_v33 }
  0xa1   : > { %v715_v42 = vadd.f32 %v1191_v29, %v679_v40  ;;  %637 = vst.msk [vmem:[#allocation2 + $0x8] sm:$0xff] %vm264_vm1, %v604_v37  ;;  %v317_v36 = vld [vmem:[#allocation2 + $0xa0] sm:$0xff] }
  0xa2   : > { %739 = vst.msk [vmem:[%s1196_s5] sm:$0xff] %vm264_vm1, %v707_v39  ;;  %v325_v37 = vld [vmem:[#allocation2 + $0xe0] sm:$0xff] }
  0xa3   : > { %747 = vst.msk [vmem:[%s1196_s5 + $0x40] sm:$0xff] %vm264_vm1, %v715_v42 }
  0xa4   : > { %645 = vst.msk [vmem:[#allocation2 + $0x48] sm:$0xff] %vm264_vm1, %v612_v41  ;;  %v565_v45 = vpop.f32.mrf.mxu2  ;;  %v585_v46 = vpop.f32.mrf.mxu3 }
  0xa5   : > { %v620_v47 = vadd.f32 %v565_v45, %v314_v43  ;;  %v628_v48 = vadd.f32 %v585_v46, %v322_v44  ;;  %v528_v50 = vpop.f32.mrf.mxu0  ;;  %v548_v51 = vpop.f32.mrf.mxu1  ;;  %v302_v44 = vld [vmem:[#allocation2 + $0x28] sm:$0xff] }
  0xa6   : > { %v687_v52 = vld [vmem:[#allocation2 + $0x80] sm:$0xff]  ;;  %v605_v58 = vadd.f32 %v528_v50, %v299_v49  ;;  %v613_v60 = vadd.f32 %v548_v51, %v307_v53 }
  0xa7   : > { %v723_v54 = vadd.f32 %v1191_v29, %v687_v52  ;;  %v695_v55 = vld [vmem:[#allocation2 + $0xc0] sm:$0xff]  ;;  %653 = vst.msk [vmem:[#allocation2 + $0x88] sm:$0xff] %vm264_vm1, %v620_v47 }
  0xa8   : > { %v731_v56 = vadd.f32 %v1191_v29, %v695_v55  ;;  %v672_v57 = vld [vmem:[#allocation2 + $0x8] sm:$0xff]  ;;  %661 = vst.msk [vmem:[#allocation2 + $0xc8] sm:$0xff] %vm264_vm1, %v628_v48 }
  0xa9   : > { %755 = vst.msk [vmem:[%s1196_s5 + $0x80] sm:$0xff] %vm264_vm1, %v723_v54  ;;  %v708_v59 = vadd.f32 %v1191_v29, %v672_v57  ;;  %v310_v48 = vld [vmem:[#allocation2 + $0x68] sm:$0xff] }
  0xaa   : > { %763 = vst.msk [vmem:[%s1196_s5 + $0xc0] sm:$0xff] %vm264_vm1, %v731_v56  ;;  %v318_v55 = vld [vmem:[#allocation2 + $0xa8] sm:$0xff] }
  0xab   : > { %740 = vst.msk [vmem:[%s1196_s5 + $0x8] sm:$0xff] %vm264_vm1, %v708_v59  ;;  %v680_v63 = vld [vmem:[#allocation2 + $0x48] sm:$0xff] }
  0xac   : > { %v716_v0 = vadd.f32 %v1191_v29, %v680_v63  ;;  %638 = vst.msk [vmem:[#allocation2 + $0x10] sm:$0xff] %vm264_vm1, %v605_v58  ;;  %v568_v1 = vpop.f32.mrf.mxu2  ;;  %v588_v2 = vpop.f32.mrf.mxu3  ;;  %v326_v56 = vld [vmem:[#allocation2 + $0xe8] sm:$0xff] }
  0xad   : > { %646 = vst.msk [vmem:[#allocation2 + $0x50] sm:$0xff] %vm264_vm1, %v613_v60  ;;  %v621_v4 = vadd.f32 %v568_v1, %v315_v61  ;;  %v629_v5 = vadd.f32 %v588_v2, %v323_v62  ;;  %v530_v6 = vpop.f32.mrf.mxu0  ;;  %v550_v8 = vpop.f32.mrf.mxu1 }
  0xae   : > { %748 = vst.msk [vmem:[%s1196_s5 + $0x48] sm:$0xff] %vm264_vm1, %v716_v0  ;;  %v688_v9 = vld [vmem:[#allocation2 + $0x88] sm:$0xff]  ;;  %v606_v12 = vadd.f32 %v530_v6, %v300_v3  ;;  %v614_v14 = vadd.f32 %v550_v8, %v308_v7  ;;  %v303_v0 = vld [vmem:[#allocation2 + $0x30] sm:$0xff] }
  0xaf   : > { %v724_v10 = vadd.f32 %v1191_v29, %v688_v9  ;;  %v696_v11 = vld [vmem:[#allocation2 + $0xc8] sm:$0xff]  ;;  %654 = vst.msk [vmem:[#allocation2 + $0x90] sm:$0xff] %vm264_vm1, %v621_v4  ;;  %v311_v9 = vld [vmem:[#allocation2 + $0x70] sm:$0xff] }
  0xb0   : > { %v732_v13 = vadd.f32 %v1191_v29, %v696_v11  ;;  %662 = vst.msk [vmem:[#allocation2 + $0xd0] sm:$0xff] %vm264_vm1, %v629_v5 }
  0xb1   : > { %756 = vst.msk [vmem:[%s1196_s5 + $0x88] sm:$0xff] %vm264_vm1, %v724_v10 }
  0xb2   : > { %764 = vst.msk [vmem:[%s1196_s5 + $0xc8] sm:$0xff] %vm264_vm1, %v732_v13 }
  0xb3   : > { %v673_v16 = vld [vmem:[#allocation2 + $0x10] sm:$0xff]  ;;  %639 = vst.msk [vmem:[#allocation2 + $0x18] sm:$0xff] %vm264_vm1, %v606_v12 }
  0xb4   : > { %v709_v17 = vadd.f32 %v1191_v29, %v673_v16  ;;  %v681_v18 = vld [vmem:[#allocation2 + $0x50] sm:$0xff]  ;;  %647 = vst.msk [vmem:[#allocation2 + $0x58] sm:$0xff] %vm264_vm1, %v614_v14  ;;  %v570_v19 = vpop.f32.mrf.mxu2  ;;  %v590_v21 = vpop.f32.mrf.mxu3 }
  0xb5   : > { %v717_v22 = vadd.f32 %v1191_v29, %v681_v18  ;;  %v622_v23 = vadd.f32 %v570_v19, %v316_v15  ;;  %v533_v25 = vpop.f32.mrf.mxu0  ;;  %v553_v26 = vpop.f32.mrf.mxu1  ;;  %v630_v31 = vadd.f32 %v590_v21, %v324_v20  ;;  %v319_v12 = vld [vmem:[#allocation2 + $0xb0] sm:$0xff]  ;;  %v304_v21 = vld [vmem:[#allocation2 + $0x38] sm:$0xff] }
  0xb6   : > { %741 = vst.msk [vmem:[%s1196_s5 + $0x10] sm:$0xff] %vm264_vm1, %v709_v17  ;;  %v689_v27 = vld [vmem:[#allocation2 + $0x90] sm:$0xff]  ;;  %v607_v33 = vadd.f32 %v533_v25, %v301_v24  ;;  %v615_v40 = vadd.f32 %v553_v26, %v309_v34  ;;  %v312_v24 = vld [vmem:[#allocation2 + $0x78] sm:$0xff] }
  0xb7   : > { %749 = vst.msk [vmem:[%s1196_s5 + $0x50] sm:$0xff] %vm264_vm1, %v717_v22  ;;  %v725_v28 = vadd.f32 %v1191_v29, %v689_v27  ;;  %v697_v30 = vld [vmem:[#allocation2 + $0xd0] sm:$0xff]  ;;  %v328_v34 = vld [vmem:[#allocation2 + $0xf8] sm:$0xff] }
  0xb8   : > { %v733_v32 = vadd.f32 %v1191_v29, %v697_v30  ;;  %655 = vst.msk [vmem:[#allocation2 + $0x98] sm:$0xff] %vm264_vm1, %v622_v23  ;;  %v327_v18 = vld [vmem:[#allocation2 + $0xf0] sm:$0xff] }
  0xb9   : > { %757 = vst.msk [vmem:[%s1196_s5 + $0x90] sm:$0xff] %vm264_vm1, %v725_v28 }
  0xba   : > { %765 = vst.msk [vmem:[%s1196_s5 + $0xd0] sm:$0xff] %vm264_vm1, %v733_v32  ;;  %v674_v35 = vld [vmem:[#allocation2 + $0x18] sm:$0xff] }
  0xbb   : > { %v710_v38 = vadd.f32 %v1191_v29, %v674_v35  ;;  %v682_v39 = vld [vmem:[#allocation2 + $0x58] sm:$0xff]  ;;  %663 = vst.msk [vmem:[#allocation2 + $0xd8] sm:$0xff] %vm264_vm1, %v630_v31 }
  0xbc   : > { %v718_v41 = vadd.f32 %v1191_v29, %v682_v39  ;;  %640 = vst.msk [vmem:[#allocation2 + $0x20] sm:$0xff] %vm264_vm1, %v607_v33  ;;  %v573_v42 = vpop.f32.mrf.mxu2  ;;  %v593_v43 = vpop.f32.mrf.mxu3  ;;  %v320_v33 = vld [vmem:[#allocation2 + $0xb8] sm:$0xff] }
  0xbd   : > { %742 = vst.msk [vmem:[%s1196_s5 + $0x18] sm:$0xff] %vm264_vm1, %v710_v38  ;;  %v623_v45 = vadd.f32 %v573_v42, %v317_v36  ;;  %v631_v46 = vadd.f32 %v593_v43, %v325_v37  ;;  %v535_v47 = vpop.f32.mrf.mxu0  ;;  %v555_v49 = vpop.f32.mrf.mxu1 }
  0xbe   : > { %750 = vst.msk [vmem:[%s1196_s5 + $0x58] sm:$0xff] %vm264_vm1, %v718_v41  ;;  %v608_v51 = vadd.f32 %v535_v47, %v302_v44  ;;  %v616_v53 = vadd.f32 %v555_v49, %v310_v48 }
  0xbf   : > { %v690_v50 = vld [vmem:[#allocation2 + $0x98] sm:$0xff]  ;;  %648 = vst.msk [vmem:[#allocation2 + $0x60] sm:$0xff] %vm264_vm1, %v615_v40 }
  0xc0   : > { %v726_v52 = vadd.f32 %v1191_v29, %v690_v50  ;;  %656 = vst.msk [vmem:[#allocation2 + $0xa0] sm:$0xff] %vm264_vm1, %v623_v45 }
  0xc1   : > { %664 = vst.msk [vmem:[#allocation2 + $0xe0] sm:$0xff] %vm264_vm1, %v631_v46 }
  0xc2   : > { %758 = vst.msk [vmem:[%s1196_s5 + $0x98] sm:$0xff] %vm264_vm1, %v726_v52  ;;  %v698_v54 = vld [vmem:[#allocation2 + $0xd8] sm:$0xff] }
  0xc3   : > { %v734_v57 = vadd.f32 %v1191_v29, %v698_v54  ;;  %v675_v58 = vld [vmem:[#allocation2 + $0x20] sm:$0xff]  ;;  %641 = vst.msk [vmem:[#allocation2 + $0x28] sm:$0xff] %vm264_vm1, %v608_v51 }
  0xc4   : > { %v711_v59 = vadd.f32 %v1191_v29, %v675_v58  ;;  %649 = vst.msk [vmem:[#allocation2 + $0x68] sm:$0xff] %vm264_vm1, %v616_v53  ;;  %v575_v60 = vpop.f32.mrf.mxu2  ;;  %v595_v61 = vpop.f32.mrf.mxu3 }
  0xc5   : > { %766 = vst.msk [vmem:[%s1196_s5 + $0xd8] sm:$0xff] %vm264_vm1, %v734_v57  ;;  %v624_v62 = vadd.f32 %v575_v60, %v318_v55  ;;  %v632_v63 = vadd.f32 %v595_v61, %v326_v56  ;;  %v538_v1 = vpop.f32.mrf.mxu0  ;;  %v558_v2 = vpop.f32.mrf.mxu1 }
  0xc6   : > { %743 = vst.msk [vmem:[%s1196_s5 + $0x20] sm:$0xff] %vm264_vm1, %v711_v59  ;;  %v683_v3 = vld [vmem:[#allocation2 + $0x60] sm:$0xff]  ;;  %v609_v8 = vadd.f32 %v538_v1, %v303_v0  ;;  %v617_v15 = vadd.f32 %v558_v2, %v311_v9 }
  0xc7   : > { %v719_v4 = vadd.f32 %v1191_v29, %v683_v3  ;;  %v691_v5 = vld [vmem:[#allocation2 + $0xa0] sm:$0xff]  ;;  %657 = vst.msk [vmem:[#allocation2 + $0xa8] sm:$0xff] %vm264_vm1, %v624_v62 }
  0xc8   : > { %v727_v6 = vadd.f32 %v1191_v29, %v691_v5  ;;  %v699_v7 = vld [vmem:[#allocation2 + $0xe0] sm:$0xff]  ;;  %665 = vst.msk [vmem:[#allocation2 + $0xe8] sm:$0xff] %vm264_vm1, %v632_v63 }
  0xc9   : > { %751 = vst.msk [vmem:[%s1196_s5 + $0x60] sm:$0xff] %vm264_vm1, %v719_v4  ;;  %v735_v10 = vadd.f32 %v1191_v29, %v699_v7 }
  0xca   : > { %759 = vst.msk [vmem:[%s1196_s5 + $0xa0] sm:$0xff] %vm264_vm1, %v727_v6  ;;  %v676_v11 = vld [vmem:[#allocation2 + $0x28] sm:$0xff] }
  0xcb   : > { %767 = vst.msk [vmem:[%s1196_s5 + $0xe0] sm:$0xff] %vm264_vm1, %v735_v10  ;;  %v712_v13 = vadd.f32 %v1191_v29, %v676_v11  ;;  %v684_v14 = vld [vmem:[#allocation2 + $0x68] sm:$0xff] }
  0xcc   : > { %v720_v16 = vadd.f32 %v1191_v29, %v684_v14  ;;  %642 = vst.msk [vmem:[#allocation2 + $0x30] sm:$0xff] %vm264_vm1, %v609_v8  ;;  %v578_v17 = vpop.f32.mrf.mxu2  ;;  %v598_v19 = vpop.f32.mrf.mxu3 }
  0xcd   : > { %744 = vst.msk [vmem:[%s1196_s5 + $0x28] sm:$0xff] %vm264_vm1, %v712_v13  ;;  %v625_v20 = vadd.f32 %v578_v17, %v319_v12  ;;  %v540_v22 = vpop.f32.mrf.mxu0  ;;  %v560_v25 = vpop.f32.mrf.mxu1  ;;  %v633_v28 = vadd.f32 %v598_v19, %v327_v18 }
  0xce   : > { %752 = vst.msk [vmem:[%s1196_s5 + $0x68] sm:$0xff] %vm264_vm1, %v720_v16  ;;  %v692_v23 = vld [vmem:[#allocation2 + $0xa8] sm:$0xff]  ;;  %v610_v31 = vadd.f32 %v540_v22, %v304_v21  ;;  %v618_v32 = vadd.f32 %v560_v25, %v312_v24 }
  0xcf   : > { %v728_v26 = vadd.f32 %v1191_v29, %v692_v23  ;;  %v700_v27 = vld [vmem:[#allocation2 + $0xe8] sm:$0xff]  ;;  %650 = vst.msk [vmem:[#allocation2 + $0x70] sm:$0xff] %vm264_vm1, %v617_v15 }
  0xd0   : > { %v736_v30 = vadd.f32 %v1191_v29, %v700_v27  ;;  %658 = vst.msk [vmem:[#allocation2 + $0xb0] sm:$0xff] %vm264_vm1, %v625_v20 }
  0xd1   : > { %760 = vst.msk [vmem:[%s1196_s5 + $0xa8] sm:$0xff] %vm264_vm1, %v728_v26 }
  0xd2   : > { %768 = vst.msk [vmem:[%s1196_s5 + $0xe8] sm:$0xff] %vm264_vm1, %v736_v30 }
  0xd3   : > { %v677_v35 = vld [vmem:[#allocation2 + $0x30] sm:$0xff]  ;;  %666 = vst.msk [vmem:[#allocation2 + $0xf0] sm:$0xff] %vm264_vm1, %v633_v28 }
  0xd4   : > { %v713_v36 = vadd.f32 %v1191_v29, %v677_v35  ;;  %643 = vst.msk [vmem:[#allocation2 + $0x38] sm:$0xff] %vm264_vm1, %v610_v31  ;;  %v580_v37 = vpop.f32.mrf.mxu2  ;;  %v600_v38 = vpop.f32.mrf.mxu3 }
  0xd5   : > { %651 = vst.msk [vmem:[#allocation2 + $0x78] sm:$0xff] %vm264_vm1, %v618_v32  ;;  %v626_v39 = vadd.f32 %v580_v37, %v320_v33  ;;  %v634_v40 = vadd.f32 %v600_v38, %v328_v34 }
  0xd6   : > { %745 = vst.msk [vmem:[%s1196_s5 + $0x30] sm:$0xff] %vm264_vm1, %v713_v36  ;;  %v685_v41 = vld [vmem:[#allocation2 + $0x70] sm:$0xff] }
  0xd7   : > { %v721_v42 = vadd.f32 %v1191_v29, %v685_v41  ;;  %v693_v43 = vld [vmem:[#allocation2 + $0xb0] sm:$0xff]  ;;  %659 = vst.msk [vmem:[#allocation2 + $0xb8] sm:$0xff] %vm264_vm1, %v626_v39 }
  0xd8   : > { %v729_v44 = vadd.f32 %v1191_v29, %v693_v43  ;;  %667 = vst.msk [vmem:[#allocation2 + $0xf8] sm:$0xff] %vm264_vm1, %v634_v40 }
  0xd9   : > { %753 = vst.msk [vmem:[%s1196_s5 + $0x70] sm:$0xff] %vm264_vm1, %v721_v42 }
  0xda   : > { %761 = vst.msk [vmem:[%s1196_s5 + $0xb0] sm:$0xff] %vm264_vm1, %v729_v44  ;;  %v701_v45 = vld [vmem:[#allocation2 + $0xf0] sm:$0xff] }
  0xdb   : > { %v737_v46 = vadd.f32 %v1191_v29, %v701_v45  ;;  %v678_v47 = vld [vmem:[#allocation2 + $0x38] sm:$0xff] }
  0xdc   : > { %v714_v48 = vadd.f32 %v1191_v29, %v678_v47  ;;  %v686_v49 = vld [vmem:[#allocation2 + $0x78] sm:$0xff] }
  0xdd   : > { %769 = vst.msk [vmem:[%s1196_s5 + $0xf0] sm:$0xff] %vm264_vm1, %v737_v46  ;;  %v722_v50 = vadd.f32 %v1191_v29, %v686_v49 }
  0xde   : > { %746 = vst.msk [vmem:[%s1196_s5 + $0x38] sm:$0xff] %vm264_vm1, %v714_v48  ;;  %v694_v51 = vld [vmem:[#allocation2 + $0xb8] sm:$0xff] }
  0xdf   : > { %754 = vst.msk [vmem:[%s1196_s5 + $0x78] sm:$0xff] %vm264_vm1, %v722_v50  ;;  %v730_v52 = vadd.f32 %v1191_v29, %v694_v51  ;;  %v702_v53 = vld [vmem:[#allocation2 + $0xf8] sm:$0xff] }
  0xe0   : > { %v738_v54 = vadd.f32 %v1191_v29, %v702_v53 }
  0xe1   : > { %762 = vst.msk [vmem:[%s1196_s5 + $0xb8] sm:$0xff] %vm264_vm1, %v730_v52 }
  0xe2   : > { %770 = vst.msk [vmem:[%s1196_s5 + $0xf8] sm:$0xff] %vm264_vm1, %v738_v54 }
  0xe3 PF: > { %s13_s14 = sadd.s32 1, %s1063_s14   ;;  %s1337_s12 = smov %s1059_s13 }
  0xe4   : > { %p10_p5 = scmp.ge.s32.totalorder %s13_s14, 4   ;;  %s1338_s13 = smov %s1340_s15 }
  0xe6   :  { %12 = sbr.rel (!%p10_p5) target bundleno = 2 (0x2), region = 76 }

// kernel: _lambda_.18
= control target key start
LH: loop header
LB: loop body
LE: loop exit
PB: predicated region body
PF: predicated region fallthrough
CT: control target
= control target key end

     0   :  { %vm18_vm0 = vcmask 130048   ;;  %v426_v6 = vmov 0.0   ;;  %s612_s1 = inlined_call_operand.vmem [shape: bf16[128,16], index: 1, kind: input, shape index: {}]   ;;  %s613_s2 = inlined_call_operand.vmem [shape: f32[1,16], index: 2, kind: input, shape index: {}]   ;;  %s614_s0 = inlined_call_operand.vmem [shape: bf16[128,128], index: 0, kind: input, shape index: {}]   ;;  %s615_s3 = inlined_call_operand.vmem [shape: f32[128,16], index: 3, kind: output, shape index: {}]  }
   0x1   :  { %v399_v0 = vld [vmem:[%s612_s1 + $0x38] sm:$0xff]  ;;  %v398_v1 = vld [vmem:[%s612_s1 + $0x30] sm:$0xff]  ;;  %v397_v2 = vld [vmem:[%s612_s1 + $0x28] sm:$0xff]  ;;  %19 = vst.msk [vmem:[#allocation2] sm:$0xff] %vm18_vm0, %v426_v6 }
   0x2   :  { %179 = vmatpush.bf16.msra.mxu0 %v399_v0  ;;  %400 = vmatpush.bf16.msra.mxu1 %v399_v0  ;;  %v396_v3 = vld [vmem:[%s612_s1 + $0x20] sm:$0xff]  ;;  %v395_v4 = vld [vmem:[%s612_s1 + $0x18] sm:$0xff]  ;;  %v394_v5 = vld [vmem:[%s612_s1 + $0x10] sm:$0xff]  ;;  %20 = vst.msk [vmem:[#allocation2 + $0x8] sm:$0xff] %vm18_vm0, %v426_v6 }
   0x3   :  { %401 = vmatpush.bf16.msra.mxu2 %v399_v0  ;;  %402 = vmatpush.bf16.msra.mxu3 %v399_v0  ;;  %21 = vst.msk [vmem:[#allocation2 + $0x10] sm:$0xff] %vm18_vm0, %v426_v6  ;;  %v393_v7 = vld [vmem:[%s612_s1 + $0x8] sm:$0xff]  ;;  %v392_v8 = vld [vmem:[%s612_s1] sm:$0xff]  ;;  %v386_v10 = vld [vmem:[%s614_s0 + $0x10] sm:$0xff] }
   0x4   :  { %22 = vst.msk [vmem:[#allocation2 + $0x18] sm:$0xff] %vm18_vm0, %v426_v6  ;;  %v384_v9 = vld [vmem:[%s614_s0] sm:$0xff]  ;;  %v390_v12 = vld [vmem:[%s614_s0 + $0x30] sm:$0xff]  ;;  %v385_v13 = vld [vmem:[%s614_s0 + $0x8] sm:$0xff] }
   0x5   :  { %23 = vst.msk [vmem:[#allocation2 + $0x20] sm:$0xff] %vm18_vm0, %v426_v6  ;;  %v388_v11 = vld [vmem:[%s614_s0 + $0x20] sm:$0xff]  ;;  %v387_v14 = vld [vmem:[%s614_s0 + $0x18] sm:$0xff]  ;;  %v389_v15 = vld [vmem:[%s614_s0 + $0x28] sm:$0xff] }
   0x6   :  { %180 = vmatpush.bf16.msra.mxu0 %v398_v1  ;;  %403 = vmatpush.bf16.msra.mxu1 %v398_v1  ;;  %24 = vst.msk [vmem:[#allocation2 + $0x28] sm:$0xff] %vm18_vm0, %v426_v6  ;;  %v391_v16 = vld [vmem:[%s614_s0 + $0x38] sm:$0xff]  ;;  %v516_v26 = vld [vmem:[%s613_s2] ss:$0 sm:$0xff] }
   0x7   :  { %404 = vmatpush.bf16.msra.mxu2 %v398_v1  ;;  %405 = vmatpush.bf16.msra.mxu3 %v398_v1  ;;  %25 = vst.msk [vmem:[#allocation2 + $0x30] sm:$0xff] %vm18_vm0, %v426_v6 }
   0x8   :  { %26 = vst.msk [vmem:[#allocation2 + $0x38] sm:$0xff] %vm18_vm0, %v426_v6  ;;  %v35_v17 = vld [vmem:[#allocation2] sm:$0xff] }
   0x9   :  { %27 = vst.msk [vmem:[#allocation2 + $0x40] sm:$0xff] %vm18_vm0, %v426_v6  ;;  %v36_v25 = vld [vmem:[#allocation2 + $0x8] sm:$0xff] }
   0xa   :  { %181 = vmatpush.bf16.msra.mxu0 %v397_v2  ;;  %406 = vmatpush.bf16.msra.mxu1 %v397_v2  ;;  %28 = vst.msk [vmem:[#allocation2 + $0x48] sm:$0xff] %vm18_vm0, %v426_v6  ;;  %v37_v46 = vld [vmem:[#allocation2 + $0x10] sm:$0xff] }
   0xb   :  { %407 = vmatpush.bf16.msra.mxu2 %v397_v2  ;;  %408 = vmatpush.bf16.msra.mxu3 %v397_v2  ;;  %29 = vst.msk [vmem:[#allocation2 + $0x50] sm:$0xff] %vm18_vm0, %v426_v6  ;;  %v38_v0 = vld [vmem:[#allocation2 + $0x18] sm:$0xff] }
   0xc   :  { %30 = vst.msk [vmem:[#allocation2 + $0x58] sm:$0xff] %vm18_vm0, %v426_v6  ;;  %v39_v18 = vld [vmem:[#allocation2 + $0x20] sm:$0xff] }
   0xd   :  { %31 = vst.msk [vmem:[#allocation2 + $0x60] sm:$0xff] %vm18_vm0, %v426_v6  ;;  %v40_v32 = vld [vmem:[#allocation2 + $0x28] sm:$0xff] }
   0xe   :  { %182 = vmatpush.bf16.msra.mxu0 %v396_v3  ;;  %409 = vmatpush.bf16.msra.mxu1 %v396_v3  ;;  %32 = vst.msk [vmem:[#allocation2 + $0x68] sm:$0xff] %vm18_vm0, %v426_v6  ;;  %v41_v50 = vld [vmem:[#allocation2 + $0x30] sm:$0xff] }
   0xf   :  { %410 = vmatpush.bf16.msra.mxu2 %v396_v3  ;;  %411 = vmatpush.bf16.msra.mxu3 %v396_v3  ;;  %33 = vst.msk [vmem:[#allocation2 + $0x70] sm:$0xff] %vm18_vm0, %v426_v6 }
  0x10   :  { %34 = vst.msk [vmem:[#allocation2 + $0x78] sm:$0xff] %vm18_vm0, %v426_v6  ;;  %v43_v23 = vld [vmem:[#allocation2 + $0x40] sm:$0xff] }
  0x11   :  { %v44_v40 = vld [vmem:[#allocation2 + $0x48] sm:$0xff] }
  0x12   :  { %183 = vmatpush.bf16.msra.mxu0 %v395_v4  ;;  %412 = vmatpush.bf16.msra.mxu1 %v395_v4  ;;  %v45_v58 = vld [vmem:[#allocation2 + $0x50] sm:$0xff] }
  0x13   :  { %413 = vmatpush.bf16.msra.mxu2 %v395_v4  ;;  %414 = vmatpush.bf16.msra.mxu3 %v395_v4  ;;  %v42_v4 = vld [vmem:[#allocation2 + $0x38] sm:$0xff] }
  0x14   :  { %v47_v24 = vld [vmem:[#allocation2 + $0x60] sm:$0xff] }
  0x15   :  { %v48_v41 = vld [vmem:[#allocation2 + $0x68] sm:$0xff] }
  0x16   :  { %184 = vmatpush.bf16.msra.mxu0 %v394_v5  ;;  %415 = vmatpush.bf16.msra.mxu1 %v394_v5  ;;  %v49_v59 = vld [vmem:[#allocation2 + $0x70] sm:$0xff] }
  0x17   :  { %416 = vmatpush.bf16.msra.mxu2 %v394_v5  ;;  %417 = vmatpush.bf16.msra.mxu3 %v394_v5 }
  0x1a   :  { %185 = vmatpush.bf16.msra.mxu0 %v393_v7  ;;  %418 = vmatpush.bf16.msra.mxu1 %v393_v7 }
  0x1b   :  { %419 = vmatpush.bf16.msra.mxu2 %v393_v7  ;;  %420 = vmatpush.bf16.msra.mxu3 %v393_v7 }
  0x1e   :  { %186 = vmatpush.bf16.msra.mxu0 %v392_v8  ;;  %421 = vmatpush.bf16.msra.mxu1 %v392_v8 }
  0x1f   :  { %422 = vmatpush.bf16.msra.mxu2 %v392_v8  ;;  %423 = vmatpush.bf16.msra.mxu3 %v392_v8 }
  0x21   :  { %187 = vmatmul.bf16.vlgmr.msra.gmra.mxu0 %v384_v9  ;;  %197 = vmatmul.bf16.vlgmr.msra.gmra.mxu1 %v386_v10 }
  0x22   :  { %207 = vmatmul.bf16.vlgmr.msra.gmra.mxu2 %v388_v11  ;;  %217 = vmatmul.bf16.vlgmr.msra.gmra.mxu3 %v390_v12  ;;  %v46_v12 = vld [vmem:[#allocation2 + $0x58] sm:$0xff] }
  0x31   :  { %192 = vmatmul.bf16.gmra.mxu0 %v385_v13  ;;  %202 = vmatmul.bf16.gmra.mxu1 %v387_v14 }
  0x32   :  { %212 = vmatmul.bf16.gmra.mxu2 %v389_v15  ;;  %222 = vmatmul.bf16.gmra.mxu3 %v391_v16 }
  0x9e   :  { %v188_v19 = vpop.f32.mrf.mxu0  ;;  %v198_v20 = vpop.f32.mrf.mxu1 }
  0x9f   :  { %v228_v21 = vadd.f32 %v188_v19, %v35_v17  ;;  %v232_v22 = vadd.f32 %v198_v20, %v39_v18  ;;  %v50_v17 = vld [vmem:[#allocation2 + $0x78] sm:$0xff] }
  0xa1   :  { %245 = vst.msk [vmem:[#allocation2] sm:$0xff] %vm18_vm0, %v228_v21 }
  0xa2   :  { %249 = vst.msk [vmem:[#allocation2 + $0x20] sm:$0xff] %vm18_vm0, %v232_v22 }
  0xa5   :  { %v208_v27 = vpop.f32.mrf.mxu2  ;;  %v218_v28 = vpop.f32.mrf.mxu3 }
  0xa6   :  { %v236_v29 = vadd.f32 %v208_v27, %v43_v23  ;;  %v240_v30 = vadd.f32 %v218_v28, %v47_v24  ;;  %v190_v31 = vpop.f32.mrf.mxu0  ;;  %v200_v33 = vpop.f32.mrf.mxu1 }
  0xa7   :  { %v229_v34 = vadd.f32 %v190_v31, %v36_v25  ;;  %v233_v38 = vadd.f32 %v200_v33, %v40_v32 }
  0xa8   :  { %v264_v35 = vld [vmem:[#allocation2] sm:$0xff]  ;;  %253 = vst.msk [vmem:[#allocation2 + $0x40] sm:$0xff] %vm18_vm0, %v236_v29 }
  0xa9   :  { %v284_v36 = vadd.f32 %v516_v26, %v264_v35  ;;  %v268_v37 = vld [vmem:[#allocation2 + $0x20] sm:$0xff]  ;;  %257 = vst.msk [vmem:[#allocation2 + $0x60] sm:$0xff] %vm18_vm0, %v240_v30 }
  0xaa   :  { %v288_v39 = vadd.f32 %v516_v26, %v268_v37  ;;  %246 = vst.msk [vmem:[#allocation2 + $0x8] sm:$0xff] %vm18_vm0, %v229_v34 }
  0xab   :  { %300 = vst.msk [vmem:[%s615_s3] sm:$0xff] %vm18_vm0, %v284_v36 }
  0xac   :  { %304 = vst.msk [vmem:[%s615_s3 + $0x20] sm:$0xff] %vm18_vm0, %v288_v39 }
  0xad   :  { %250 = vst.msk [vmem:[#allocation2 + $0x28] sm:$0xff] %vm18_vm0, %v233_v38  ;;  %v210_v42 = vpop.f32.mrf.mxu2  ;;  %v220_v43 = vpop.f32.mrf.mxu3 }
  0xae   :  { %v237_v44 = vadd.f32 %v210_v42, %v44_v40  ;;  %v241_v45 = vadd.f32 %v220_v43, %v48_v41  ;;  %v193_v47 = vpop.f32.mrf.mxu0  ;;  %v203_v48 = vpop.f32.mrf.mxu1 }
  0xaf   :  { %v272_v49 = vld [vmem:[#allocation2 + $0x40] sm:$0xff]  ;;  %v230_v55 = vadd.f32 %v193_v47, %v37_v46  ;;  %v234_v57 = vadd.f32 %v203_v48, %v41_v50 }
  0xb0   :  { %v292_v51 = vadd.f32 %v516_v26, %v272_v49  ;;  %v276_v52 = vld [vmem:[#allocation2 + $0x60] sm:$0xff]  ;;  %254 = vst.msk [vmem:[#allocation2 + $0x48] sm:$0xff] %vm18_vm0, %v237_v44 }
  0xb1   :  { %v296_v53 = vadd.f32 %v516_v26, %v276_v52  ;;  %v265_v54 = vld [vmem:[#allocation2 + $0x8] sm:$0xff]  ;;  %258 = vst.msk [vmem:[#allocation2 + $0x68] sm:$0xff] %vm18_vm0, %v241_v45 }
  0xb2   :  { %308 = vst.msk [vmem:[%s615_s3 + $0x40] sm:$0xff] %vm18_vm0, %v292_v51  ;;  %v285_v56 = vadd.f32 %v516_v26, %v265_v54 }
  0xb3   :  { %312 = vst.msk [vmem:[%s615_s3 + $0x60] sm:$0xff] %vm18_vm0, %v296_v53 }
  0xb4   :  { %301 = vst.msk [vmem:[%s615_s3 + $0x8] sm:$0xff] %vm18_vm0, %v285_v56  ;;  %v269_v60 = vld [vmem:[#allocation2 + $0x28] sm:$0xff] }
  0xb5   :  { %v289_v61 = vadd.f32 %v516_v26, %v269_v60  ;;  %247 = vst.msk [vmem:[#allocation2 + $0x10] sm:$0xff] %vm18_vm0, %v230_v55  ;;  %v213_v62 = vpop.f32.mrf.mxu2  ;;  %v223_v63 = vpop.f32.mrf.mxu3 }
  0xb6   :  { %251 = vst.msk [vmem:[#allocation2 + $0x30] sm:$0xff] %vm18_vm0, %v234_v57  ;;  %v238_v1 = vadd.f32 %v213_v62, %v45_v58  ;;  %v242_v2 = vadd.f32 %v223_v63, %v49_v59  ;;  %v195_v3 = vpop.f32.mrf.mxu0  ;;  %v205_v5 = vpop.f32.mrf.mxu1 }
  0xb7   :  { %305 = vst.msk [vmem:[%s615_s3 + $0x28] sm:$0xff] %vm18_vm0, %v289_v61  ;;  %v273_v6 = vld [vmem:[#allocation2 + $0x48] sm:$0xff]  ;;  %v231_v9 = vadd.f32 %v195_v3, %v38_v0  ;;  %v235_v11 = vadd.f32 %v205_v5, %v42_v4 }
  0xb8   :  { %v293_v7 = vadd.f32 %v516_v26, %v273_v6  ;;  %v277_v8 = vld [vmem:[#allocation2 + $0x68] sm:$0xff]  ;;  %255 = vst.msk [vmem:[#allocation2 + $0x50] sm:$0xff] %vm18_vm0, %v238_v1 }
  0xb9   :  { %v297_v10 = vadd.f32 %v516_v26, %v277_v8  ;;  %259 = vst.msk [vmem:[#allocation2 + $0x70] sm:$0xff] %vm18_vm0, %v242_v2 }
  0xba   :  { %309 = vst.msk [vmem:[%s615_s3 + $0x48] sm:$0xff] %vm18_vm0, %v293_v7 }
  0xbb   :  { %313 = vst.msk [vmem:[%s615_s3 + $0x68] sm:$0xff] %vm18_vm0, %v297_v10 }
  0xbc   :  { %v266_v13 = vld [vmem:[#allocation2 + $0x10] sm:$0xff]  ;;  %248 = vst.msk [vmem:[#allocation2 + $0x18] sm:$0xff] %vm18_vm0, %v231_v9 }
  0xbd   :  { %v286_v14 = vadd.f32 %v516_v26, %v266_v13  ;;  %v270_v15 = vld [vmem:[#allocation2 + $0x30] sm:$0xff]  ;;  %252 = vst.msk [vmem:[#allocation2 + $0x38] sm:$0xff] %vm18_vm0, %v235_v11  ;;  %v215_v16 = vpop.f32.mrf.mxu2  ;;  %v225_v18 = vpop.f32.mrf.mxu3 }
  0xbe   :  { %v290_v19 = vadd.f32 %v516_v26, %v270_v15  ;;  %v239_v20 = vadd.f32 %v215_v16, %v46_v12  ;;  %v243_v24 = vadd.f32 %v225_v18, %v50_v17 }
  0xbf   :  { %302 = vst.msk [vmem:[%s615_s3 + $0x10] sm:$0xff] %vm18_vm0, %v286_v14  ;;  %v274_v21 = vld [vmem:[#allocation2 + $0x50] sm:$0xff] }
  0xc0   :  { %306 = vst.msk [vmem:[%s615_s3 + $0x30] sm:$0xff] %vm18_vm0, %v290_v19  ;;  %v294_v22 = vadd.f32 %v516_v26, %v274_v21  ;;  %v278_v23 = vld [vmem:[#allocation2 + $0x70] sm:$0xff] }
  0xc1   :  { %v298_v25 = vadd.f32 %v516_v26, %v278_v23  ;;  %256 = vst.msk [vmem:[#allocation2 + $0x58] sm:$0xff] %vm18_vm0, %v239_v20 }
  0xc2   :  { %310 = vst.msk [vmem:[%s615_s3 + $0x50] sm:$0xff] %vm18_vm0, %v294_v22 }
  0xc3   :  { %314 = vst.msk [vmem:[%s615_s3 + $0x70] sm:$0xff] %vm18_vm0, %v298_v25  ;;  %v267_v27 = vld [vmem:[#allocation2 + $0x18] sm:$0xff] }
  0xc4   :  { %v287_v28 = vadd.f32 %v516_v26, %v267_v27  ;;  %v271_v29 = vld [vmem:[#allocation2 + $0x38] sm:$0xff]  ;;  %260 = vst.msk [vmem:[#allocation2 + $0x78] sm:$0xff] %vm18_vm0, %v243_v24 }
  0xc5   :  { %v291_v30 = vadd.f32 %v516_v26, %v271_v29 }
  0xc6   :  { %303 = vst.msk [vmem:[%s615_s3 + $0x18] sm:$0xff] %vm18_vm0, %v287_v28 }
  0xc7   :  { %307 = vst.msk [vmem:[%s615_s3 + $0x38] sm:$0xff] %vm18_vm0, %v291_v30 }
  0xc8   :  { %v275_v31 = vld [vmem:[#allocation2 + $0x58] sm:$0xff] }
  0xc9   :  { %v295_v32 = vadd.f32 %v516_v26, %v275_v31 }
  0xcb   :  { %311 = vst.msk [vmem:[%s615_s3 + $0x58] sm:$0xff] %vm18_vm0, %v295_v32  ;;  %v279_v33 = vld [vmem:[#allocation2 + $0x78] sm:$0xff] }
  0xcc   :  { %v299_v34 = vadd.f32 %v516_v26, %v279_v33 }
  0xce   :  { %315 = vst.msk [vmem:[%s615_s3 + $0x78] sm:$0xff] %vm18_vm0, %v299_v34 }

// kernel: _lambda_.19
= control target key start
LH: loop header
LB: loop body
LE: loop exit
PB: predicated region body
PF: predicated region fallthrough
CT: control target
= control target key end

     0   :  { %vm70_vm0 = vcmask 130048   ;;  %s231_s0 = inlined_call_operand.vmem [shape: f32[128,16], index: 0, kind: input, shape index: {}]   ;;  %s232_s1 = inlined_call_operand.vmem [shape: f32[1,16], index: 1, kind: input, shape index: {}]   ;;  %s233_s2 = inlined_call_operand.vmem [shape: f32[1,16], index: 2, kind: input, shape index: {}]   ;;  %s234_s3 = inlined_call_operand.vmem [shape: f32[128,16], index: 3, kind: output, shape index: {}]  }
   0x1   :  { %v14_v0 = vld [vmem:[%s231_s0] sm:$0xff]  ;;  %v15_v3 = vld [vmem:[%s231_s0 + $0x8] sm:$0xff]  ;;  %v16_v6 = vld [vmem:[%s231_s0 + $0x10] sm:$0xff] }
   0x2   :  { %v91_v1 = vld [vmem:[%s232_s1] ss:$0 sm:$0xff]  ;;  %v17_v7 = vld [vmem:[%s231_s0 + $0x18] sm:$0xff]  ;;  %v19_v12 = vld [vmem:[%s231_s0 + $0x28] sm:$0xff] }
   0x3   :  { %v92_v2 = vld [vmem:[%s233_s2] ss:$0 sm:$0xff]  ;;  %v34_v4 = vmul.f32 %v91_v1, %v14_v0  ;;  %v35_v5 = vmul.f32 %v91_v1, %v15_v3  ;;  %v36_v9 = vmul.f32 %v91_v1, %v16_v6  ;;  %v37_v10 = vmul.f32 %v91_v1, %v17_v7  ;;  %v20_v13 = vld [vmem:[%s231_s0 + $0x30] sm:$0xff]  ;;  %v21_v14 = vld [vmem:[%s231_s0 + $0x38] sm:$0xff] }
   0x4   :  { %v18_v8 = vld [vmem:[%s231_s0 + $0x20] sm:$0xff]  ;;  %v39_v17 = vmul.f32 %v91_v1, %v19_v12  ;;  %v40_v18 = vmul.f32 %v91_v1, %v20_v13  ;;  %v23_v20 = vld [vmem:[%s231_s0 + $0x48] sm:$0xff]  ;;  %v41_v23 = vmul.f32 %v91_v1, %v21_v14  ;;  %v24_v24 = vld [vmem:[%s231_s0 + $0x50] sm:$0xff] }
   0x5   :  { %v38_v11 = vmul.f32 %v91_v1, %v18_v8  ;;  %v54_v15 = vadd.f32 %v92_v2, %v34_v4  ;;  %v55_v16 = vadd.f32 %v92_v2, %v35_v5  ;;  %v22_v19 = vld [vmem:[%s231_s0 + $0x40] sm:$0xff]  ;;  %v56_v21 = vadd.f32 %v92_v2, %v36_v9  ;;  %v25_v27 = vld [vmem:[%s231_s0 + $0x58] sm:$0xff]  ;;  %v27_v33 = vld [vmem:[%s231_s0 + $0x68] sm:$0xff] }
   0x6   :  { %v57_v22 = vadd.f32 %v92_v2, %v37_v10  ;;  %v42_v26 = vmul.f32 %v91_v1, %v22_v19  ;;  %v59_v28 = vadd.f32 %v92_v2, %v39_v17  ;;  %v43_v29 = vmul.f32 %v91_v1, %v23_v20  ;;  %v26_v30 = vld [vmem:[%s231_s0 + $0x60] sm:$0xff]  ;;  %v28_v36 = vld [vmem:[%s231_s0 + $0x70] sm:$0xff]  ;;  %v29_v39 = vld [vmem:[%s231_s0 + $0x78] sm:$0xff] }
   0x7   :  { %71 = vst.msk [vmem:[%s234_s3] sm:$0xff] %vm70_vm0, %v54_v15  ;;  %v58_v25 = vadd.f32 %v92_v2, %v38_v11  ;;  %v60_v31 = vadd.f32 %v92_v2, %v40_v18  ;;  %v44_v32 = vmul.f32 %v91_v1, %v24_v24  ;;  %v61_v34 = vadd.f32 %v92_v2, %v41_v23 }
   0x8   :  { %72 = vst.msk [vmem:[%s234_s3 + $0x8] sm:$0xff] %vm70_vm0, %v55_v16  ;;  %v45_v35 = vmul.f32 %v91_v1, %v25_v27  ;;  %v62_v37 = vadd.f32 %v92_v2, %v42_v26  ;;  %v46_v38 = vmul.f32 %v91_v1, %v26_v30  ;;  %v63_v40 = vadd.f32 %v92_v2, %v43_v29 }
   0x9   :  { %73 = vst.msk [vmem:[%s234_s3 + $0x10] sm:$0xff] %vm70_vm0, %v56_v21  ;;  %v47_v41 = vmul.f32 %v91_v1, %v27_v33  ;;  %v64_v42 = vadd.f32 %v92_v2, %v44_v32  ;;  %v48_v43 = vmul.f32 %v91_v1, %v28_v36  ;;  %v49_v45 = vmul.f32 %v91_v1, %v29_v39 }
   0xa   :  { %74 = vst.msk [vmem:[%s234_s3 + $0x18] sm:$0xff] %vm70_vm0, %v57_v22  ;;  %v65_v44 = vadd.f32 %v92_v2, %v45_v35  ;;  %v66_v46 = vadd.f32 %v92_v2, %v46_v38 }
   0xb   :  { %75 = vst.msk [vmem:[%s234_s3 + $0x20] sm:$0xff] %vm70_vm0, %v58_v25  ;;  %v67_v47 = vadd.f32 %v92_v2, %v47_v41  ;;  %v68_v48 = vadd.f32 %v92_v2, %v48_v43  ;;  %v69_v49 = vadd.f32 %v92_v2, %v49_v45 }
   0xc   :  { %76 = vst.msk [vmem:[%s234_s3 + $0x28] sm:$0xff] %vm70_vm0, %v59_v28 }
   0xd   :  { %77 = vst.msk [vmem:[%s234_s3 + $0x30] sm:$0xff] %vm70_vm0, %v60_v31 }
   0xe   :  { %78 = vst.msk [vmem:[%s234_s3 + $0x38] sm:$0xff] %vm70_vm0, %v61_v34 }
   0xf   :  { %79 = vst.msk [vmem:[%s234_s3 + $0x40] sm:$0xff] %vm70_vm0, %v62_v37 }
  0x10   :  { %80 = vst.msk [vmem:[%s234_s3 + $0x48] sm:$0xff] %vm70_vm0, %v63_v40 }
  0x11   :  { %81 = vst.msk [vmem:[%s234_s3 + $0x50] sm:$0xff] %vm70_vm0, %v64_v42 }
  0x12   :  { %82 = vst.msk [vmem:[%s234_s3 + $0x58] sm:$0xff] %vm70_vm0, %v65_v44 }
  0x13   :  { %83 = vst.msk [vmem:[%s234_s3 + $0x60] sm:$0xff] %vm70_vm0, %v66_v46 }
  0x14   :  { %84 = vst.msk [vmem:[%s234_s3 + $0x68] sm:$0xff] %vm70_vm0, %v67_v47 }
  0x15   :  { %85 = vst.msk [vmem:[%s234_s3 + $0x70] sm:$0xff] %vm70_vm0, %v68_v48 }
  0x16   :  { %86 = vst.msk [vmem:[%s234_s3 + $0x78] sm:$0xff] %vm70_vm0, %v69_v49 }

// kernel: _lambda_.20
= control target key start
LH: loop header
LB: loop body
LE: loop exit
PB: predicated region body
PF: predicated region fallthrough
CT: control target
= control target key end

     0   :  { %vm18_vm0 = vcmask 261120   ;;  %v367_v28 = vmov 0.0   ;;  %s487_s1 = inlined_call_operand.vmem [shape: bf16[256,32], index: 1, kind: input, shape index: {}]   ;;  %s488_s0 = inlined_call_operand.vmem [shape: bf16[32,256], index: 0, kind: input, shape index: {}]   ;;  %s489_s2 = inlined_call_operand.vmem [shape: f32[1,32], index: 2, kind: input, shape index: {}]   ;;  %s490_s3 = inlined_call_operand.vmem [shape: f32[32,32], index: 3, kind: output, shape index: {}]  }
   0x1   :  { %v340_v0 = vld [vmem:[%s487_s1 + $0x38] sm:$0xff]  ;;  %v339_v2 = vld [vmem:[%s487_s1 + $0x30] sm:$0xff]  ;;  %v338_v4 = vld [vmem:[%s487_s1 + $0x28] sm:$0xff]  ;;  %19 = vst.msk [vmem:[#allocation2] sm:$0xff] %vm18_vm0, %v367_v28 }
   0x2   :  { %v348_v1 = vld [vmem:[%s487_s1 + $0x78] sm:$0xff]  ;;  %179 = vmatpush.bf16.msra.mxu0 %v340_v0  ;;  %349 = vmatpush.bf16.msra.mxu2 %v340_v0  ;;  %v347_v3 = vld [vmem:[%s487_s1 + $0x70] sm:$0xff]  ;;  %v346_v5 = vld [vmem:[%s487_s1 + $0x68] sm:$0xff]  ;;  %20 = vst.msk [vmem:[#allocation2 + $0x8] sm:$0xff] %vm18_vm0, %v367_v28 }
   0x3   :  { %198 = vmatpush.bf16.msra.mxu1 %v348_v1  ;;  %357 = vmatpush.bf16.msra.mxu3 %v348_v1  ;;  %v337_v6 = vld [vmem:[%s487_s1 + $0x20] sm:$0xff]  ;;  %v336_v8 = vld [vmem:[%s487_s1 + $0x18] sm:$0xff]  ;;  %v335_v10 = vld [vmem:[%s487_s1 + $0x10] sm:$0xff]  ;;  %21 = vst.msk [vmem:[#allocation2 + $0x10] sm:$0xff] %vm18_vm0, %v367_v28 }
   0x4   :  { %v345_v7 = vld [vmem:[%s487_s1 + $0x60] sm:$0xff]  ;;  %v344_v9 = vld [vmem:[%s487_s1 + $0x58] sm:$0xff]  ;;  %v343_v11 = vld [vmem:[%s487_s1 + $0x50] sm:$0xff]  ;;  %22 = vst.msk [vmem:[#allocation2 + $0x18] sm:$0xff] %vm18_vm0, %v367_v28 }
   0x5   :  { %v334_v12 = vld [vmem:[%s487_s1 + $0x8] sm:$0xff]  ;;  %v333_v14 = vld [vmem:[%s487_s1] sm:$0xff]  ;;  %v259_v18 = vld [vmem:[%s488_s0 + $0x10] sm:$0xf] }
   0x6   :  { %180 = vmatpush.bf16.msra.mxu0 %v339_v2  ;;  %350 = vmatpush.bf16.msra.mxu2 %v339_v2  ;;  %v342_v13 = vld [vmem:[%s487_s1 + $0x48] sm:$0xff]  ;;  %v341_v15 = vld [vmem:[%s487_s1 + $0x40] sm:$0xff]  ;;  %v332_v19 = vld [vmem:[%s488_s0 + $0x14] sm:$0xf0] }
   0x7   :  { %199 = vmatpush.bf16.msra.mxu1 %v347_v3  ;;  %358 = vmatpush.bf16.msra.mxu3 %v347_v3  ;;  %v251_v16 = vld [vmem:[%s488_s0] sm:$0xf]  ;;  %v330_v17 = vld [vmem:[%s488_s0 + $0x4] sm:$0xf0]  ;;  %v329_v20 = vld [vmem:[%s488_s0 + $0x4] sm:$0xf]  ;;  %v260_v25 = vor.u32 %v332_v19, %v259_v18 }
   0x8   :  { %v253_v21 = vld [vmem:[%s488_s0 + $0x8] sm:$0xf0]  ;;  %v331_v22 = vld [vmem:[%s488_s0 + $0x14] sm:$0xf]  ;;  %v261_v23 = vld [vmem:[%s488_s0 + $0x18] sm:$0xf0]  ;;  %v252_v24 = vor.u32 %v330_v17, %v251_v16 }
   0x9   :  { %v256_v26 = vor.u32 %v329_v20, %v253_v21  ;;  %v264_v27 = vor.u32 %v331_v22, %v261_v23  ;;  %v23_v30 = vld [vmem:[#allocation2] sm:$0xff]  ;;  %v24_v39 = vld [vmem:[#allocation2 + $0x8] sm:$0xff] }
   0xa   :  { %181 = vmatpush.bf16.msra.mxu0 %v338_v4  ;;  %351 = vmatpush.bf16.msra.mxu2 %v338_v4  ;;  %v25_v35 = vld [vmem:[#allocation2 + $0x10] sm:$0xff]  ;;  %v366_v41 = vld [vmem:[%s489_s2] ss:$0 sm:$0xff] }
   0xb   :  { %200 = vmatpush.bf16.msra.mxu1 %v346_v5  ;;  %359 = vmatpush.bf16.msra.mxu3 %v346_v5  ;;  %v26_v48 = vld [vmem:[#allocation2 + $0x18] sm:$0xff] }
   0xe   :  { %182 = vmatpush.bf16.msra.mxu0 %v337_v6  ;;  %352 = vmatpush.bf16.msra.mxu2 %v337_v6 }
   0xf   :  { %201 = vmatpush.bf16.msra.mxu1 %v345_v7  ;;  %360 = vmatpush.bf16.msra.mxu3 %v345_v7 }
  0x12   :  { %183 = vmatpush.bf16.msra.mxu0 %v336_v8  ;;  %353 = vmatpush.bf16.msra.mxu2 %v336_v8 }
  0x13   :  { %202 = vmatpush.bf16.msra.mxu1 %v344_v9  ;;  %361 = vmatpush.bf16.msra.mxu3 %v344_v9 }
  0x16   :  { %184 = vmatpush.bf16.msra.mxu0 %v335_v10  ;;  %354 = vmatpush.bf16.msra.mxu2 %v335_v10 }
  0x17   :  { %203 = vmatpush.bf16.msra.mxu1 %v343_v11  ;;  %362 = vmatpush.bf16.msra.mxu3 %v343_v11 }
  0x1a   :  { %185 = vmatpush.bf16.msra.mxu0 %v334_v12  ;;  %355 = vmatpush.bf16.msra.mxu2 %v334_v12 }
  0x1b   :  { %204 = vmatpush.bf16.msra.mxu1 %v342_v13  ;;  %363 = vmatpush.bf16.msra.mxu3 %v342_v13 }
  0x1e   :  { %186 = vmatpush.bf16.msra.mxu0 %v333_v14  ;;  %356 = vmatpush.bf16.msra.mxu2 %v333_v14 }
  0x1f   :  { %205 = vmatpush.bf16.msra.mxu1 %v341_v15  ;;  %364 = vmatpush.bf16.msra.mxu3 %v341_v15 }
  0x21   :  { %187 = vmatmul.bf16.vlgmr.msra.gmra.mxu0 %v252_v24  ;;  %192 = vmatmul.bf16.vlgmr.msra.gmra.mxu2 %v260_v25 }
  0x22   :  { %206 = vmatmul.bf16.vlgmr.msra.gmra.mxu1 %v256_v26  ;;  %211 = vmatmul.bf16.vlgmr.msra.gmra.mxu3 %v264_v27 }
  0x9e   :  { %v188_v29 = vpop.f32.mrf.mxu0 }
  0x9f   :  { %v207_v31 = vpop.f32.mrf.mxu1 }
  0xa0   :  { %v208_v32 = vadd.f32 %v207_v31, %v188_v29 }
  0xa2   :  { %v217_v33 = vadd.f32 %v208_v32, %v23_v30 }
  0xa4   :  { %222 = vst.msk [vmem:[#allocation2] sm:$0xff] %vm18_vm0, %v217_v33  ;;  %v193_v34 = vpop.f32.mrf.mxu2 }
  0xa5   :  { %v212_v36 = vpop.f32.mrf.mxu3 }
  0xa6   :  { %v213_v37 = vadd.f32 %v212_v36, %v193_v34  ;;  %v190_v38 = vpop.f32.mrf.mxu0 }
  0xa7   :  { %v209_v40 = vpop.f32.mrf.mxu1 }
  0xa8   :  { %v219_v42 = vadd.f32 %v213_v37, %v25_v35  ;;  %v210_v43 = vadd.f32 %v209_v40, %v190_v38 }
  0xaa   :  { %224 = vst.msk [vmem:[#allocation2 + $0x10] sm:$0xff] %vm18_vm0, %v219_v42  ;;  %v218_v44 = vadd.f32 %v210_v43, %v24_v39 }
  0xab   :  { %v229_v45 = vld [vmem:[#allocation2] sm:$0xff] }
  0xac   :  { %v237_v46 = vadd.f32 %v366_v41, %v229_v45  ;;  %223 = vst.msk [vmem:[#allocation2 + $0x8] sm:$0xff] %vm18_vm0, %v218_v44  ;;  %v195_v47 = vpop.f32.mrf.mxu2 }
  0xad   :  { %v214_v49 = vpop.f32.mrf.mxu3 }
  0xae   :  { %241 = vst.msk [vmem:[%s490_s3] sm:$0xff] %vm18_vm0, %v237_v46  ;;  %v215_v50 = vadd.f32 %v214_v49, %v195_v47 }
  0xb0   :  { %v220_v51 = vadd.f32 %v215_v50, %v26_v48 }
  0xb1   :  { %v231_v52 = vld [vmem:[#allocation2 + $0x10] sm:$0xff] }
  0xb2   :  { %v239_v53 = vadd.f32 %v366_v41, %v231_v52  ;;  %225 = vst.msk [vmem:[#allocation2 + $0x18] sm:$0xff] %vm18_vm0, %v220_v51 }
  0xb3   :  { %v230_v54 = vld [vmem:[#allocation2 + $0x8] sm:$0xff] }
  0xb4   :  { %243 = vst.msk [vmem:[%s490_s3 + $0x10] sm:$0xff] %vm18_vm0, %v239_v53  ;;  %v238_v55 = vadd.f32 %v366_v41, %v230_v54 }
  0xb6   :  { %242 = vst.msk [vmem:[%s490_s3 + $0x8] sm:$0xff] %vm18_vm0, %v238_v55 }
  0xb9   :  { %v232_v56 = vld [vmem:[#allocation2 + $0x18] sm:$0xff] }
  0xba   :  { %v240_v57 = vadd.f32 %v366_v41, %v232_v56 }
  0xbc   :  { %244 = vst.msk [vmem:[%s490_s3 + $0x18] sm:$0xff] %vm18_vm0, %v240_v57 }

// kernel: _lambda_.21
= control target key start
LH: loop header
LB: loop body
LE: loop exit
PB: predicated region body
PF: predicated region fallthrough
CT: control target
= control target key end

     0   :  { %vm34_vm0 = vcmask 261120   ;;  %s95_s0 = inlined_call_operand.vmem [shape: f32[32,32], index: 0, kind: input, shape index: {}]   ;;  %s96_s1 = inlined_call_operand.vmem [shape: f32[1,32], index: 1, kind: input, shape index: {}]   ;;  %s97_s2 = inlined_call_operand.vmem [shape: f32[1,32], index: 2, kind: input, shape index: {}]   ;;  %s98_s3 = inlined_call_operand.vmem [shape: f32[32,32], index: 3, kind: output, shape index: {}]  }
   0x1   :  { %v14_v0 = vld [vmem:[%s95_s0] sm:$0xff]  ;;  %v15_v3 = vld [vmem:[%s95_s0 + $0x8] sm:$0xff]  ;;  %v16_v6 = vld [vmem:[%s95_s0 + $0x10] sm:$0xff] }
   0x2   :  { %v43_v1 = vld [vmem:[%s96_s1] ss:$0 sm:$0xff]  ;;  %v17_v7 = vld [vmem:[%s95_s0 + $0x18] sm:$0xff] }
   0x3   :  { %v44_v2 = vld [vmem:[%s97_s2] ss:$0 sm:$0xff]  ;;  %v22_v4 = vmul.f32 %v43_v1, %v14_v0  ;;  %v23_v5 = vmul.f32 %v43_v1, %v15_v3  ;;  %v24_v8 = vmul.f32 %v43_v1, %v16_v6  ;;  %v25_v9 = vmul.f32 %v43_v1, %v17_v7 }
   0x5   :  { %v30_v10 = vadd.f32 %v44_v2, %v22_v4  ;;  %v31_v11 = vadd.f32 %v44_v2, %v23_v5  ;;  %v32_v12 = vadd.f32 %v44_v2, %v24_v8  ;;  %v33_v13 = vadd.f32 %v44_v2, %v25_v9 }
   0x7   :  { %35 = vst.msk [vmem:[%s98_s3] sm:$0xff] %vm34_vm0, %v30_v10 }
   0x8   :  { %36 = vst.msk [vmem:[%s98_s3 + $0x8] sm:$0xff] %vm34_vm0, %v31_v11 }
   0x9   :  { %37 = vst.msk [vmem:[%s98_s3 + $0x10] sm:$0xff] %vm34_vm0, %v32_v12 }
   0xa   :  { %38 = vst.msk [vmem:[%s98_s3 + $0x18] sm:$0xff] %vm34_vm0, %v33_v13 }

// kernel: _lambda_.23
= control target key start
LH: loop header
LB: loop body
LE: loop exit
PB: predicated region body
PF: predicated region fallthrough
CT: control target
= control target key end

     0   :  { %vm25_vm0 = vcmask 523264   ;;  %s65_s0 = inlined_call_operand.vmem [shape: f32[8,64], index: 0, kind: input, shape index: {}]   ;;  %s66_s1 = inlined_call_operand.vmem [shape: f32[1,64], index: 1, kind: input, shape index: {}]   ;;  %s67_s2 = inlined_call_operand.vmem [shape: f32[1,64], index: 2, kind: input, shape index: {}]   ;;  %s68_s3 = inlined_call_operand.vmem [shape: f32[8,64], index: 3, kind: output, shape index: {}]  }
   0x1   :  { %v14_v0 = vld [vmem:[%s65_s0] sm:$0xff] }
   0x2   :  { %v31_v1 = vld [vmem:[%s66_s1] ss:$0 sm:$0xff] }
   0x3   :  { %v32_v2 = vld [vmem:[%s67_s2] ss:$0 sm:$0xff]  ;;  %v19_v3 = vmul.f32 %v31_v1, %v14_v0 }
   0x5   :  { %v24_v4 = vadd.f32 %v32_v2, %v19_v3 }
   0x7   :  { %26 = vst.msk [vmem:[%s68_s3] sm:$0xff] %vm25_vm0, %v24_v4 }

// kernel: _lambda_.22
= control target key start
LH: loop header
LB: loop body
LE: loop exit
PB: predicated region body
PF: predicated region fallthrough
CT: control target
= control target key end

     0   :  { %vm18_vm0 = vcmask 523264   ;;  %v524_v42 = vmov 0.0   ;;  %s656_s1 = inlined_call_operand.vmem [shape: bf16[512,64], index: 1, kind: input, shape index: {}]   ;;  %s657_s0 = inlined_call_operand.vmem [shape: bf16[8,512], index: 0, kind: input, shape index: {}]   ;;  %s658_s2 = inlined_call_operand.vmem [shape: f32[1,64], index: 2, kind: input, shape index: {}]   ;;  %s659_s3 = inlined_call_operand.vmem [shape: f32[8,64], index: 3, kind: output, shape index: {}]  }
   0x1   :  { %v497_v0 = vld [vmem:[%s656_s1 + $0x38] sm:$0xff]  ;;  %v496_v4 = vld [vmem:[%s656_s1 + $0x30] sm:$0xff]  ;;  %v495_v8 = vld [vmem:[%s656_s1 + $0x28] sm:$0xff]  ;;  %19 = vst.msk [vmem:[#allocation2] sm:$0xff] %vm18_vm0, %v524_v42 }
   0x2   :  { %v505_v1 = vld [vmem:[%s656_s1 + $0x78] sm:$0xff]  ;;  %293 = vmatpush.bf16.msra.mxu0 %v497_v0  ;;  %v504_v5 = vld [vmem:[%s656_s1 + $0x70] sm:$0xff]  ;;  %v503_v9 = vld [vmem:[%s656_s1 + $0x68] sm:$0xff] }
   0x3   :  { %v513_v2 = vld [vmem:[%s656_s1 + $0xb8] sm:$0xff]  ;;  %306 = vmatpush.bf16.msra.mxu1 %v505_v1  ;;  %v512_v6 = vld [vmem:[%s656_s1 + $0xb0] sm:$0xff]  ;;  %v511_v10 = vld [vmem:[%s656_s1 + $0xa8] sm:$0xff] }
   0x4   :  { %v521_v3 = vld [vmem:[%s656_s1 + $0xf8] sm:$0xff]  ;;  %319 = vmatpush.bf16.msra.mxu2 %v513_v2  ;;  %v520_v7 = vld [vmem:[%s656_s1 + $0xf0] sm:$0xff]  ;;  %v519_v11 = vld [vmem:[%s656_s1 + $0xe8] sm:$0xff] }
   0x5   :  { %332 = vmatpush.bf16.msra.mxu3 %v521_v3  ;;  %v494_v12 = vld [vmem:[%s656_s1 + $0x20] sm:$0xff]  ;;  %v493_v16 = vld [vmem:[%s656_s1 + $0x18] sm:$0xff]  ;;  %v492_v20 = vld [vmem:[%s656_s1 + $0x10] sm:$0xff] }
   0x6   :  { %294 = vmatpush.bf16.msra.mxu0 %v496_v4  ;;  %v502_v13 = vld [vmem:[%s656_s1 + $0x60] sm:$0xff]  ;;  %v501_v17 = vld [vmem:[%s656_s1 + $0x58] sm:$0xff]  ;;  %v500_v21 = vld [vmem:[%s656_s1 + $0x50] sm:$0xff] }
   0x7   :  { %307 = vmatpush.bf16.msra.mxu1 %v504_v5  ;;  %v510_v14 = vld [vmem:[%s656_s1 + $0xa0] sm:$0xff]  ;;  %v509_v18 = vld [vmem:[%s656_s1 + $0x98] sm:$0xff]  ;;  %v508_v22 = vld [vmem:[%s656_s1 + $0x90] sm:$0xff] }
   0x8   :  { %320 = vmatpush.bf16.msra.mxu2 %v512_v6  ;;  %v518_v15 = vld [vmem:[%s656_s1 + $0xe0] sm:$0xff]  ;;  %v517_v19 = vld [vmem:[%s656_s1 + $0xd8] sm:$0xff]  ;;  %v516_v23 = vld [vmem:[%s656_s1 + $0xd0] sm:$0xff] }
   0x9   :  { %333 = vmatpush.bf16.msra.mxu3 %v520_v7  ;;  %v491_v24 = vld [vmem:[%s656_s1 + $0x8] sm:$0xff]  ;;  %v21_v26 = vld [vmem:[%s657_s0] sm:$0xff] }
   0xa   :  { %295 = vmatpush.bf16.msra.mxu0 %v495_v8  ;;  %v499_v25 = vld [vmem:[%s656_s1 + $0x48] sm:$0xff]  ;;  %v89_v30 = vunpack.c.l.b16 %v21_v26  ;;  %v90_v31 = vunpack.c.h.b16 %v21_v26  ;;  %v490_v32 = vld [vmem:[%s656_s1] sm:$0xff] }
   0xb   :  { %308 = vmatpush.bf16.msra.mxu1 %v503_v9  ;;  %v507_v27 = vld [vmem:[%s656_s1 + $0x88] sm:$0xff]  ;;  %v498_v33 = vld [vmem:[%s656_s1 + $0x40] sm:$0xff] }
   0xc   :  { %321 = vmatpush.bf16.msra.mxu2 %v511_v10  ;;  %v515_v28 = vld [vmem:[%s656_s1 + $0xc8] sm:$0xff]  ;;  %v506_v36 = vld [vmem:[%s656_s1 + $0x80] sm:$0xff]  ;;  %v93_v38 = vpack.c.b16 %v89_v30, %v89_v30  ;;  %v94_v39 = vpack.c.b16 %v90_v31, %v90_v31 }
   0xd   :  { %334 = vmatpush.bf16.msra.mxu3 %v519_v11  ;;  %v22_v29 = vld [vmem:[%s657_s0 + $0x8] sm:$0xff]  ;;  %v514_v37 = vld [vmem:[%s656_s1 + $0xc0] sm:$0xff] }
   0xe   :  { %296 = vmatpush.bf16.msra.mxu0 %v494_v12  ;;  %v91_v34 = vunpack.c.l.b16 %v22_v29  ;;  %v92_v35 = vunpack.c.h.b16 %v22_v29  ;;  %v20_v51 = vld [vmem:[#allocation2] sm:$0xff] }
   0xf   :  { %309 = vmatpush.bf16.msra.mxu1 %v502_v13  ;;  %v523_v56 = vld [vmem:[%s658_s2] ss:$0 sm:$0xff] }
  0x10   :  { %322 = vmatpush.bf16.msra.mxu2 %v510_v14  ;;  %v95_v40 = vpack.c.b16 %v91_v34, %v91_v34  ;;  %v96_v41 = vpack.c.b16 %v92_v35, %v92_v35 }
  0x11   :  { %335 = vmatpush.bf16.msra.mxu3 %v518_v15 }
  0x12   :  { %297 = vmatpush.bf16.msra.mxu0 %v493_v16 }
  0x13   :  { %310 = vmatpush.bf16.msra.mxu1 %v501_v17 }
  0x14   :  { %323 = vmatpush.bf16.msra.mxu2 %v509_v18 }
  0x15   :  { %336 = vmatpush.bf16.msra.mxu3 %v517_v19 }
  0x16   :  { %298 = vmatpush.bf16.msra.mxu0 %v492_v20 }
  0x17   :  { %311 = vmatpush.bf16.msra.mxu1 %v500_v21 }
  0x18   :  { %324 = vmatpush.bf16.msra.mxu2 %v508_v22 }
  0x19   :  { %337 = vmatpush.bf16.msra.mxu3 %v516_v23 }
  0x1a   :  { %299 = vmatpush.bf16.msra.mxu0 %v491_v24 }
  0x1b   :  { %312 = vmatpush.bf16.msra.mxu1 %v499_v25 }
  0x1c   :  { %325 = vmatpush.bf16.msra.mxu2 %v507_v27 }
  0x1d   :  { %338 = vmatpush.bf16.msra.mxu3 %v515_v28 }
  0x1e   :  { %300 = vmatpush.bf16.msra.mxu0 %v490_v32 }
  0x1f   :  { %313 = vmatpush.bf16.msra.mxu1 %v498_v33 }
  0x20   :  { %326 = vmatpush.bf16.msra.mxu2 %v506_v36 }
  0x21   :  { %339 = vmatpush.bf16.msra.mxu3 %v514_v37  ;;  %301 = vmatmul.bf16.vlgmr.msra.gmra.mxu0 %v93_v38 }
  0x22   :  { %314 = vmatmul.bf16.vlgmr.msra.gmra.mxu1 %v94_v39 }
  0x23   :  { %327 = vmatmul.bf16.vlgmr.msra.gmra.mxu2 %v95_v40 }
  0x24   :  { %340 = vmatmul.bf16.vlgmr.msra.gmra.mxu3 %v96_v41 }
  0x9e   :  { %v302_v43 = vpop.f32.mrf.mxu0 }
  0x9f   :  { %v315_v44 = vpop.f32.mrf.mxu1 }
  0xa0   :  { %v316_v45 = vadd.f32 %v315_v44, %v302_v43 }
  0xa6   :  { %v328_v46 = vpop.f32.mrf.mxu2  ;;  %v304_v49 = vpop.f32.mrf.mxu0 }
  0xa7   :  { %v341_v47 = vpop.f32.mrf.mxu3  ;;  %v329_v48 = vadd.f32 %v328_v46, %v316_v45  ;;  %v317_v50 = vpop.f32.mrf.mxu1 }
  0xa9   :  { %v342_v52 = vadd.f32 %v341_v47, %v329_v48 }
  0xab   :  { %v345_v53 = vadd.f32 %v342_v52, %v20_v51 }
  0xad   :  { %347 = vst.msk [vmem:[#allocation2] sm:$0xff] %vm18_vm0, %v345_v53 }
  0xae   :  { %v330_v54 = vpop.f32.mrf.mxu2 }
  0xaf   :  { %v343_v55 = vpop.f32.mrf.mxu3 }
  0xb4   :  { %v351_v57 = vld [vmem:[#allocation2] sm:$0xff] }
  0xb5   :  { %v356_v58 = vadd.f32 %v523_v56, %v351_v57 }
  0xb7   :  { %357 = vst.msk [vmem:[%s659_s3] sm:$0xff] %vm18_vm0, %v356_v58 }

// kernel: _lambda_.24
= control target key start
LH: loop header
LB: loop body
LE: loop exit
PB: predicated region body
PF: predicated region fallthrough
CT: control target
= control target key end

     0   :  { %vm18_vm0 = vcmask 517120   ;;  %s1220_s1 = inlined_call_operand.vmem [shape: bf16[1024,64], index: 1, kind: input, shape index: {}]   ;;  %s1221_s0 = inlined_call_operand.vmem [shape: bf16[2,1024], index: 0, kind: input, shape index: {}]   ;;  %s1222_s2 = inlined_call_operand.vmem [shape: f32[1,64], index: 2, kind: input, shape index: {}]   ;;  %s1223_s3 = inlined_call_operand.vmem [shape: f32[2,64], index: 3, kind: output, shape index: {}]  }
   0x1   :  { %v936_v0 = vld [vmem:[%s1220_s1 + $0x38] sm:$0xff]  ;;  %v935_v4 = vld [vmem:[%s1220_s1 + $0x30] sm:$0xff]  ;;  %v934_v8 = vld [vmem:[%s1220_s1 + $0x28] sm:$0xff] }
   0x2   :  { %v944_v1 = vld [vmem:[%s1220_s1 + $0x78] sm:$0xff]  ;;  %552 = vmatpush.bf16.msra.mxu0 %v936_v0  ;;  %v943_v5 = vld [vmem:[%s1220_s1 + $0x70] sm:$0xff]  ;;  %v942_v9 = vld [vmem:[%s1220_s1 + $0x68] sm:$0xff] }
   0x3   :  { %v952_v2 = vld [vmem:[%s1220_s1 + $0xb8] sm:$0xff]  ;;  %565 = vmatpush.bf16.msra.mxu1 %v944_v1  ;;  %v951_v6 = vld [vmem:[%s1220_s1 + $0xb0] sm:$0xff]  ;;  %v950_v10 = vld [vmem:[%s1220_s1 + $0xa8] sm:$0xff] }
   0x4   :  { %v960_v3 = vld [vmem:[%s1220_s1 + $0xf8] sm:$0xff]  ;;  %578 = vmatpush.bf16.msra.mxu2 %v952_v2  ;;  %v959_v7 = vld [vmem:[%s1220_s1 + $0xf0] sm:$0xff]  ;;  %v958_v11 = vld [vmem:[%s1220_s1 + $0xe8] sm:$0xff] }
   0x5   :  { %591 = vmatpush.bf16.msra.mxu3 %v960_v3  ;;  %v933_v12 = vld [vmem:[%s1220_s1 + $0x20] sm:$0xff]  ;;  %v932_v17 = vld [vmem:[%s1220_s1 + $0x18] sm:$0xff]  ;;  %v931_v21 = vld [vmem:[%s1220_s1 + $0x10] sm:$0xff] }
   0x6   :  { %553 = vmatpush.bf16.msra.mxu0 %v935_v4  ;;  %v941_v13 = vld [vmem:[%s1220_s1 + $0x60] sm:$0xff]  ;;  %v940_v18 = vld [vmem:[%s1220_s1 + $0x58] sm:$0xff]  ;;  %v939_v22 = vld [vmem:[%s1220_s1 + $0x50] sm:$0xff] }
   0x7   :  { %566 = vmatpush.bf16.msra.mxu1 %v943_v5  ;;  %v949_v14 = vld [vmem:[%s1220_s1 + $0xa0] sm:$0xff]  ;;  %v948_v19 = vld [vmem:[%s1220_s1 + $0x98] sm:$0xff]  ;;  %v947_v23 = vld [vmem:[%s1220_s1 + $0x90] sm:$0xff] }
   0x8   :  { %579 = vmatpush.bf16.msra.mxu2 %v951_v6  ;;  %v957_v15 = vld [vmem:[%s1220_s1 + $0xe0] sm:$0xff]  ;;  %v956_v20 = vld [vmem:[%s1220_s1 + $0xd8] sm:$0xff]  ;;  %v955_v24 = vld [vmem:[%s1220_s1 + $0xd0] sm:$0xff] }
   0x9   :  { %592 = vmatpush.bf16.msra.mxu3 %v959_v7  ;;  %v21_v16 = vld [vmem:[%s1221_s0] sm:$0xff]  ;;  %v930_v25 = vld [vmem:[%s1220_s1 + $0x8] sm:$0xff]  ;;  %v968_v33 = vld [vmem:[%s1220_s1 + $0x138] sm:$0xff] }
   0xa   :  { %554 = vmatpush.bf16.msra.mxu0 %v934_v8  ;;  %151 = vst [vmem:[#allocation1] ss:$9 sm:$0xff] %v21_v16  ;;  %v938_v26 = vld [vmem:[%s1220_s1 + $0x48] sm:$0xff]  ;;  %v929_v29 = vld [vmem:[%s1220_s1] sm:$0xff]  ;;  %v976_v34 = vld [vmem:[%s1220_s1 + $0x178] sm:$0xff] }
   0xb   :  { %567 = vmatpush.bf16.msra.mxu1 %v942_v9  ;;  %v946_v27 = vld [vmem:[%s1220_s1 + $0x88] sm:$0xff]  ;;  %v937_v30 = vld [vmem:[%s1220_s1 + $0x40] sm:$0xff]  ;;  %v984_v35 = vld [vmem:[%s1220_s1 + $0x1b8] sm:$0xff] }
   0xc   :  { %580 = vmatpush.bf16.msra.mxu2 %v950_v10  ;;  %v954_v28 = vld [vmem:[%s1220_s1 + $0xc8] sm:$0xff]  ;;  %v945_v31 = vld [vmem:[%s1220_s1 + $0x80] sm:$0xff]  ;;  %v992_v36 = vld [vmem:[%s1220_s1 + $0x1f8] sm:$0xff] }
   0xd   :  { %593 = vmatpush.bf16.msra.mxu3 %v958_v11  ;;  %v953_v32 = vld [vmem:[%s1220_s1 + $0xc0] sm:$0xff]  ;;  %v967_v37 = vld [vmem:[%s1220_s1 + $0x130] sm:$0xff]  ;;  %v966_v45 = vld [vmem:[%s1220_s1 + $0x128] sm:$0xff]  ;;  %v995_v11 = vmov 0.0  }
   0xe   :  { %555 = vmatpush.bf16.msra.mxu0 %v933_v12  ;;  %v975_v40 = vld [vmem:[%s1220_s1 + $0x170] sm:$0xff]  ;;  %v974_v46 = vld [vmem:[%s1220_s1 + $0x168] sm:$0xff]  ;;  %v965_v49 = vld [vmem:[%s1220_s1 + $0x120] sm:$0xff]  ;;  %19 = vst.msk [vmem:[#allocation2] sm:$0x3] %vm18_vm0, %v995_v11 }
   0xf   :  { %568 = vmatpush.bf16.msra.mxu1 %v941_v13  ;;  %v983_v43 = vld [vmem:[%s1220_s1 + $0x1b0] sm:$0xff]  ;;  %v982_v47 = vld [vmem:[%s1220_s1 + $0x1a8] sm:$0xff]  ;;  %v973_v50 = vld [vmem:[%s1220_s1 + $0x160] sm:$0xff] }
  0x10   :  { %581 = vmatpush.bf16.msra.mxu2 %v949_v14  ;;  %v991_v44 = vld [vmem:[%s1220_s1 + $0x1f0] sm:$0xff]  ;;  %v990_v48 = vld [vmem:[%s1220_s1 + $0x1e8] sm:$0xff]  ;;  %v981_v51 = vld [vmem:[%s1220_s1 + $0x1a0] sm:$0xff] }
  0x11   :  { %594 = vmatpush.bf16.msra.mxu3 %v957_v15  ;;  %v154_v38 = vld [vmem:[#allocation1 + $0x12] sm:$0xff]  ;;  %v152_v39 = vld [vmem:[#allocation1] sm:$0xff]  ;;  %v153_v42 = vld [vmem:[#allocation1 + $0x9] sm:$0xff] }
  0x12   :  { %556 = vmatpush.bf16.msra.mxu0 %v932_v17  ;;  %v155_v41 = vld [vmem:[#allocation1 + $0x1b] sm:$0xff]  ;;  %v963_v57 = vld [vmem:[%s1220_s1 + $0x110] sm:$0xff]  ;;  %v962_v61 = vld [vmem:[%s1220_s1 + $0x108] sm:$0xff] }
  0x13   :  { %569 = vmatpush.bf16.msra.mxu1 %v940_v18  ;;  %v989_v52 = vld [vmem:[%s1220_s1 + $0x1e0] sm:$0xff]  ;;  %v964_v53 = vld [vmem:[%s1220_s1 + $0x118] sm:$0xff]  ;;  %v971_v58 = vld [vmem:[%s1220_s1 + $0x150] sm:$0xff] }
  0x14   :  { %582 = vmatpush.bf16.msra.mxu2 %v948_v19  ;;  %v972_v54 = vld [vmem:[%s1220_s1 + $0x158] sm:$0xff]  ;;  %v979_v59 = vld [vmem:[%s1220_s1 + $0x190] sm:$0xff]  ;;  %v970_v62 = vld [vmem:[%s1220_s1 + $0x148] sm:$0xff] }
  0x15   :  { %595 = vmatpush.bf16.msra.mxu3 %v956_v20  ;;  %v980_v55 = vld [vmem:[%s1220_s1 + $0x198] sm:$0xff]  ;;  %v987_v60 = vld [vmem:[%s1220_s1 + $0x1d0] sm:$0xff]  ;;  %v978_v63 = vld [vmem:[%s1220_s1 + $0x188] sm:$0xff] }
  0x16   :  { %557 = vmatpush.bf16.msra.mxu0 %v931_v21  ;;  %v988_v56 = vld [vmem:[%s1220_s1 + $0x1d8] sm:$0xff]  ;;  %v986_v0 = vld [vmem:[%s1220_s1 + $0x1c8] sm:$0xff]  ;;  %v961_v1 = vld [vmem:[%s1220_s1 + $0x100] sm:$0xff] }
  0x17   :  { %570 = vmatpush.bf16.msra.mxu1 %v939_v22  ;;  %v969_v2 = vld [vmem:[%s1220_s1 + $0x140] sm:$0xff]  ;;  %v157_v6 = vld [vmem:[#allocation1 + $0x2d] sm:$0xff]  ;;  %v158_v7 = vld [vmem:[#allocation1 + $0x36] sm:$0xff] }
  0x18   :  { %583 = vmatpush.bf16.msra.mxu2 %v947_v23  ;;  %v977_v3 = vld [vmem:[%s1220_s1 + $0x180] sm:$0xff] }
  0x19   :  { %596 = vmatpush.bf16.msra.mxu3 %v955_v24  ;;  %v985_v4 = vld [vmem:[%s1220_s1 + $0x1c0] sm:$0xff] }
  0x1a   :  { %558 = vmatpush.bf16.msra.mxu0 %v930_v25  ;;  %v156_v5 = vld [vmem:[#allocation1 + $0x24] sm:$0xff] }
  0x1b   :  { %571 = vmatpush.bf16.msra.mxu1 %v938_v26  ;;  %v159_v8 = vld [vmem:[#allocation1 + $0x3f] sm:$0xff] }
  0x1c   :  { %584 = vmatpush.bf16.msra.mxu2 %v946_v27 }
  0x1d   :  { %597 = vmatpush.bf16.msra.mxu3 %v954_v28 }
  0x1e   :  { %559 = vmatpush.bf16.msra.mxu0 %v929_v29 }
  0x1f   :  { %572 = vmatpush.bf16.msra.mxu1 %v937_v30  ;;  %v20_v30 = vld [vmem:[#allocation2] sm:$0x3] }
  0x20   :  { %585 = vmatpush.bf16.msra.mxu2 %v945_v31 }
  0x21   :  { %598 = vmatpush.bf16.msra.mxu3 %v953_v32  ;;  %560 = vmatmul.bf16.vlgmr.msra.gmra.mxu0 %v152_v39 }
  0x22   :  { %604 = vmatpush.bf16.msrb.mxu0 %v968_v33  ;;  %573 = vmatmul.bf16.vlgmr.msra.gmra.mxu1 %v153_v42 }
  0x23   :  { %617 = vmatpush.bf16.msrb.mxu1 %v976_v34  ;;  %586 = vmatmul.bf16.vlgmr.msra.gmra.mxu2 %v154_v38 }
  0x24   :  { %630 = vmatpush.bf16.msrb.mxu2 %v984_v35  ;;  %599 = vmatmul.bf16.vlgmr.msra.gmra.mxu3 %v155_v41  ;;  %v994_v35 = vld [vmem:[%s1222_s2] ss:$0 sm:$0xff] }
  0x25   :  { %643 = vmatpush.bf16.msrb.mxu3 %v992_v36 }
  0x26   :  { %605 = vmatpush.bf16.msrb.mxu0 %v967_v37 }
  0x27   :  { %618 = vmatpush.bf16.msrb.mxu1 %v975_v40 }
  0x28   :  { %631 = vmatpush.bf16.msrb.mxu2 %v983_v43 }
  0x29   :  { %644 = vmatpush.bf16.msrb.mxu3 %v991_v44 }
  0x2a   :  { %606 = vmatpush.bf16.msrb.mxu0 %v966_v45 }
  0x2b   :  { %619 = vmatpush.bf16.msrb.mxu1 %v974_v46 }
  0x2c   :  { %632 = vmatpush.bf16.msrb.mxu2 %v982_v47 }
  0x2d   :  { %645 = vmatpush.bf16.msrb.mxu3 %v990_v48 }
  0x2e   :  { %607 = vmatpush.bf16.msrb.mxu0 %v965_v49 }
  0x2f   :  { %620 = vmatpush.bf16.msrb.mxu1 %v973_v50 }
  0x30   :  { %633 = vmatpush.bf16.msrb.mxu2 %v981_v51 }
  0x31   :  { %646 = vmatpush.bf16.msrb.mxu3 %v989_v52 }
  0x32   :  { %608 = vmatpush.bf16.msrb.mxu0 %v964_v53 }
  0x33   :  { %621 = vmatpush.bf16.msrb.mxu1 %v972_v54 }
  0x34   :  { %634 = vmatpush.bf16.msrb.mxu2 %v980_v55 }
  0x35   :  { %647 = vmatpush.bf16.msrb.mxu3 %v988_v56 }
  0x36   :  { %609 = vmatpush.bf16.msrb.mxu0 %v963_v57 }
  0x37   :  { %622 = vmatpush.bf16.msrb.mxu1 %v971_v58 }
  0x38   :  { %635 = vmatpush.bf16.msrb.mxu2 %v979_v59 }
  0x39   :  { %648 = vmatpush.bf16.msrb.mxu3 %v987_v60 }
  0x3a   :  { %610 = vmatpush.bf16.msrb.mxu0 %v962_v61 }
  0x3b   :  { %623 = vmatpush.bf16.msrb.mxu1 %v970_v62 }
  0x3c   :  { %636 = vmatpush.bf16.msrb.mxu2 %v978_v63 }
  0x3d   :  { %649 = vmatpush.bf16.msrb.mxu3 %v986_v0 }
  0x3e   :  { %611 = vmatpush.bf16.msrb.mxu0 %v961_v1 }
  0x3f   :  { %624 = vmatpush.bf16.msrb.mxu1 %v969_v2 }
  0x40   :  { %637 = vmatpush.bf16.msrb.mxu2 %v977_v3 }
  0x41   :  { %650 = vmatpush.bf16.msrb.mxu3 %v985_v4  ;;  %612 = vmatmul.bf16.vlgmr.msrb.gmra.mxu0 %v156_v5 }
  0x42   :  { %625 = vmatmul.bf16.vlgmr.msrb.gmra.mxu1 %v157_v6 }
  0x43   :  { %638 = vmatmul.bf16.vlgmr.msrb.gmra.mxu2 %v158_v7 }
  0x44   :  { %651 = vmatmul.bf16.vlgmr.msrb.gmra.mxu3 %v159_v8 }
  0x9e   :  { %v561_v9 = vpop.f32.mrf.mxu0 }
  0x9f   :  { %v574_v10 = vpop.f32.mrf.mxu1 }
  0xa0   :  { %v575_v18 = vadd.f32 %v574_v10, %v561_v9 }
  0xa6   :  { %v587_v12 = vpop.f32.mrf.mxu2  ;;  %v563_v14 = vpop.f32.mrf.mxu0 }
  0xa7   :  { %v600_v13 = vpop.f32.mrf.mxu3  ;;  %v576_v15 = vpop.f32.mrf.mxu1  ;;  %v588_v19 = vadd.f32 %v587_v12, %v575_v18 }
  0xa9   :  { %v601_v20 = vadd.f32 %v600_v13, %v588_v19 }
  0xae   :  { %v589_v16 = vpop.f32.mrf.mxu2 }
  0xaf   :  { %v602_v17 = vpop.f32.mrf.mxu3 }
  0xbe   :  { %v613_v21 = vpop.f32.mrf.mxu0 }
  0xbf   :  { %v626_v22 = vpop.f32.mrf.mxu1  ;;  %v614_v23 = vadd.f32 %v613_v21, %v601_v20 }
  0xc1   :  { %v627_v24 = vadd.f32 %v626_v22, %v614_v23 }
  0xc6   :  { %v639_v25 = vpop.f32.mrf.mxu2  ;;  %v615_v28 = vpop.f32.mrf.mxu0 }
  0xc7   :  { %v652_v26 = vpop.f32.mrf.mxu3  ;;  %v640_v27 = vadd.f32 %v639_v25, %v627_v24  ;;  %v628_v29 = vpop.f32.mrf.mxu1 }
  0xc9   :  { %v653_v31 = vadd.f32 %v652_v26, %v640_v27 }
  0xcb   :  { %v656_v32 = vadd.f32 %v653_v31, %v20_v30 }
  0xcd   :  { %658 = vst.msk [vmem:[#allocation2] sm:$0x3] %vm18_vm0, %v656_v32 }
  0xce   :  { %v641_v33 = vpop.f32.mrf.mxu2 }
  0xcf   :  { %v654_v34 = vpop.f32.mrf.mxu3 }
  0xd4   :  { %v662_v36 = vld [vmem:[#allocation2] sm:$0x3] }
  0xd5   :  { %v667_v37 = vadd.f32 %v994_v35, %v662_v36 }
  0xd7   :  { %668 = vst.msk [vmem:[%s1223_s3] sm:$0x3] %vm18_vm0, %v667_v37 }

// kernel: _lambda_.25
= control target key start
LH: loop header
LB: loop body
LE: loop exit
PB: predicated region body
PF: predicated region fallthrough
CT: control target
= control target key end

     0   :  { %vm465_vm0 = vcmask 523264   ;;  %vm601_vm1 = vcmask 1041408   ;;  %s1470_s1 = inlined_call_operand.vmem [shape: bf16[576,256], index: 1, kind: input, shape index: {}]   ;;  %s1471_s0 = inlined_call_operand.vmem [shape: bf16[2,576], index: 0, kind: input, shape index: {}]   ;;  %s1472_s2 = inlined_call_operand.vmem [shape: f32[1,256], index: 2, kind: input, shape index: {}]   ;;  %s1473_s3 = inlined_call_operand.vmem [shape: f32[2,256], index: 3, kind: output, shape index: {}]  }
   0x1   :  { %v681_v0 = vld [vmem:[%s1470_s1 + $0x70] sm:$0xf]  ;;  %v928_v1 = vld [vmem:[%s1470_s1 + $0x74] sm:$0xf0]  ;;  %v673_v11 = vld [vmem:[%s1470_s1 + $0x60] sm:$0xf] }
   0x2   :  { %v745_v2 = vld [vmem:[%s1470_s1 + $0xf0] sm:$0xf]  ;;  %v682_v3 = vor.u32 %v928_v1, %v681_v0  ;;  %v944_v4 = vld [vmem:[%s1470_s1 + $0xf4] sm:$0xf0]  ;;  %v926_v13 = vld [vmem:[%s1470_s1 + $0x64] sm:$0xf0] }
   0x3   :  { %v809_v5 = vld [vmem:[%s1470_s1 + $0x170] sm:$0xf]  ;;  %v960_v6 = vld [vmem:[%s1470_s1 + $0x174] sm:$0xf0]  ;;  %v746_v7 = vor.u32 %v944_v4, %v745_v2  ;;  %v737_v14 = vld [vmem:[%s1470_s1 + $0xe0] sm:$0xf]  ;;  %v674_v16 = vor.u32 %v926_v13, %v673_v11 }
   0x4   :  { %v810_v8 = vor.u32 %v960_v6, %v809_v5  ;;  %v873_v9 = vld [vmem:[%s1470_s1 + $0x1f0] sm:$0xf]  ;;  %v976_v10 = vld [vmem:[%s1470_s1 + $0x1f4] sm:$0xf0]  ;;  %468 = vmatpush.bf16.msra.mxu0 %v682_v3  ;;  %v942_v15 = vld [vmem:[%s1470_s1 + $0xe4] sm:$0xf0] }
   0x5   :  { %v874_v12 = vor.u32 %v976_v10, %v873_v9  ;;  %481 = vmatpush.bf16.msra.mxu1 %v746_v7  ;;  %v738_v17 = vor.u32 %v942_v15, %v737_v14  ;;  %v801_v18 = vld [vmem:[%s1470_s1 + $0x160] sm:$0xf]  ;;  %v958_v19 = vld [vmem:[%s1470_s1 + $0x164] sm:$0xf0]  ;;  %v665_v23 = vld [vmem:[%s1470_s1 + $0x50] sm:$0xf] }
   0x6   :  { %494 = vmatpush.bf16.msra.mxu2 %v810_v8  ;;  %v865_v20 = vld [vmem:[%s1470_s1 + $0x1e0] sm:$0xf]  ;;  %v802_v21 = vor.u32 %v958_v19, %v801_v18  ;;  %v974_v22 = vld [vmem:[%s1470_s1 + $0x1e4] sm:$0xf0]  ;;  %v924_v24 = vld [vmem:[%s1470_s1 + $0x54] sm:$0xf0] }
   0x7   :  { %507 = vmatpush.bf16.msra.mxu3 %v874_v12  ;;  %v866_v25 = vor.u32 %v974_v22, %v865_v20  ;;  %v729_v26 = vld [vmem:[%s1470_s1 + $0xd0] sm:$0xf]  ;;  %v940_v27 = vld [vmem:[%s1470_s1 + $0xd4] sm:$0xf0]  ;;  %v666_v29 = vor.u32 %v924_v24, %v665_v23  ;;  %v657_v35 = vld [vmem:[%s1470_s1 + $0x40] sm:$0xf] }
   0x8   :  { %v793_v28 = vld [vmem:[%s1470_s1 + $0x150] sm:$0xf]  ;;  %469 = vmatpush.bf16.msra.mxu0 %v674_v16  ;;  %v956_v30 = vld [vmem:[%s1470_s1 + $0x154] sm:$0xf0]  ;;  %v730_v33 = vor.u32 %v940_v27, %v729_v26  ;;  %v922_v36 = vld [vmem:[%s1470_s1 + $0x44] sm:$0xf0] }
   0x9   :  { %v857_v31 = vld [vmem:[%s1470_s1 + $0x1d0] sm:$0xf]  ;;  %v972_v32 = vld [vmem:[%s1470_s1 + $0x1d4] sm:$0xf0]  ;;  %482 = vmatpush.bf16.msra.mxu1 %v738_v17  ;;  %v794_v34 = vor.u32 %v956_v30, %v793_v28  ;;  %v721_v37 = vld [vmem:[%s1470_s1 + $0xc0] sm:$0xf]  ;;  %v658_v44 = vor.u32 %v922_v36, %v657_v35 }
   0xa   :  { %495 = vmatpush.bf16.msra.mxu2 %v802_v21  ;;  %v858_v38 = vor.u32 %v972_v32, %v857_v31  ;;  %v938_v39 = vld [vmem:[%s1470_s1 + $0xc4] sm:$0xf0]  ;;  %v785_v40 = vld [vmem:[%s1470_s1 + $0x140] sm:$0xf]  ;;  %v649_v47 = vld [vmem:[%s1470_s1 + $0x30] sm:$0xf] }
   0xb   :  { %508 = vmatpush.bf16.msra.mxu3 %v866_v25  ;;  %v954_v41 = vld [vmem:[%s1470_s1 + $0x144] sm:$0xf0]  ;;  %v849_v42 = vld [vmem:[%s1470_s1 + $0x1c0] sm:$0xf]  ;;  %v722_v45 = vor.u32 %v938_v39, %v721_v37  ;;  %v920_v48 = vld [vmem:[%s1470_s1 + $0x34] sm:$0xf0] }
   0xc   :  { %v970_v43 = vld [vmem:[%s1470_s1 + $0x1c4] sm:$0xf0]  ;;  %470 = vmatpush.bf16.msra.mxu0 %v666_v29  ;;  %v786_v46 = vor.u32 %v954_v41, %v785_v40  ;;  %v713_v49 = vld [vmem:[%s1470_s1 + $0xb0] sm:$0xf]  ;;  %v936_v51 = vld [vmem:[%s1470_s1 + $0xb4] sm:$0xf0]  ;;  %v650_v56 = vor.u32 %v920_v48, %v649_v47 }
   0xd   :  { %483 = vmatpush.bf16.msra.mxu1 %v730_v33  ;;  %v850_v50 = vor.u32 %v970_v43, %v849_v42  ;;  %v777_v52 = vld [vmem:[%s1470_s1 + $0x130] sm:$0xf]  ;;  %v952_v53 = vld [vmem:[%s1470_s1 + $0x134] sm:$0xf0]  ;;  %v714_v57 = vor.u32 %v936_v51, %v713_v49  ;;  %v641_v59 = vld [vmem:[%s1470_s1 + $0x20] sm:$0xf] }
   0xe   :  { %496 = vmatpush.bf16.msra.mxu2 %v794_v34  ;;  %v841_v54 = vld [vmem:[%s1470_s1 + $0x1b0] sm:$0xf]  ;;  %v968_v55 = vld [vmem:[%s1470_s1 + $0x1b4] sm:$0xf0]  ;;  %v778_v58 = vor.u32 %v952_v53, %v777_v52  ;;  %v918_v60 = vld [vmem:[%s1470_s1 + $0x24] sm:$0xf0] }
   0xf   :  { %509 = vmatpush.bf16.msra.mxu3 %v858_v38  ;;  %v705_v61 = vld [vmem:[%s1470_s1 + $0xa0] sm:$0xf]  ;;  %v842_v62 = vor.u32 %v968_v55, %v841_v54  ;;  %v934_v63 = vld [vmem:[%s1470_s1 + $0xa4] sm:$0xf0]  ;;  %v642_v4 = vor.u32 %v918_v60, %v641_v59  ;;  %v633_v7 = vld [vmem:[%s1470_s1 + $0x10] sm:$0xf] }
  0x10   :  { %471 = vmatpush.bf16.msra.mxu0 %v658_v44  ;;  %v769_v0 = vld [vmem:[%s1470_s1 + $0x120] sm:$0xf]  ;;  %v950_v1 = vld [vmem:[%s1470_s1 + $0x124] sm:$0xf0]  ;;  %v706_v5 = vor.u32 %v934_v63, %v705_v61  ;;  %v916_v8 = vld [vmem:[%s1470_s1 + $0x14] sm:$0xf0] }
  0x11   :  { %484 = vmatpush.bf16.msra.mxu1 %v722_v45  ;;  %v833_v2 = vld [vmem:[%s1470_s1 + $0x1a0] sm:$0xf]  ;;  %v966_v3 = vld [vmem:[%s1470_s1 + $0x1a4] sm:$0xf0]  ;;  %v770_v6 = vor.u32 %v950_v1, %v769_v0  ;;  %v697_v9 = vld [vmem:[%s1470_s1 + $0x90] sm:$0xf]  ;;  %v634_v17 = vor.u32 %v916_v8, %v633_v7 }
  0x12   :  { %497 = vmatpush.bf16.msra.mxu2 %v786_v46  ;;  %v834_v10 = vor.u32 %v966_v3, %v833_v2  ;;  %v932_v11 = vld [vmem:[%s1470_s1 + $0x94] sm:$0xf0]  ;;  %v761_v12 = vld [vmem:[%s1470_s1 + $0x110] sm:$0xf]  ;;  %v625_v16 = vld [vmem:[%s1470_s1] sm:$0xf] }
  0x13   :  { %510 = vmatpush.bf16.msra.mxu3 %v850_v50  ;;  %v948_v13 = vld [vmem:[%s1470_s1 + $0x114] sm:$0xf0]  ;;  %v825_v14 = vld [vmem:[%s1470_s1 + $0x190] sm:$0xf]  ;;  %v914_v18 = vld [vmem:[%s1470_s1 + $0x4] sm:$0xf0]  ;;  %v698_v21 = vor.u32 %v932_v11, %v697_v9 }
  0x14   :  { %472 = vmatpush.bf16.msra.mxu0 %v650_v56  ;;  %v964_v15 = vld [vmem:[%s1470_s1 + $0x194] sm:$0xf0]  ;;  %v689_v19 = vld [vmem:[%s1470_s1 + $0x80] sm:$0xf]  ;;  %v930_v20 = vld [vmem:[%s1470_s1 + $0x84] sm:$0xf0]  ;;  %v762_v22 = vor.u32 %v948_v13, %v761_v12  ;;  %v626_v32 = vor.u32 %v914_v18, %v625_v16 }
  0x15   :  { %485 = vmatpush.bf16.msra.mxu1 %v714_v57  ;;  %v753_v23 = vld [vmem:[%s1470_s1 + $0x100] sm:$0xf]  ;;  %v946_v24 = vld [vmem:[%s1470_s1 + $0x104] sm:$0xf0]  ;;  %v826_v26 = vor.u32 %v964_v15, %v825_v14  ;;  %v905_v29 = vld [vmem:[%s1470_s1 + $0x230] sm:$0xf]  ;;  %v690_v36 = vor.u32 %v930_v20, %v689_v19 }
  0x16   :  { %498 = vmatpush.bf16.msra.mxu2 %v778_v58  ;;  %v21_v25 = vld [vmem:[%s1471_s0] sm:$0x1f]  ;;  %v962_v28 = vld [vmem:[%s1470_s1 + $0x184] sm:$0xf0]  ;;  %v984_v30 = vld [vmem:[%s1470_s1 + $0x234] sm:$0xf0]  ;;  %v754_v37 = vor.u32 %v946_v24, %v753_v23 }
  0x17   :  { %511 = vmatpush.bf16.msra.mxu3 %v842_v62  ;;  %v817_v27 = vld [vmem:[%s1470_s1 + $0x180] sm:$0xf]  ;;  %95 = vst [vmem:[#allocation1] ss:$9 sm:$0xff] %v21_v25  ;;  %v927_v31 = vld [vmem:[%s1470_s1 + $0x74] sm:$0xf]  ;;  %v906_v41 = vor.u32 %v984_v30, %v905_v29 }
  0x18   :  { %473 = vmatpush.bf16.msra.mxu0 %v642_v4  ;;  %v683_v33 = vld [vmem:[%s1470_s1 + $0x78] sm:$0xf0]  ;;  %v943_v34 = vld [vmem:[%s1470_s1 + $0xf4] sm:$0xf]  ;;  %v818_v40 = vor.u32 %v962_v28, %v817_v27  ;;  %v897_v44 = vld [vmem:[%s1470_s1 + $0x220] sm:$0xf] }
  0x19   :  { %486 = vmatpush.bf16.msra.mxu1 %v706_v5  ;;  %v747_v35 = vld [vmem:[%s1470_s1 + $0xf8] sm:$0xf0]  ;;  %v959_v38 = vld [vmem:[%s1470_s1 + $0x174] sm:$0xf]  ;;  %v686_v42 = vor.u32 %v927_v31, %v683_v33  ;;  %v982_v45 = vld [vmem:[%s1470_s1 + $0x224] sm:$0xf0] }
  0x1a   :  { %499 = vmatpush.bf16.msra.mxu2 %v770_v6  ;;  %v811_v39 = vld [vmem:[%s1470_s1 + $0x178] sm:$0xf0]  ;;  %v750_v43 = vor.u32 %v943_v34, %v747_v35  ;;  %v925_v46 = vld [vmem:[%s1470_s1 + $0x64] sm:$0xf]  ;;  %v675_v48 = vld [vmem:[%s1470_s1 + $0x68] sm:$0xf0]  ;;  %v898_v54 = vor.u32 %v982_v45, %v897_v44 }
  0x1b   :  { %512 = vmatpush.bf16.msra.mxu3 %v834_v10  ;;  %v814_v47 = vor.u32 %v959_v38, %v811_v39  ;;  %v941_v49 = vld [vmem:[%s1470_s1 + $0xe4] sm:$0xf]  ;;  %v739_v50 = vld [vmem:[%s1470_s1 + $0xe8] sm:$0xf0]  ;;  %v889_v56 = vld [vmem:[%s1470_s1 + $0x210] sm:$0xf]  ;;  %v678_v58 = vor.u32 %v925_v46, %v675_v48 }
  0x1c   :  { %474 = vmatpush.bf16.msra.mxu0 %v634_v17  ;;  %v957_v52 = vld [vmem:[%s1470_s1 + $0x164] sm:$0xf]  ;;  %v803_v53 = vld [vmem:[%s1470_s1 + $0x168] sm:$0xf0]  ;;  %v742_v59 = vor.u32 %v941_v49, %v739_v50  ;;  %v980_v60 = vld [vmem:[%s1470_s1 + $0x214] sm:$0xf0] }
  0x1d   :  { %487 = vmatpush.bf16.msra.mxu1 %v698_v21  ;;  %v923_v61 = vld [vmem:[%s1470_s1 + $0x54] sm:$0xf]  ;;  %v806_v63 = vor.u32 %v957_v52, %v803_v53  ;;  %v667_v0 = vld [vmem:[%s1470_s1 + $0x58] sm:$0xf0]  ;;  %v890_v5 = vor.u32 %v980_v60, %v889_v56  ;;  %v881_v6 = vld [vmem:[%s1470_s1 + $0x200] sm:$0xf] }
  0x1e   :  { %500 = vmatpush.bf16.msra.mxu2 %v762_v22  ;;  %v1244_v51 = vld [vmem:[#allocation1] sm:$0xff]  ;;  %v1252_v55 = vld [vmem:[#allocation1 + $0x9] sm:$0xff]  ;;  %v1257_v57 = vld [vmem:[#allocation1 + $0x12] sm:$0xff]  ;;  %v670_v7 = vor.u32 %v923_v61, %v667_v0 }
  0x1f   :  { %513 = vmatpush.bf16.msra.mxu3 %v826_v26  ;;  %v1265_v62 = vld [vmem:[#allocation1 + $0x1b] sm:$0xff]  ;;  %v939_v1 = vld [vmem:[%s1470_s1 + $0xd4] sm:$0xf]  ;;  %v978_v9 = vld [vmem:[%s1470_s1 + $0x204] sm:$0xf0] }
  0x20   :  { %475 = vmatpush.bf16.msra.mxu0 %v626_v32  ;;  %v731_v2 = vld [vmem:[%s1470_s1 + $0xd8] sm:$0xf0]  ;;  %v955_v3 = vld [vmem:[%s1470_s1 + $0x154] sm:$0xf]  ;;  %v921_v10 = vld [vmem:[%s1470_s1 + $0x44] sm:$0xf]  ;;  %v882_v19 = vor.u32 %v978_v9, %v881_v6 }
  0x21   :  { %488 = vmatpush.bf16.msra.mxu1 %v690_v36  ;;  %v795_v4 = vld [vmem:[%s1470_s1 + $0x158] sm:$0xf0]  ;;  %v734_v8 = vor.u32 %v939_v1, %v731_v2  ;;  %v659_v11 = vld [vmem:[%s1470_s1 + $0x48] sm:$0xf0]  ;;  %v937_v13 = vld [vmem:[%s1470_s1 + $0xc4] sm:$0xf] }
  0x22   :  { %501 = vmatpush.bf16.msra.mxu2 %v754_v37  ;;  %v798_v12 = vor.u32 %v955_v3, %v795_v4  ;;  %v723_v14 = vld [vmem:[%s1470_s1 + $0xc8] sm:$0xf0]  ;;  %v953_v15 = vld [vmem:[%s1470_s1 + $0x144] sm:$0xf]  ;;  %v975_v17 = vld [vmem:[%s1470_s1 + $0x1f4] sm:$0xf]  ;;  %v662_v20 = vor.u32 %v921_v10, %v659_v11 }
  0x23   :  { %514 = vmatpush.bf16.msra.mxu3 %v818_v40  ;;  %476 = vmatmul.bf16.vlgmr.msra.gmra.mxu0 %v1244_v51  ;;  %v787_v16 = vld [vmem:[%s1470_s1 + $0x148] sm:$0xf0]  ;;  %v875_v18 = vld [vmem:[%s1470_s1 + $0x1f8] sm:$0xf0]  ;;  %v726_v21 = vor.u32 %v937_v13, %v723_v14  ;;  %v919_v22 = vld [vmem:[%s1470_s1 + $0x34] sm:$0xf] }
  0x24   :  { %524 = vmatpush.bf16.msrb.mxu0 %v906_v41  ;;  %489 = vmatmul.bf16.vlgmr.msra.gmra.mxu1 %v1252_v55  ;;  %v651_v23 = vld [vmem:[%s1470_s1 + $0x38] sm:$0xf0]  ;;  %v790_v24 = vor.u32 %v953_v15, %v787_v16  ;;  %v878_v25 = vor.u32 %v975_v17, %v875_v18  ;;  %v935_v26 = vld [vmem:[%s1470_s1 + $0xb4] sm:$0xf]  ;;  %v973_v30 = vld [vmem:[%s1470_s1 + $0x1e4] sm:$0xf] }
  0x25   :  { %533 = vmatpush.bf16.msrb.mxu1 %v686_v42  ;;  %502 = vmatmul.bf16.vlgmr.msra.gmra.mxu2 %v1257_v57  ;;  %v715_v27 = vld [vmem:[%s1470_s1 + $0xb8] sm:$0xf0]  ;;  %v951_v28 = vld [vmem:[%s1470_s1 + $0x134] sm:$0xf]  ;;  %v867_v31 = vld [vmem:[%s1470_s1 + $0x1e8] sm:$0xf0]  ;;  %v654_v32 = vor.u32 %v919_v22, %v651_v23 }
  0x26   :  { %546 = vmatpush.bf16.msrb.mxu2 %v750_v43  ;;  %515 = vmatmul.bf16.vlgmr.msra.gmra.mxu3 %v1265_v62  ;;  %v779_v29 = vld [vmem:[%s1470_s1 + $0x138] sm:$0xf0]  ;;  %v718_v33 = vor.u32 %v935_v26, %v715_v27  ;;  %v917_v34 = vld [vmem:[%s1470_s1 + $0x24] sm:$0xf]  ;;  %v643_v35 = vld [vmem:[%s1470_s1 + $0x28] sm:$0xf0]  ;;  %v870_v37 = vor.u32 %v973_v30, %v867_v31 }
  0x27   :  { %559 = vmatpush.bf16.msrb.mxu3 %v814_v47  ;;  %v782_v36 = vor.u32 %v951_v28, %v779_v29  ;;  %v933_v38 = vld [vmem:[%s1470_s1 + $0xa4] sm:$0xf]  ;;  %v707_v39 = vld [vmem:[%s1470_s1 + $0xa8] sm:$0xf0]  ;;  %v971_v42 = vld [vmem:[%s1470_s1 + $0x1d4] sm:$0xf]  ;;  %v646_v45 = vor.u32 %v917_v34, %v643_v35 }
  0x28   :  { %525 = vmatpush.bf16.msrb.mxu0 %v898_v54  ;;  %v949_v40 = vld [vmem:[%s1470_s1 + $0x124] sm:$0xf]  ;;  %v771_v41 = vld [vmem:[%s1470_s1 + $0x128] sm:$0xf0]  ;;  %v859_v43 = vld [vmem:[%s1470_s1 + $0x1d8] sm:$0xf0]  ;;  %v710_v46 = vor.u32 %v933_v38, %v707_v39 }
  0x29   :  { %534 = vmatpush.bf16.msrb.mxu1 %v678_v58  ;;  %v1364_v44 = vld [vmem:[#allocation1 + $0x24] sm:$0xff]  ;;  %v915_v47 = vld [vmem:[%s1470_s1 + $0x14] sm:$0xf]  ;;  %v635_v48 = vld [vmem:[%s1470_s1 + $0x18] sm:$0xf0]  ;;  %v774_v49 = vor.u32 %v949_v40, %v771_v41  ;;  %v862_v50 = vor.u32 %v971_v42, %v859_v43 }
  0x2a   :  { %547 = vmatpush.bf16.msrb.mxu2 %v742_v59  ;;  %v931_v52 = vld [vmem:[%s1470_s1 + $0x94] sm:$0xf]  ;;  %v699_v53 = vld [vmem:[%s1470_s1 + $0x98] sm:$0xf0]  ;;  %v969_v58 = vld [vmem:[%s1470_s1 + $0x1c4] sm:$0xf]  ;;  %v638_v60 = vor.u32 %v915_v47, %v635_v48 }
  0x2b   :  { %560 = vmatpush.bf16.msrb.mxu3 %v806_v63  ;;  %v947_v54 = vld [vmem:[%s1470_s1 + $0x114] sm:$0xf]  ;;  %v763_v56 = vld [vmem:[%s1470_s1 + $0x118] sm:$0xf0]  ;;  %v851_v59 = vld [vmem:[%s1470_s1 + $0x1c8] sm:$0xf0]  ;;  %v702_v61 = vor.u32 %v931_v52, %v699_v53 }
  0x2c   :  { %526 = vmatpush.bf16.msrb.mxu0 %v890_v5  ;;  %v913_v63 = vld [vmem:[%s1470_s1 + $0x4] sm:$0xf]  ;;  %v627_v0 = vld [vmem:[%s1470_s1 + $0x8] sm:$0xf0]  ;;  %v766_v1 = vor.u32 %v947_v54, %v763_v56  ;;  %v854_v2 = vor.u32 %v969_v58, %v851_v59  ;;  %v983_v9 = vld [vmem:[%s1470_s1 + $0x234] sm:$0xf] }
  0x2d   :  { %535 = vmatpush.bf16.msrb.mxu1 %v670_v7  ;;  %v929_v3 = vld [vmem:[%s1470_s1 + $0x84] sm:$0xf]  ;;  %v691_v4 = vld [vmem:[%s1470_s1 + $0x88] sm:$0xf0]  ;;  %v967_v7 = vld [vmem:[%s1470_s1 + $0x1b4] sm:$0xf]  ;;  %v630_v11 = vor.u32 %v913_v63, %v627_v0 }
  0x2e   :  { %548 = vmatpush.bf16.msrb.mxu2 %v734_v8  ;;  %v945_v5 = vld [vmem:[%s1470_s1 + $0x104] sm:$0xf]  ;;  %v755_v6 = vld [vmem:[%s1470_s1 + $0x108] sm:$0xf0]  ;;  %v843_v8 = vld [vmem:[%s1470_s1 + $0x1b8] sm:$0xf0] }
  0x2f   :  { %561 = vmatpush.bf16.msrb.mxu3 %v798_v12  ;;  %v907_v10 = vld [vmem:[%s1470_s1 + $0x238] sm:$0xf0]  ;;  %v694_v12 = vor.u32 %v929_v3, %v691_v4  ;;  %v758_v13 = vor.u32 %v945_v5, %v755_v6  ;;  %v846_v14 = vor.u32 %v967_v7, %v843_v8  ;;  %v965_v16 = vld [vmem:[%s1470_s1 + $0x1a4] sm:$0xf]  ;;  %v835_v17 = vld [vmem:[%s1470_s1 + $0x1a8] sm:$0xf0] }
  0x30   :  { %527 = vmatpush.bf16.msrb.mxu0 %v882_v19  ;;  %v910_v15 = vor.u32 %v983_v9, %v907_v10  ;;  %v981_v18 = vld [vmem:[%s1470_s1 + $0x224] sm:$0xf]  ;;  %v899_v19 = vld [vmem:[%s1470_s1 + $0x228] sm:$0xf0]  ;;  %v963_v22 = vld [vmem:[%s1470_s1 + $0x194] sm:$0xf] }
  0x31   :  { %536 = vmatpush.bf16.msrb.mxu1 %v662_v20  ;;  %v838_v20 = vor.u32 %v965_v16, %v835_v17  ;;  %v827_v23 = vld [vmem:[%s1470_s1 + $0x198] sm:$0xf0]  ;;  %v977_v28 = vld [vmem:[%s1470_s1 + $0x204] sm:$0xf]  ;;  %v610_v59 = vld [vmem:[%s1472_s2] sm:$0x3] }
  0x32   :  { %549 = vmatpush.bf16.msrb.mxu2 %v726_v21  ;;  %v902_v21 = vor.u32 %v981_v18, %v899_v19  ;;  %v830_v26 = vor.u32 %v963_v22, %v827_v23  ;;  %v612_v5 = vperm.slane %v610_v59, 0 }
  0x33   :  { %562 = vmatpush.bf16.msrb.mxu3 %v790_v24  ;;  %911 = vmatmul.msk.bf16.vlgmr.msrb.gmra.mxu0 %vm465_vm0, %v1364_v44  ;;  %v979_v24 = vld [vmem:[%s1470_s1 + $0x214] sm:$0xf] }
  0x34   :  { %572 = vmatpush.bf16.msra.mxu0 %v878_v25  ;;  %v891_v25 = vld [vmem:[%s1470_s1 + $0x218] sm:$0xf0] }
  0x35   :  { %537 = vmatpush.bf16.msrb.mxu1 %v654_v32  ;;  %v894_v27 = vor.u32 %v979_v24, %v891_v25 }
  0x36   :  { %550 = vmatpush.bf16.msrb.mxu2 %v718_v33 }
  0x37   :  { %563 = vmatpush.bf16.msrb.mxu3 %v782_v36 }
  0x38   :  { %573 = vmatpush.bf16.msra.mxu0 %v870_v37  ;;  %v986_v37 = vmov 0.0  }
  0x39   :  { %538 = vmatpush.bf16.msrb.mxu1 %v646_v45  ;;  %19 = vst [vmem:[#allocation2] sm:$0xf] %v986_v37 }
  0x3a   :  { %551 = vmatpush.bf16.msrb.mxu2 %v710_v46 }
  0x3b   :  { %564 = vmatpush.bf16.msrb.mxu3 %v774_v49 }
  0x3c   :  { %574 = vmatpush.bf16.msra.mxu0 %v862_v50 }
  0x3d   :  { %539 = vmatpush.bf16.msrb.mxu1 %v638_v60 }
  0x3e   :  { %552 = vmatpush.bf16.msrb.mxu2 %v702_v61 }
  0x3f   :  { %565 = vmatpush.bf16.msrb.mxu3 %v766_v1  ;;  %v613_v1 = vperm.slane %v610_v59, 1 }
  0x40   :  { %575 = vmatpush.bf16.msra.mxu0 %v854_v2  ;;  %v20_v61 = vld [vmem:[#allocation2] sm:$0xf] }
  0x41   :  { %540 = vmatpush.bf16.msrb.mxu1 %v630_v11  ;;  %v614_v6 = vrot.slane %v613_v1, 6 }
  0x42   :  { %553 = vmatpush.bf16.msrb.mxu2 %v694_v12 }
  0x43   :  { %566 = vmatpush.bf16.msrb.mxu3 %v758_v13  ;;  %v615_v7 = vsel %vm601_vm1, %v612_v5, %v614_v6 }
  0x44   :  { %576 = vmatpush.bf16.msra.mxu0 %v846_v14  ;;  %541 = vmatmul.bf16.vlgmr.msrb.gmra.mxu1 %v1244_v51  ;;  %v961_v51 = vld [vmem:[%s1470_s1 + $0x184] sm:$0xf] }
  0x45   :  { %589 = vmatpush.bf16.msra.mxu1 %v910_v15  ;;  %554 = vmatmul.bf16.vlgmr.msrb.gmra.mxu2 %v1252_v55  ;;  %v819_v55 = vld [vmem:[%s1470_s1 + $0x188] sm:$0xf0] }
  0x46   :  { %567 = vmatmul.bf16.vlgmr.msrb.gmra.mxu3 %v1257_v57  ;;  %v883_v57 = vld [vmem:[%s1470_s1 + $0x208] sm:$0xf0]  ;;  %v822_v29 = vor.u32 %v961_v51, %v819_v55 }
  0x47   :  { %v886_v30 = vor.u32 %v977_v28, %v883_v57 }
  0x48   :  { %577 = vmatpush.bf16.msra.mxu0 %v838_v20 }
  0x49   :  { %590 = vmatpush.bf16.msra.mxu1 %v902_v21 }
  0x4c   :  { %578 = vmatpush.bf16.msra.mxu0 %v830_v26 }
  0x4d   :  { %591 = vmatpush.bf16.msra.mxu1 %v894_v27 }
  0x50   :  { %579 = vmatpush.bf16.msra.mxu0 %v822_v29 }
  0x51   :  { %592 = vmatpush.bf16.msra.mxu1 %v886_v30 }
  0x53   :  { %580 = vmatmul.bf16.vlgmr.msra.gmra.mxu0 %v1265_v62 }
  0x54   :  { %912 = vmatmul.msk.bf16.vlgmr.msra.gmra.mxu1 %vm465_vm0, %v1364_v44 }
  0xa0   :  { %v477_v31 = vpop.f32.mrf.mxu0 }
  0xa1   :  { %v490_v32 = vpop.f32.mrf.mxu1 }
  0xa2   :  { %v491_v45 = vadd.f32 %v490_v32, %v477_v31 }
  0xa8   :  { %v503_v33 = vpop.f32.mrf.mxu2  ;;  %v479_v34 = vpop.f32.mrf.mxu0 }
  0xa9   :  { %v516_v35 = vpop.f32.mrf.mxu3  ;;  %v492_v36 = vpop.f32.mrf.mxu1  ;;  %v504_v48 = vadd.f32 %v503_v33, %v491_v45 }
  0xab   :  { %v517_v53 = vadd.f32 %v516_v35, %v504_v48 }
  0xb0   :  { %v505_v38 = vpop.f32.mrf.mxu2  ;;  %v529_v40 = vpop.f32.mrf.mxu0 }
  0xb1   :  { %v518_v39 = vpop.f32.mrf.mxu3  ;;  %v530_v60 = vadd.f32 %v529_v40, %v517_v53 }
  0xb8   :  { %v531_v41 = vpop.f32.mrf.mxu0 }
  0xc1   :  { %v542_v42 = vpop.f32.mrf.mxu1 }
  0xc8   :  { %v555_v43 = vpop.f32.mrf.mxu2 }
  0xc9   :  { %v568_v46 = vpop.f32.mrf.mxu3  ;;  %v556_v62 = vadd.f32 %v555_v43, %v542_v42  ;;  %v544_v47 = vpop.f32.mrf.mxu1 }
  0xcb   :  { %v569_v44 = vadd.f32 %v568_v46, %v556_v62 }
  0xd0   :  { %v581_v49 = vpop.f32.mrf.mxu0  ;;  %v557_v52 = vpop.f32.mrf.mxu2 }
  0xd1   :  { %v582_v50 = vadd.f32 %v581_v49, %v569_v44  ;;  %v570_v54 = vpop.f32.mrf.mxu3  ;;  %v594_v56 = vpop.f32.mrf.mxu1 }
  0xd3   :  { %v595_v58 = vadd.f32 %v594_v56, %v582_v50 }
  0xd5   :  { %v600_v63 = vrot.slane %v595_v58, 6 }
  0xd7   :  { %v602_v0 = vsel %vm601_vm1, %v530_v60, %v600_v63 }
  0xd8   :  { %v583_v2 = vpop.f32.mrf.mxu0  ;;  %v604_v3 = vadd.f32 %v602_v0, %v20_v61 }
  0xd9   :  { %v596_v4 = vpop.f32.mrf.mxu1 }
  0xda   :  { %605 = vst [vmem:[#allocation2] sm:$0xf] %v604_v3 }
  0xe1   :  { %v609_v8 = vld [vmem:[#allocation2] sm:$0xf] }
  0xe2   :  { %v617_v9 = vadd.f32 %v615_v7, %v609_v8 }
  0xe4   :  { %618 = vst [vmem:[%s1473_s3] sm:$0xf] %v617_v9 }

// kernel: _lambda_.27
= control target key start
LH: loop header
LB: loop body
LE: loop exit
PB: predicated region body
PF: predicated region fallthrough
CT: control target
= control target key end

     0   :  { %s1384_s1 = inlined_call_operand.vmem [shape: bf16[1152,128], index: 1, kind: input, shape index: {}]   ;;  %s1385_s0 = inlined_call_operand.vmem [shape: bf16[8,1152], index: 0, kind: input, shape index: {}]   ;;  %s1386_s2 = inlined_call_operand.vmem [shape: f32[1,128], index: 2, kind: input, shape index: {}]   ;;  %s1387_s3 = inlined_call_operand.vmem [shape: f32[8,128], index: 3, kind: output, shape index: {}]  }
   0x1   :  { %v1061_v0 = vld [vmem:[%s1384_s1 + $0x38] sm:$0xff]  ;;  %v1060_v4 = vld [vmem:[%s1384_s1 + $0x30] sm:$0xff]  ;;  %v1059_v8 = vld [vmem:[%s1384_s1 + $0x28] sm:$0xff] }
   0x2   :  { %v1077_v1 = vld [vmem:[%s1384_s1 + $0xb8] sm:$0xff]  ;;  %633 = vmatpush.bf16.msra.mxu0 %v1061_v0  ;;  %v1076_v5 = vld [vmem:[%s1384_s1 + $0xb0] sm:$0xff]  ;;  %v1075_v9 = vld [vmem:[%s1384_s1 + $0xa8] sm:$0xff] }
   0x3   :  { %v1085_v2 = vld [vmem:[%s1384_s1 + $0xf8] sm:$0xff]  ;;  %659 = vmatpush.bf16.msra.mxu2 %v1077_v1  ;;  %v1084_v6 = vld [vmem:[%s1384_s1 + $0xf0] sm:$0xff]  ;;  %v1083_v10 = vld [vmem:[%s1384_s1 + $0xe8] sm:$0xff] }
   0x4   :  { %v1069_v3 = vld [vmem:[%s1384_s1 + $0x78] sm:$0xff]  ;;  %672 = vmatpush.bf16.msra.mxu3 %v1085_v2  ;;  %v1068_v7 = vld [vmem:[%s1384_s1 + $0x70] sm:$0xff]  ;;  %v1067_v11 = vld [vmem:[%s1384_s1 + $0x68] sm:$0xff] }
   0x5   :  { %646 = vmatpush.bf16.msra.mxu1 %v1069_v3  ;;  %v1058_v12 = vld [vmem:[%s1384_s1 + $0x20] sm:$0xff]  ;;  %v1057_v16 = vld [vmem:[%s1384_s1 + $0x18] sm:$0xff]  ;;  %v1056_v20 = vld [vmem:[%s1384_s1 + $0x10] sm:$0xff] }
   0x6   :  { %634 = vmatpush.bf16.msra.mxu0 %v1060_v4  ;;  %v1074_v13 = vld [vmem:[%s1384_s1 + $0xa0] sm:$0xff]  ;;  %v1073_v17 = vld [vmem:[%s1384_s1 + $0x98] sm:$0xff]  ;;  %v1072_v21 = vld [vmem:[%s1384_s1 + $0x90] sm:$0xff] }
   0x7   :  { %660 = vmatpush.bf16.msra.mxu2 %v1076_v5  ;;  %v1082_v14 = vld [vmem:[%s1384_s1 + $0xe0] sm:$0xff]  ;;  %v1081_v18 = vld [vmem:[%s1384_s1 + $0xd8] sm:$0xff]  ;;  %v1080_v22 = vld [vmem:[%s1384_s1 + $0xd0] sm:$0xff] }
   0x8   :  { %673 = vmatpush.bf16.msra.mxu3 %v1084_v6  ;;  %v1066_v15 = vld [vmem:[%s1384_s1 + $0x60] sm:$0xff]  ;;  %v1065_v19 = vld [vmem:[%s1384_s1 + $0x58] sm:$0xff]  ;;  %v1064_v23 = vld [vmem:[%s1384_s1 + $0x50] sm:$0xff] }
   0x9   :  { %647 = vmatpush.bf16.msra.mxu1 %v1068_v7  ;;  %v1055_v24 = vld [vmem:[%s1384_s1 + $0x8] sm:$0xff]  ;;  %v20_v29 = vld [vmem:[%s1385_s0] sm:$0xff]  ;;  %v1093_v34 = vld [vmem:[%s1384_s1 + $0x138] sm:$0xff] }
   0xa   :  { %635 = vmatpush.bf16.msra.mxu0 %v1059_v8  ;;  %v1071_v25 = vld [vmem:[%s1384_s1 + $0x88] sm:$0xff]  ;;  %v1054_v30 = vld [vmem:[%s1384_s1] sm:$0xff]  ;;  %v174_v33 = vunpack.c.l.b16 %v20_v29  ;;  %v1109_v35 = vld [vmem:[%s1384_s1 + $0x1b8] sm:$0xff]  ;;  %v175_v39 = vunpack.c.h.b16 %v20_v29 }
   0xb   :  { %661 = vmatpush.bf16.msra.mxu2 %v1075_v9  ;;  %v1079_v26 = vld [vmem:[%s1384_s1 + $0xc8] sm:$0xff]  ;;  %v1070_v31 = vld [vmem:[%s1384_s1 + $0x80] sm:$0xff]  ;;  %v1117_v40 = vld [vmem:[%s1384_s1 + $0x1f8] sm:$0xff] }
   0xc   :  { %674 = vmatpush.bf16.msra.mxu3 %v1083_v10  ;;  %v1063_v27 = vld [vmem:[%s1384_s1 + $0x48] sm:$0xff]  ;;  %v1078_v36 = vld [vmem:[%s1384_s1 + $0xc0] sm:$0xff]  ;;  %v1101_v41 = vld [vmem:[%s1384_s1 + $0x178] sm:$0xff]  ;;  %v183_v43 = vpack.c.b16 %v174_v33, %v174_v33  ;;  %v184_v47 = vpack.c.b16 %v175_v39, %v175_v39 }
   0xd   :  { %648 = vmatpush.bf16.msra.mxu1 %v1067_v11  ;;  %v21_v28 = vld [vmem:[%s1385_s0 + $0x8] sm:$0xff]  ;;  %v1062_v37 = vld [vmem:[%s1384_s1 + $0x40] sm:$0xff]  ;;  %v1092_v44 = vld [vmem:[%s1384_s1 + $0x130] sm:$0xff] }
   0xe   :  { %636 = vmatpush.bf16.msra.mxu0 %v1058_v12  ;;  %v176_v32 = vunpack.c.l.b16 %v21_v28  ;;  %v177_v38 = vunpack.c.h.b16 %v21_v28  ;;  %v1108_v45 = vld [vmem:[%s1384_s1 + $0x1b0] sm:$0xff]  ;;  %v1091_v50 = vld [vmem:[%s1384_s1 + $0x128] sm:$0xff]  ;;  %v1090_v54 = vld [vmem:[%s1384_s1 + $0x120] sm:$0xff] }
   0xf   :  { %662 = vmatpush.bf16.msra.mxu2 %v1074_v13  ;;  %v1116_v48 = vld [vmem:[%s1384_s1 + $0x1f0] sm:$0xff]  ;;  %v1107_v51 = vld [vmem:[%s1384_s1 + $0x1a8] sm:$0xff]  ;;  %v1106_v55 = vld [vmem:[%s1384_s1 + $0x1a0] sm:$0xff] }
  0x10   :  { %675 = vmatpush.bf16.msra.mxu3 %v1082_v14  ;;  %v185_v42 = vpack.c.b16 %v176_v32, %v176_v32  ;;  %v186_v46 = vpack.c.b16 %v177_v38, %v177_v38  ;;  %v1100_v49 = vld [vmem:[%s1384_s1 + $0x170] sm:$0xff]  ;;  %v1115_v52 = vld [vmem:[%s1384_s1 + $0x1e8] sm:$0xff]  ;;  %v1114_v56 = vld [vmem:[%s1384_s1 + $0x1e0] sm:$0xff] }
  0x11   :  { %649 = vmatpush.bf16.msra.mxu1 %v1066_v15  ;;  %v1099_v53 = vld [vmem:[%s1384_s1 + $0x168] sm:$0xff]  ;;  %v1098_v57 = vld [vmem:[%s1384_s1 + $0x160] sm:$0xff]  ;;  %v1089_v58 = vld [vmem:[%s1384_s1 + $0x118] sm:$0xff] }
  0x12   :  { %637 = vmatpush.bf16.msra.mxu0 %v1057_v16  ;;  %v1105_v59 = vld [vmem:[%s1384_s1 + $0x198] sm:$0xff]  ;;  %v1088_v62 = vld [vmem:[%s1384_s1 + $0x110] sm:$0xff]  ;;  %v1087_v2 = vld [vmem:[%s1384_s1 + $0x108] sm:$0xff] }
  0x13   :  { %663 = vmatpush.bf16.msra.mxu2 %v1073_v17  ;;  %v1113_v60 = vld [vmem:[%s1384_s1 + $0x1d8] sm:$0xff]  ;;  %v1104_v63 = vld [vmem:[%s1384_s1 + $0x190] sm:$0xff]  ;;  %v1103_v3 = vld [vmem:[%s1384_s1 + $0x188] sm:$0xff] }
  0x14   :  { %676 = vmatpush.bf16.msra.mxu3 %v1081_v18  ;;  %v1097_v61 = vld [vmem:[%s1384_s1 + $0x158] sm:$0xff]  ;;  %v1112_v0 = vld [vmem:[%s1384_s1 + $0x1d0] sm:$0xff]  ;;  %v1111_v6 = vld [vmem:[%s1384_s1 + $0x1c8] sm:$0xff] }
  0x15   :  { %650 = vmatpush.bf16.msra.mxu1 %v1065_v19  ;;  %v1096_v1 = vld [vmem:[%s1384_s1 + $0x150] sm:$0xff]  ;;  %v23_v4 = vld [vmem:[%s1385_s0 + $0x18] sm:$0xff]  ;;  %v1095_v7 = vld [vmem:[%s1384_s1 + $0x148] sm:$0xff] }
  0x16   :  { %638 = vmatpush.bf16.msra.mxu0 %v1056_v20  ;;  %v22_v5 = vld [vmem:[%s1385_s0 + $0x10] sm:$0xff]  ;;  %v180_v8 = vunpack.c.l.b16 %v23_v4  ;;  %v1086_v10 = vld [vmem:[%s1384_s1 + $0x100] sm:$0xff]  ;;  %v1125_v12 = vld [vmem:[%s1384_s1 + $0x238] sm:$0xff]  ;;  %v181_v13 = vunpack.c.h.b16 %v23_v4 }
  0x17   :  { %664 = vmatpush.bf16.msra.mxu2 %v1072_v21  ;;  %v178_v9 = vunpack.c.l.b16 %v22_v5  ;;  %v1102_v11 = vld [vmem:[%s1384_s1 + $0x180] sm:$0xff]  ;;  %v179_v16 = vunpack.c.h.b16 %v22_v5  ;;  %v1124_v19 = vld [vmem:[%s1384_s1 + $0x230] sm:$0xff] }
  0x18   :  { %677 = vmatpush.bf16.msra.mxu3 %v1080_v22  ;;  %v1110_v14 = vld [vmem:[%s1384_s1 + $0x1c0] sm:$0xff]  ;;  %v189_v17 = vpack.c.b16 %v180_v8, %v180_v8  ;;  %v190_v20 = vpack.c.b16 %v181_v13, %v181_v13  ;;  %v1123_v22 = vld [vmem:[%s1384_s1 + $0x228] sm:$0xff] }
  0x19   :  { %651 = vmatpush.bf16.msra.mxu1 %v1064_v23  ;;  %v1094_v15 = vld [vmem:[%s1384_s1 + $0x140] sm:$0xff]  ;;  %v187_v18 = vpack.c.b16 %v178_v9, %v178_v9  ;;  %v188_v21 = vpack.c.b16 %v179_v16, %v179_v16 }
  0x1a   :  { %639 = vmatpush.bf16.msra.mxu0 %v1055_v24  ;;  %v1122_v23 = vld [vmem:[%s1384_s1 + $0x220] sm:$0xff]  ;;  %v1121_v24 = vld [vmem:[%s1384_s1 + $0x218] sm:$0xff] }
  0x1b   :  { %665 = vmatpush.bf16.msra.mxu2 %v1071_v25  ;;  %v1120_v25 = vld [vmem:[%s1384_s1 + $0x210] sm:$0xff]  ;;  %v1118_v29 = vld [vmem:[%s1384_s1 + $0x200] sm:$0xff] }
  0x1c   :  { %678 = vmatpush.bf16.msra.mxu3 %v1079_v26  ;;  %v1119_v26 = vld [vmem:[%s1384_s1 + $0x208] sm:$0xff] }
  0x1d   :  { %652 = vmatpush.bf16.msra.mxu1 %v1063_v27  ;;  %v24_v27 = vld [vmem:[%s1385_s0 + $0x20] sm:$0xf] }
  0x1e   :  { %640 = vmatpush.bf16.msra.mxu0 %v1054_v30  ;;  %v182_v28 = vunpack.c.l.b16 %v24_v27 }
  0x1f   :  { %666 = vmatpush.bf16.msra.mxu2 %v1070_v31 }
  0x20   :  { %679 = vmatpush.bf16.msra.mxu3 %v1078_v36  ;;  %v191_v30 = vpack.c.b16 %v182_v28, %v182_v28 }
  0x21   :  { %653 = vmatpush.bf16.msra.mxu1 %v1062_v37  ;;  %641 = vmatmul.bf16.vlgmr.msra.gmra.mxu0 %v183_v43 }
  0x22   :  { %685 = vmatpush.bf16.msrb.mxu0 %v1093_v34  ;;  %667 = vmatmul.bf16.vlgmr.msra.gmra.mxu2 %v185_v42 }
  0x23   :  { %711 = vmatpush.bf16.msrb.mxu2 %v1109_v35  ;;  %680 = vmatmul.bf16.vlgmr.msra.gmra.mxu3 %v186_v46 }
  0x24   :  { %724 = vmatpush.bf16.msrb.mxu3 %v1117_v40  ;;  %654 = vmatmul.bf16.vlgmr.msra.gmra.mxu1 %v184_v47 }
  0x25   :  { %698 = vmatpush.bf16.msrb.mxu1 %v1101_v41 }
  0x26   :  { %686 = vmatpush.bf16.msrb.mxu0 %v1092_v44 }
  0x27   :  { %712 = vmatpush.bf16.msrb.mxu2 %v1108_v45 }
  0x28   :  { %725 = vmatpush.bf16.msrb.mxu3 %v1116_v48 }
  0x29   :  { %699 = vmatpush.bf16.msrb.mxu1 %v1100_v49 }
  0x2a   :  { %687 = vmatpush.bf16.msrb.mxu0 %v1091_v50 }
  0x2b   :  { %713 = vmatpush.bf16.msrb.mxu2 %v1107_v51 }
  0x2c   :  { %726 = vmatpush.bf16.msrb.mxu3 %v1115_v52 }
  0x2d   :  { %700 = vmatpush.bf16.msrb.mxu1 %v1099_v53 }
  0x2e   :  { %688 = vmatpush.bf16.msrb.mxu0 %v1090_v54  ;;  %v1126_v54 = vld [vmem:[%s1386_s2] ss:$0 sm:$0xff] }
  0x2f   :  { %714 = vmatpush.bf16.msrb.mxu2 %v1106_v55 }
  0x30   :  { %727 = vmatpush.bf16.msrb.mxu3 %v1114_v56 }
  0x31   :  { %701 = vmatpush.bf16.msrb.mxu1 %v1098_v57 }
  0x32   :  { %689 = vmatpush.bf16.msrb.mxu0 %v1089_v58 }
  0x33   :  { %715 = vmatpush.bf16.msrb.mxu2 %v1105_v59 }
  0x34   :  { %728 = vmatpush.bf16.msrb.mxu3 %v1113_v60 }
  0x35   :  { %702 = vmatpush.bf16.msrb.mxu1 %v1097_v61 }
  0x36   :  { %690 = vmatpush.bf16.msrb.mxu0 %v1088_v62 }
  0x37   :  { %716 = vmatpush.bf16.msrb.mxu2 %v1104_v63 }
  0x38   :  { %729 = vmatpush.bf16.msrb.mxu3 %v1112_v0 }
  0x39   :  { %703 = vmatpush.bf16.msrb.mxu1 %v1096_v1 }
  0x3a   :  { %691 = vmatpush.bf16.msrb.mxu0 %v1087_v2 }
  0x3b   :  { %717 = vmatpush.bf16.msrb.mxu2 %v1103_v3 }
  0x3c   :  { %730 = vmatpush.bf16.msrb.mxu3 %v1111_v6 }
  0x3d   :  { %704 = vmatpush.bf16.msrb.mxu1 %v1095_v7 }
  0x3e   :  { %692 = vmatpush.bf16.msrb.mxu0 %v1086_v10 }
  0x3f   :  { %718 = vmatpush.bf16.msrb.mxu2 %v1102_v11 }
  0x40   :  { %731 = vmatpush.bf16.msrb.mxu3 %v1110_v14 }
  0x41   :  { %705 = vmatpush.bf16.msrb.mxu1 %v1094_v15  ;;  %693 = vmatmul.bf16.vlgmr.msrb.gmra.mxu0 %v187_v18 }
  0x42   :  { %737 = vmatpush.bf16.msra.mxu0 %v1125_v12  ;;  %719 = vmatmul.bf16.vlgmr.msrb.gmra.mxu2 %v189_v17 }
  0x43   :  { %732 = vmatmul.bf16.vlgmr.msrb.gmra.mxu3 %v190_v20 }
  0x44   :  { %706 = vmatmul.bf16.vlgmr.msrb.gmra.mxu1 %v188_v21 }
  0x46   :  { %738 = vmatpush.bf16.msra.mxu0 %v1124_v19 }
  0x4a   :  { %739 = vmatpush.bf16.msra.mxu0 %v1123_v22 }
  0x4e   :  { %740 = vmatpush.bf16.msra.mxu0 %v1122_v23 }
  0x52   :  { %741 = vmatpush.bf16.msra.mxu0 %v1121_v24 }
  0x56   :  { %742 = vmatpush.bf16.msra.mxu0 %v1120_v25 }
  0x5a   :  { %743 = vmatpush.bf16.msra.mxu0 %v1119_v26 }
  0x5e   :  { %744 = vmatpush.bf16.msra.mxu0 %v1118_v29 }
  0x61   :  { %745 = vmatmul.bf16.vlgmr.msra.gmra.mxu0 %v191_v30 }
  0x9e   :  { %v642_v31 = vpop.f32.mrf.mxu0 }
  0xa1   :  { %v655_v32 = vpop.f32.mrf.mxu1 }
  0xa2   :  { %v656_v41 = vadd.f32 %v655_v32, %v642_v31 }
  0xa5   :  { %v668_v33 = vpop.f32.mrf.mxu2 }
  0xa6   :  { %v681_v34 = vpop.f32.mrf.mxu3  ;;  %v644_v35 = vpop.f32.mrf.mxu0  ;;  %v669_v43 = vadd.f32 %v668_v33, %v656_v41 }
  0xa8   :  { %v682_v47 = vadd.f32 %v681_v34, %v669_v43 }
  0xa9   :  { %v657_v36 = vpop.f32.mrf.mxu1 }
  0xad   :  { %v670_v37 = vpop.f32.mrf.mxu2 }
  0xae   :  { %v683_v38 = vpop.f32.mrf.mxu3 }
  0xbe   :  { %v694_v39 = vpop.f32.mrf.mxu0 }
  0xbf   :  { %v695_v49 = vadd.f32 %v694_v39, %v682_v47 }
  0xc1   :  { %v707_v40 = vpop.f32.mrf.mxu1 }
  0xc2   :  { %v708_v51 = vadd.f32 %v707_v40, %v695_v49 }
  0xc5   :  { %v720_v42 = vpop.f32.mrf.mxu2 }
  0xc6   :  { %v733_v44 = vpop.f32.mrf.mxu3  ;;  %v696_v45 = vpop.f32.mrf.mxu0  ;;  %v721_v52 = vadd.f32 %v720_v42, %v708_v51 }
  0xc8   :  { %v734_v53 = vadd.f32 %v733_v44, %v721_v52 }
  0xc9   :  { %v709_v46 = vpop.f32.mrf.mxu1 }
  0xcd   :  { %v722_v48 = vpop.f32.mrf.mxu2 }
  0xce   :  { %v735_v50 = vpop.f32.mrf.mxu3 }
  0xde   :  { %v746_v55 = vpop.f32.mrf.mxu0 }
  0xdf   :  { %v747_v56 = vadd.f32 %v746_v55, %v734_v53 }
  0xe1   :  { %v760_v57 = vadd.f32 %v1126_v54, %v747_v56 }
  0xe3   :  { %761 = vst [vmem:[%s1387_s3] sm:$0xff] %v760_v57 }
  0xe6   :  { %v748_v58 = vpop.f32.mrf.mxu0 }

// kernel: _lambda_.29
= control target key start
LH: loop header
LB: loop body
LE: loop exit
PB: predicated region body
PF: predicated region fallthrough
CT: control target
= control target key end

     0   :  { %vm19_vm0 = vcmask 523264   ;;  %s967_s1 = inlined_call_operand.vmem [shape: bf16[576,64], index: 1, kind: input, shape index: {}]   ;;  %s968_s0 = inlined_call_operand.vmem [shape: bf16[32,576], index: 0, kind: input, shape index: {}]   ;;  %s969_s2 = inlined_call_operand.vmem [shape: f32[1,64], index: 2, kind: input, shape index: {}]   ;;  %s970_s3 = inlined_call_operand.vmem [shape: f32[32,64], index: 3, kind: output, shape index: {}]  }
   0x1   :  { %v714_v0 = vld [vmem:[%s967_s1 + $0x38] sm:$0xff]  ;;  %v713_v4 = vld [vmem:[%s967_s1 + $0x30] sm:$0xff]  ;;  %v712_v8 = vld [vmem:[%s967_s1 + $0x28] sm:$0xff] }
   0x2   :  { %v722_v1 = vld [vmem:[%s967_s1 + $0x78] sm:$0xff]  ;;  %385 = vmatpush.bf16.msra.mxu0 %v714_v0  ;;  %v721_v5 = vld [vmem:[%s967_s1 + $0x70] sm:$0xff]  ;;  %v720_v9 = vld [vmem:[%s967_s1 + $0x68] sm:$0xff] }
   0x3   :  { %v730_v2 = vld [vmem:[%s967_s1 + $0xb8] sm:$0xff]  ;;  %404 = vmatpush.bf16.msra.mxu1 %v722_v1  ;;  %v729_v6 = vld [vmem:[%s967_s1 + $0xb0] sm:$0xff]  ;;  %v728_v10 = vld [vmem:[%s967_s1 + $0xa8] sm:$0xff] }
   0x4   :  { %v738_v3 = vld [vmem:[%s967_s1 + $0xf8] sm:$0xff]  ;;  %423 = vmatpush.bf16.msra.mxu2 %v730_v2  ;;  %v737_v7 = vld [vmem:[%s967_s1 + $0xf0] sm:$0xff]  ;;  %v736_v11 = vld [vmem:[%s967_s1 + $0xe8] sm:$0xff]  ;;  %v749_v2 = vmov 0.0  }
   0x5   :  { %442 = vmatpush.bf16.msra.mxu3 %v738_v3  ;;  %v711_v12 = vld [vmem:[%s967_s1 + $0x20] sm:$0xff]  ;;  %v710_v16 = vld [vmem:[%s967_s1 + $0x18] sm:$0xff]  ;;  %v709_v20 = vld [vmem:[%s967_s1 + $0x10] sm:$0xff]  ;;  %20 = vst.msk [vmem:[#allocation2] sm:$0xff] %vm19_vm0, %v749_v2 }
   0x6   :  { %386 = vmatpush.bf16.msra.mxu0 %v713_v4  ;;  %v719_v13 = vld [vmem:[%s967_s1 + $0x60] sm:$0xff]  ;;  %v718_v17 = vld [vmem:[%s967_s1 + $0x58] sm:$0xff]  ;;  %v717_v21 = vld [vmem:[%s967_s1 + $0x50] sm:$0xff]  ;;  %21 = vst.msk [vmem:[#allocation2 + $0x8] sm:$0xff] %vm19_vm0, %v749_v2 }
   0x7   :  { %405 = vmatpush.bf16.msra.mxu1 %v721_v5  ;;  %v727_v14 = vld [vmem:[%s967_s1 + $0xa0] sm:$0xff]  ;;  %v726_v18 = vld [vmem:[%s967_s1 + $0x98] sm:$0xff]  ;;  %v725_v22 = vld [vmem:[%s967_s1 + $0x90] sm:$0xff]  ;;  %22 = vst.msk [vmem:[#allocation2 + $0x10] sm:$0xff] %vm19_vm0, %v749_v2 }
   0x8   :  { %424 = vmatpush.bf16.msra.mxu2 %v729_v6  ;;  %v735_v15 = vld [vmem:[%s967_s1 + $0xe0] sm:$0xff]  ;;  %v734_v19 = vld [vmem:[%s967_s1 + $0xd8] sm:$0xff]  ;;  %v733_v23 = vld [vmem:[%s967_s1 + $0xd0] sm:$0xff]  ;;  %23 = vst.msk [vmem:[#allocation2 + $0x18] sm:$0xff] %vm19_vm0, %v749_v2 }
   0x9   :  { %443 = vmatpush.bf16.msra.mxu3 %v737_v7  ;;  %v708_v24 = vld [vmem:[%s967_s1 + $0x8] sm:$0xff]  ;;  %v707_v28 = vld [vmem:[%s967_s1] sm:$0xff]  ;;  %v699_v33 = vld [vmem:[%s968_s0 + $0x10] sm:$0xf0] }
   0xa   :  { %387 = vmatpush.bf16.msra.mxu0 %v712_v8  ;;  %v716_v25 = vld [vmem:[%s967_s1 + $0x48] sm:$0xff]  ;;  %v715_v29 = vld [vmem:[%s967_s1 + $0x40] sm:$0xff]  ;;  %v515_v35 = vld [vmem:[%s968_s0 + $0x14] sm:$0xf0] }
   0xb   :  { %406 = vmatpush.bf16.msra.mxu1 %v720_v9  ;;  %v724_v26 = vld [vmem:[%s967_s1 + $0x88] sm:$0xff]  ;;  %v723_v30 = vld [vmem:[%s967_s1 + $0x80] sm:$0xff]  ;;  %v700_v37 = vld [vmem:[%s968_s0 + $0x18] sm:$0xf0] }
   0xc   :  { %425 = vmatpush.bf16.msra.mxu2 %v728_v10  ;;  %v732_v27 = vld [vmem:[%s967_s1 + $0xc8] sm:$0xff]  ;;  %v731_v31 = vld [vmem:[%s967_s1 + $0xc0] sm:$0xff]  ;;  %v742_v40 = vld [vmem:[%s967_s1 + $0x118] sm:$0xff] }
   0xd   :  { %444 = vmatpush.bf16.msra.mxu3 %v736_v11  ;;  %v513_v32 = vld [vmem:[%s968_s0] sm:$0xf]  ;;  %v697_v34 = vld [vmem:[%s968_s0 + $0x4] sm:$0xf]  ;;  %v521_v36 = vld [vmem:[%s968_s0 + $0x8] sm:$0xf] }
   0xe   :  { %388 = vmatpush.bf16.msra.mxu0 %v711_v12  ;;  %v698_v38 = vld [vmem:[%s968_s0 + $0xc] sm:$0xf]  ;;  %v523_v39 = vld [vmem:[%s968_s0 + $0x1c] sm:$0xf0]  ;;  %v514_v41 = vor.u32 %v699_v33, %v513_v32  ;;  %v518_v42 = vor.u32 %v697_v34, %v515_v35  ;;  %v522_v43 = vor.u32 %v700_v37, %v521_v36  ;;  %v741_v45 = vld [vmem:[%s967_s1 + $0x110] sm:$0xff] }
   0xf   :  { %407 = vmatpush.bf16.msra.mxu1 %v719_v13  ;;  %v526_v44 = vor.u32 %v698_v38, %v523_v39  ;;  %v740_v46 = vld [vmem:[%s967_s1 + $0x108] sm:$0xff]  ;;  %v739_v47 = vld [vmem:[%s967_s1 + $0x100] sm:$0xff]  ;;  %v704_v49 = vld [vmem:[%s968_s0 + $0x38] sm:$0xf0] }
  0x10   :  { %426 = vmatpush.bf16.msra.mxu2 %v727_v14  ;;  %v533_v48 = vld [vmem:[%s968_s0 + $0x28] sm:$0xf]  ;;  %v702_v50 = vld [vmem:[%s968_s0 + $0x2c] sm:$0xf]  ;;  %v535_v51 = vld [vmem:[%s968_s0 + $0x3c] sm:$0xf0] }
  0x11   :  { %445 = vmatpush.bf16.msra.mxu3 %v735_v15  ;;  %v541_v52 = vld [vmem:[%s968_s0 + $0x30] sm:$0xf]  ;;  %v705_v53 = vld [vmem:[%s968_s0 + $0x40] sm:$0xf0]  ;;  %v703_v54 = vld [vmem:[%s968_s0 + $0x34] sm:$0xf]  ;;  %v534_v56 = vor.u32 %v704_v49, %v533_v48  ;;  %v538_v57 = vor.u32 %v702_v50, %v535_v51 }
  0x12   :  { %389 = vmatpush.bf16.msra.mxu0 %v710_v16  ;;  %v543_v55 = vld [vmem:[%s968_s0 + $0x44] sm:$0xf0]  ;;  %v542_v58 = vor.u32 %v705_v53, %v541_v52  ;;  %v529_v60 = vld [vmem:[%s968_s0 + $0x10] sm:$0xf]  ;;  %v701_v61 = vld [vmem:[%s968_s0 + $0x20] sm:$0xf0] }
  0x13   :  { %408 = vmatpush.bf16.msra.mxu1 %v718_v17  ;;  %v546_v59 = vor.u32 %v703_v54, %v543_v55  ;;  %v549_v62 = vld [vmem:[%s968_s0 + $0x38] sm:$0xf]  ;;  %v706_v63 = vld [vmem:[%s968_s0 + $0x48] sm:$0xf0]  ;;  %v530_v0 = vor.u32 %v701_v61, %v529_v60 }
  0x14   :  { %427 = vmatpush.bf16.msra.mxu2 %v726_v18  ;;  %v550_v1 = vor.u32 %v706_v63, %v549_v62  ;;  %v25_v39 = vld [vmem:[#allocation2 + $0x8] sm:$0xff] }
  0x15   :  { %446 = vmatpush.bf16.msra.mxu3 %v734_v19 }
  0x16   :  { %390 = vmatpush.bf16.msra.mxu0 %v709_v20 }
  0x17   :  { %409 = vmatpush.bf16.msra.mxu1 %v717_v21 }
  0x18   :  { %428 = vmatpush.bf16.msra.mxu2 %v725_v22 }
  0x19   :  { %447 = vmatpush.bf16.msra.mxu3 %v733_v23 }
  0x1a   :  { %391 = vmatpush.bf16.msra.mxu0 %v708_v24  ;;  %v24_v24 = vld [vmem:[#allocation2] sm:$0xff] }
  0x1b   :  { %410 = vmatpush.bf16.msra.mxu1 %v716_v25 }
  0x1c   :  { %429 = vmatpush.bf16.msra.mxu2 %v724_v26  ;;  %v26_v26 = vld [vmem:[#allocation2 + $0x10] sm:$0xff] }
  0x1d   :  { %448 = vmatpush.bf16.msra.mxu3 %v732_v27 }
  0x1e   :  { %392 = vmatpush.bf16.msra.mxu0 %v707_v28 }
  0x1f   :  { %411 = vmatpush.bf16.msra.mxu1 %v715_v29 }
  0x20   :  { %430 = vmatpush.bf16.msra.mxu2 %v723_v30 }
  0x21   :  { %449 = vmatpush.bf16.msra.mxu3 %v731_v31  ;;  %393 = vmatmul.bf16.vlgmr.msra.gmra.mxu0 %v514_v41  ;;  %v27_v41 = vld [vmem:[#allocation2 + $0x18] sm:$0xff] }
  0x22   :  { %465 = vmatpush.bf16.msrb.mxu0 %v742_v40  ;;  %412 = vmatmul.bf16.vlgmr.msra.gmra.mxu1 %v518_v42 }
  0x23   :  { %743 = vmatpush.bf16.msrb.mxu1 %v742_v40  ;;  %431 = vmatmul.bf16.vlgmr.msra.gmra.mxu2 %v522_v43  ;;  %v748_v43 = vld [vmem:[%s969_s2] ss:$0 sm:$0xff] }
  0x24   :  { %450 = vmatmul.bf16.vlgmr.msra.gmra.mxu3 %v526_v44 }
  0x26   :  { %466 = vmatpush.bf16.msrb.mxu0 %v741_v45 }
  0x27   :  { %744 = vmatpush.bf16.msrb.mxu1 %v741_v45 }
  0x2a   :  { %467 = vmatpush.bf16.msrb.mxu0 %v740_v46 }
  0x2b   :  { %745 = vmatpush.bf16.msrb.mxu1 %v740_v46 }
  0x2e   :  { %468 = vmatpush.bf16.msrb.mxu0 %v739_v47 }
  0x2f   :  { %746 = vmatpush.bf16.msrb.mxu1 %v739_v47 }
  0x31   :  { %398 = vmatmul.bf16.gmra.mxu0 %v534_v56 }
  0x32   :  { %417 = vmatmul.bf16.gmra.mxu1 %v538_v57 }
  0x33   :  { %436 = vmatmul.bf16.gmra.mxu2 %v542_v58 }
  0x34   :  { %455 = vmatmul.bf16.gmra.mxu3 %v546_v59 }
  0x41   :  { %695 = vmatmul.msk.bf16.vlgmr.msrb.gmra.mxu0 %vm19_vm0, %v530_v0 }
  0x42   :  { %696 = vmatmul.msk.bf16.vlgmr.msrb.gmra.mxu1 %vm19_vm0, %v550_v1 }
  0x9e   :  { %v394_v3 = vpop.f32.mrf.mxu0 }
  0x9f   :  { %v413_v4 = vpop.f32.mrf.mxu1 }
  0xa0   :  { %v414_v16 = vadd.f32 %v413_v4, %v394_v3 }
  0xa6   :  { %v432_v5 = vpop.f32.mrf.mxu2  ;;  %v396_v7 = vpop.f32.mrf.mxu0 }
  0xa7   :  { %v451_v6 = vpop.f32.mrf.mxu3  ;;  %v415_v8 = vpop.f32.mrf.mxu1  ;;  %v433_v18 = vadd.f32 %v432_v5, %v414_v16 }
  0xa8   :  { %v416_v28 = vadd.f32 %v415_v8, %v396_v7 }
  0xa9   :  { %v452_v21 = vadd.f32 %v451_v6, %v433_v18 }
  0xae   :  { %v434_v9 = vpop.f32.mrf.mxu2  ;;  %v399_v10 = vpop.f32.mrf.mxu0 }
  0xaf   :  { %v418_v11 = vpop.f32.mrf.mxu1  ;;  %v453_v12 = vpop.f32.mrf.mxu3  ;;  %v435_v32 = vadd.f32 %v434_v9, %v416_v28 }
  0xb0   :  { %v419_v17 = vadd.f32 %v418_v11, %v399_v10 }
  0xb1   :  { %v454_v37 = vadd.f32 %v453_v12, %v435_v32 }
  0xb6   :  { %v437_v13 = vpop.f32.mrf.mxu2  ;;  %v401_v14 = vpop.f32.mrf.mxu0 }
  0xb7   :  { %v420_v15 = vpop.f32.mrf.mxu1  ;;  %v438_v19 = vadd.f32 %v437_v13, %v419_v17  ;;  %v456_v20 = vpop.f32.mrf.mxu3 }
  0xb8   :  { %v421_v29 = vadd.f32 %v420_v15, %v401_v14 }
  0xb9   :  { %v457_v22 = vadd.f32 %v456_v20, %v438_v19 }
  0xbe   :  { %v439_v23 = vpop.f32.mrf.mxu2  ;;  %v470_v25 = vpop.f32.mrf.mxu0 }
  0xbf   :  { %v475_v27 = vpop.f32.mrf.mxu1  ;;  %v471_v30 = vadd.f32 %v470_v25, %v452_v21  ;;  %v440_v33 = vadd.f32 %v439_v23, %v421_v29  ;;  %v458_v36 = vpop.f32.mrf.mxu3 }
  0xc0   :  { %v476_v31 = vadd.f32 %v475_v27, %v457_v22 }
  0xc1   :  { %v480_v34 = vadd.f32 %v471_v30, %v24_v24  ;;  %v459_v38 = vadd.f32 %v458_v36, %v440_v33 }
  0xc2   :  { %v482_v35 = vadd.f32 %v476_v31, %v26_v26 }
  0xc3   :  { %484 = vst.msk [vmem:[#allocation2] sm:$0xff] %vm19_vm0, %v480_v34 }
  0xc4   :  { %486 = vst.msk [vmem:[#allocation2 + $0x10] sm:$0xff] %vm19_vm0, %v482_v35 }
  0xc6   :  { %v472_v40 = vpop.f32.mrf.mxu0 }
  0xc7   :  { %v477_v42 = vpop.f32.mrf.mxu1  ;;  %v473_v44 = vadd.f32 %v472_v40, %v454_v37 }
  0xc8   :  { %v478_v45 = vadd.f32 %v477_v42, %v459_v38 }
  0xc9   :  { %v481_v46 = vadd.f32 %v473_v44, %v25_v39 }
  0xca   :  { %v483_v47 = vadd.f32 %v478_v45, %v27_v41  ;;  %v491_v48 = vld [vmem:[#allocation2] sm:$0xff] }
  0xcb   :  { %v499_v49 = vadd.f32 %v748_v43, %v491_v48  ;;  %v493_v50 = vld [vmem:[#allocation2 + $0x10] sm:$0xff]  ;;  %485 = vst.msk [vmem:[#allocation2 + $0x8] sm:$0xff] %vm19_vm0, %v481_v46 }
  0xcc   :  { %v501_v51 = vadd.f32 %v748_v43, %v493_v50  ;;  %487 = vst.msk [vmem:[#allocation2 + $0x18] sm:$0xff] %vm19_vm0, %v483_v47 }
  0xcd   :  { %503 = vst.msk [vmem:[%s970_s3] sm:$0xff] %vm19_vm0, %v499_v49 }
  0xce   :  { %505 = vst.msk [vmem:[%s970_s3 + $0x10] sm:$0xff] %vm19_vm0, %v501_v51 }
  0xd2   :  { %v492_v52 = vld [vmem:[#allocation2 + $0x8] sm:$0xff] }
  0xd3   :  { %v500_v53 = vadd.f32 %v748_v43, %v492_v52  ;;  %v494_v54 = vld [vmem:[#allocation2 + $0x18] sm:$0xff] }
  0xd4   :  { %v502_v55 = vadd.f32 %v748_v43, %v494_v54 }
  0xd5   :  { %504 = vst.msk [vmem:[%s970_s3 + $0x8] sm:$0xff] %vm19_vm0, %v500_v53 }
  0xd6   :  { %506 = vst.msk [vmem:[%s970_s3 + $0x18] sm:$0xff] %vm19_vm0, %v502_v55 }

// kernel: _lambda_.31
= control target key start
LH: loop header
LB: loop body
LE: loop exit
PB: predicated region body
PF: predicated region fallthrough
CT: control target
= control target key end

     0   :  { %vm19_vm0 = vcmask 261120   ;;  %s1203_s1 = inlined_call_operand.vmem [shape: bf16[288,32], index: 1, kind: input, shape index: {}]   ;;  %s1204_s0 = inlined_call_operand.vmem [shape: bf16[128,288], index: 0, kind: input, shape index: {}]   ;;  %s1205_s2 = inlined_call_operand.vmem [shape: f32[1,32], index: 2, kind: input, shape index: {}]   ;;  %s1206_s3 = inlined_call_operand.vmem [shape: f32[128,32], index: 3, kind: output, shape index: {}]  }
   0x1   :  { %v818_v0 = vld [vmem:[%s1203_s1 + $0x38] sm:$0xff]  ;;  %v828_v2 = vld [vmem:[%s1203_s1 + $0x88] sm:$0xff]  ;;  %v817_v3 = vld [vmem:[%s1203_s1 + $0x30] sm:$0xff] }
   0x2   :  { %v826_v1 = vld [vmem:[%s1203_s1 + $0x78] sm:$0xff]  ;;  %373 = vmatpush.bf16.msra.mxu0 %v818_v0  ;;  %829 = vmatpush.bf16.msra.mxu3 %v818_v0  ;;  %v825_v4 = vld [vmem:[%s1203_s1 + $0x70] sm:$0xff]  ;;  %v827_v5 = vld [vmem:[%s1203_s1 + $0x80] sm:$0xff] }
   0x3   :  { %422 = vmatpush.bf16.msra.mxu1 %v826_v1  ;;  %477 = vmatpush.bf16.msra.mxu2 %v828_v2  ;;  %v621_v6 = vld [vmem:[%s1204_s0 + $0x8] sm:$0xf]  ;;  %v789_v7 = vld [vmem:[%s1204_s0 + $0x10] sm:$0xf0]  ;;  %v815_v11 = vld [vmem:[%s1203_s1 + $0x20] sm:$0xff] }
   0x4   :  { %v622_v8 = vor.u32 %v789_v7, %v621_v6  ;;  %v816_v9 = vld [vmem:[%s1203_s1 + $0x28] sm:$0xff]  ;;  %v823_v12 = vld [vmem:[%s1203_s1 + $0x60] sm:$0xff]  ;;  %v814_v13 = vld [vmem:[%s1203_s1 + $0x18] sm:$0xff] }
   0x5   :  { %v824_v10 = vld [vmem:[%s1203_s1 + $0x68] sm:$0xff]  ;;  %v822_v14 = vld [vmem:[%s1203_s1 + $0x58] sm:$0xff]  ;;  %v813_v15 = vld [vmem:[%s1203_s1 + $0x10] sm:$0xff] }
   0x6   :  { %374 = vmatpush.bf16.msra.mxu0 %v817_v3  ;;  %830 = vmatpush.bf16.msra.mxu3 %v817_v3  ;;  %v821_v16 = vld [vmem:[%s1203_s1 + $0x50] sm:$0xff]  ;;  %v633_v17 = vld [vmem:[%s1204_s0 + $0x20] sm:$0xf]  ;;  %v792_v18 = vld [vmem:[%s1204_s0 + $0x28] sm:$0xf0] }
   0x7   :  { %423 = vmatpush.bf16.msra.mxu1 %v825_v4  ;;  %478 = vmatpush.bf16.msra.mxu2 %v827_v5  ;;  %v634_v19 = vor.u32 %v792_v18, %v633_v17  ;;  %v812_v20 = vld [vmem:[%s1203_s1 + $0x8] sm:$0xff]  ;;  %v811_v22 = vld [vmem:[%s1203_s1] sm:$0xff]  ;;  %v685_v26 = vld [vmem:[%s1204_s0 + $0x90] sm:$0xf] }
   0x8   :  { %v820_v21 = vld [vmem:[%s1203_s1 + $0x48] sm:$0xff]  ;;  %v819_v23 = vld [vmem:[%s1203_s1 + $0x40] sm:$0xff]  ;;  %v806_v27 = vld [vmem:[%s1204_s0 + $0x98] sm:$0xf0] }
   0x9   :  { %v613_v24 = vld [vmem:[%s1204_s0] sm:$0xf]  ;;  %v788_v25 = vld [vmem:[%s1204_s0 + $0x8] sm:$0xf0]  ;;  %v787_v28 = vld [vmem:[%s1204_s0 + $0x4] sm:$0xf]  ;;  %v686_v31 = vor.u32 %v806_v27, %v685_v26 }
   0xa   :  { %779 = vmatmul.msk.bf16.vlgmr.msra.gmra.mxu2 %vm19_vm0, %v622_v8  ;;  %375 = vmatpush.bf16.msra.mxu0 %v816_v9  ;;  %v615_v29 = vld [vmem:[%s1204_s0 + $0xc] sm:$0xf0]  ;;  %v614_v30 = vor.u32 %v788_v25, %v613_v24  ;;  %v645_v33 = vld [vmem:[%s1204_s0 + $0x38] sm:$0xf]  ;;  %v795_v34 = vld [vmem:[%s1204_s0 + $0x40] sm:$0xf0] }
   0xb   :  { %831 = vmatpush.bf16.msra.mxu3 %v816_v9  ;;  %424 = vmatpush.bf16.msra.mxu1 %v824_v10  ;;  %v618_v32 = vor.u32 %v787_v28, %v615_v29  ;;  %v646_v35 = vor.u32 %v795_v34, %v645_v33  ;;  %v625_v36 = vld [vmem:[%s1204_s0 + $0x18] sm:$0xf]  ;;  %v791_v37 = vld [vmem:[%s1204_s0 + $0x20] sm:$0xf0]  ;;  %v697_v38 = vld [vmem:[%s1204_s0 + $0xa8] sm:$0xf] }
   0xc   :  { %v809_v39 = vld [vmem:[%s1204_s0 + $0xb0] sm:$0xf0]  ;;  %v790_v40 = vld [vmem:[%s1204_s0 + $0x1c] sm:$0xf]  ;;  %v627_v41 = vld [vmem:[%s1204_s0 + $0x24] sm:$0xf0]  ;;  %v626_v42 = vor.u32 %v791_v37, %v625_v36 }
   0xd   :  { %v698_v43 = vor.u32 %v809_v39, %v697_v38  ;;  %v630_v44 = vor.u32 %v790_v40, %v627_v41  ;;  %v657_v45 = vld [vmem:[%s1204_s0 + $0x50] sm:$0xf]  ;;  %v798_v46 = vld [vmem:[%s1204_s0 + $0x58] sm:$0xf0]  ;;  %v793_v50 = vld [vmem:[%s1204_s0 + $0x34] sm:$0xf] }
   0xe   :  { %376 = vmatpush.bf16.msra.mxu0 %v815_v11  ;;  %v658_v47 = vor.u32 %v798_v46, %v657_v45  ;;  %v637_v48 = vld [vmem:[%s1204_s0 + $0x30] sm:$0xf]  ;;  %v794_v49 = vld [vmem:[%s1204_s0 + $0x38] sm:$0xf0]  ;;  %v639_v51 = vld [vmem:[%s1204_s0 + $0x3c] sm:$0xf0] }
   0xf   :  { %832 = vmatpush.bf16.msra.mxu3 %v815_v11  ;;  %425 = vmatpush.bf16.msra.mxu1 %v823_v12  ;;  %v805_v52 = vld [vmem:[%s1204_s0 + $0x94] sm:$0xf]  ;;  %v687_v53 = vld [vmem:[%s1204_s0 + $0x9c] sm:$0xf0]  ;;  %v638_v54 = vor.u32 %v794_v49, %v637_v48  ;;  %v642_v55 = vor.u32 %v793_v50, %v639_v51  ;;  %v669_v57 = vld [vmem:[%s1204_s0 + $0x68] sm:$0xf] }
  0x10   :  { %v690_v56 = vor.u32 %v805_v52, %v687_v53  ;;  %v801_v58 = vld [vmem:[%s1204_s0 + $0x70] sm:$0xf0]  ;;  %v649_v60 = vld [vmem:[%s1204_s0 + $0x48] sm:$0xf]  ;;  %v796_v62 = vld [vmem:[%s1204_s0 + $0x4c] sm:$0xf] }
  0x11   :  { %v670_v59 = vor.u32 %v801_v58, %v669_v57  ;;  %v797_v61 = vld [vmem:[%s1204_s0 + $0x50] sm:$0xf0]  ;;  %v651_v63 = vld [vmem:[%s1204_s0 + $0x54] sm:$0xf0]  ;;  %v808_v0 = vld [vmem:[%s1204_s0 + $0xac] sm:$0xf] }
  0x12   :  { %377 = vmatpush.bf16.msra.mxu0 %v814_v13  ;;  %v650_v2 = vor.u32 %v797_v61, %v649_v60  ;;  %v654_v3 = vor.u32 %v796_v62, %v651_v63  ;;  %v681_v5 = vld [vmem:[%s1204_s0 + $0x80] sm:$0xf]  ;;  %v804_v6 = vld [vmem:[%s1204_s0 + $0x88] sm:$0xf0]  ;;  %v663_v11 = vld [vmem:[%s1204_s0 + $0x6c] sm:$0xf0] }
  0x13   :  { %833 = vmatpush.bf16.msra.mxu3 %v814_v13  ;;  %426 = vmatpush.bf16.msra.mxu1 %v822_v14  ;;  %v682_v7 = vor.u32 %v804_v6, %v681_v5  ;;  %v661_v8 = vld [vmem:[%s1204_s0 + $0x60] sm:$0xf]  ;;  %v800_v9 = vld [vmem:[%s1204_s0 + $0x68] sm:$0xf0]  ;;  %v673_v17 = vld [vmem:[%s1204_s0 + $0x78] sm:$0xf] }
  0x14   :  { %v803_v18 = vld [vmem:[%s1204_s0 + $0x80] sm:$0xf0]  ;;  %v810_v24 = vld [vmem:[%s1204_s0 + $0xb8] sm:$0xf0]  ;;  %v847_v26 = vmov 0.0  }
  0x15   :  { %20 = vst.msk [vmem:[#allocation2] sm:$0xff] %vm19_vm0, %v847_v26  ;;  %v1094_v41 = vld [vmem:[%s1205_s2] ss:$0 sm:$0xff] }
  0x16   :  { %378 = vmatpush.bf16.msra.mxu0 %v813_v15  ;;  %21 = vst.msk [vmem:[#allocation2 + $0x8] sm:$0xff] %vm19_vm0, %v847_v26 }
  0x17   :  { %834 = vmatpush.bf16.msra.mxu3 %v813_v15  ;;  %427 = vmatpush.bf16.msra.mxu1 %v821_v16  ;;  %v807_v15 = vld [vmem:[%s1204_s0 + $0xa0] sm:$0xf0]  ;;  %22 = vst.msk [vmem:[#allocation2 + $0x10] sm:$0xff] %vm19_vm0, %v847_v26 }
  0x18   :  { %23 = vst.msk [vmem:[#allocation2 + $0x18] sm:$0xff] %vm19_vm0, %v847_v26 }
  0x19   :  { %24 = vst.msk [vmem:[#allocation2 + $0x20] sm:$0xff] %vm19_vm0, %v847_v26 }
  0x1a   :  { %780 = vmatmul.msk.bf16.gmra.mxu2 %vm19_vm0, %v634_v19  ;;  %379 = vmatpush.bf16.msra.mxu0 %v812_v20  ;;  %v802_v19 = vld [vmem:[%s1204_s0 + $0x7c] sm:$0xf]  ;;  %25 = vst.msk [vmem:[#allocation2 + $0x28] sm:$0xff] %vm19_vm0, %v847_v26 }
  0x1b   :  { %835 = vmatpush.bf16.msra.mxu3 %v812_v20  ;;  %428 = vmatpush.bf16.msra.mxu1 %v820_v21  ;;  %v675_v20 = vld [vmem:[%s1204_s0 + $0x84] sm:$0xf0]  ;;  %26 = vst.msk [vmem:[#allocation2 + $0x30] sm:$0xff] %vm19_vm0, %v847_v26 }
  0x1c   :  { %27 = vst.msk [vmem:[#allocation2 + $0x38] sm:$0xff] %vm19_vm0, %v847_v26  ;;  %v36_v33 = vld [vmem:[#allocation2] sm:$0xff] }
  0x1d   :  { %28 = vst.msk [vmem:[#allocation2 + $0x40] sm:$0xff] %vm19_vm0, %v847_v26  ;;  %v37_v40 = vld [vmem:[#allocation2 + $0x8] sm:$0xff] }
  0x1e   :  { %380 = vmatpush.bf16.msra.mxu0 %v811_v22  ;;  %29 = vst.msk [vmem:[#allocation2 + $0x48] sm:$0xff] %vm19_vm0, %v847_v26  ;;  %v38_v50 = vld [vmem:[#allocation2 + $0x10] sm:$0xff] }
  0x1f   :  { %836 = vmatpush.bf16.msra.mxu3 %v811_v22  ;;  %429 = vmatpush.bf16.msra.mxu1 %v819_v23  ;;  %v678_v22 = vor.u32 %v802_v19, %v675_v20  ;;  %30 = vst.msk [vmem:[#allocation2 + $0x50] sm:$0xff] %vm19_vm0, %v847_v26 }
  0x20   :  { %31 = vst.msk [vmem:[#allocation2 + $0x58] sm:$0xff] %vm19_vm0, %v847_v26  ;;  %v40_v5 = vld [vmem:[#allocation2 + $0x20] sm:$0xff] }
  0x21   :  { %381 = vmatmul.bf16.vlgmr.msra.gmra.mxu0 %v614_v30  ;;  %32 = vst.msk [vmem:[#allocation2 + $0x60] sm:$0xff] %vm19_vm0, %v847_v26 }
  0x22   :  { %411 = vmatmul.bf16.vlgmr.msra.gmra.mxu3 %v686_v31  ;;  %430 = vmatmul.bf16.vlgmr.msra.gmra.mxu1 %v618_v32  ;;  %33 = vst.msk [vmem:[#allocation2 + $0x68] sm:$0xff] %vm19_vm0, %v847_v26 }
  0x23   :  { %837 = vmatpush.bf16.msrb.mxu3 %v826_v1  ;;  %v699_v1 = vld [vmem:[%s1204_s0 + $0xb4] sm:$0xf0]  ;;  %34 = vst.msk [vmem:[#allocation2 + $0x70] sm:$0xff] %vm19_vm0, %v847_v26 }
  0x24   :  { %35 = vst.msk [vmem:[#allocation2 + $0x78] sm:$0xff] %vm19_vm0, %v847_v26 }
  0x27   :  { %838 = vmatpush.bf16.msrb.mxu3 %v825_v4  ;;  %v702_v4 = vor.u32 %v808_v0, %v699_v1 }
  0x2a   :  { %781 = vmatmul.msk.bf16.gmra.mxu2 %vm19_vm0, %v646_v35 }
  0x2b   :  { %839 = vmatpush.bf16.msrb.mxu3 %v824_v10  ;;  %v799_v10 = vld [vmem:[%s1204_s0 + $0x64] sm:$0xf] }
  0x2c   :  { %v666_v13 = vor.u32 %v799_v10, %v663_v11 }
  0x2f   :  { %840 = vmatpush.bf16.msrb.mxu3 %v823_v12  ;;  %v662_v12 = vor.u32 %v800_v9, %v661_v8 }
  0x31   :  { %386 = vmatmul.bf16.gmra.mxu0 %v626_v42 }
  0x32   :  { %416 = vmatmul.bf16.gmra.mxu3 %v698_v43  ;;  %435 = vmatmul.bf16.gmra.mxu1 %v630_v44 }
  0x33   :  { %841 = vmatpush.bf16.msrb.mxu3 %v822_v14  ;;  %v693_v14 = vld [vmem:[%s1204_s0 + $0x98] sm:$0xf] }
  0x37   :  { %842 = vmatpush.bf16.msrb.mxu3 %v821_v16  ;;  %v694_v16 = vor.u32 %v807_v15, %v693_v14  ;;  %v41_v15 = vld [vmem:[#allocation2 + $0x28] sm:$0xff] }
  0x3a   :  { %782 = vmatmul.msk.bf16.gmra.mxu2 %vm19_vm0, %v658_v47 }
  0x3b   :  { %843 = vmatpush.bf16.msrb.mxu3 %v820_v21  ;;  %v674_v21 = vor.u32 %v803_v18, %v673_v17 }
  0x3f   :  { %844 = vmatpush.bf16.msrb.mxu3 %v819_v23  ;;  %v705_v23 = vld [vmem:[%s1204_s0 + $0xb0] sm:$0xf] }
  0x40   :  { %v706_v25 = vor.u32 %v810_v24, %v705_v23 }
  0x41   :  { %391 = vmatmul.bf16.gmra.mxu0 %v638_v54 }
  0x42   :  { %440 = vmatmul.bf16.gmra.mxu1 %v642_v55  ;;  %460 = vmatmul.bf16.vlgmr.msrb.gmra.mxu3 %v690_v56 }
  0x4a   :  { %783 = vmatmul.msk.bf16.gmra.mxu2 %vm19_vm0, %v670_v59  ;;  %v39_v59 = vld [vmem:[#allocation2 + $0x18] sm:$0xff] }
  0x51   :  { %396 = vmatmul.bf16.gmra.mxu0 %v650_v2 }
  0x52   :  { %445 = vmatmul.bf16.gmra.mxu1 %v654_v3  ;;  %465 = vmatmul.bf16.gmra.mxu3 %v702_v4 }
  0x5a   :  { %784 = vmatmul.msk.bf16.gmra.mxu2 %vm19_vm0, %v682_v7 }
  0x61   :  { %401 = vmatmul.bf16.gmra.mxu0 %v662_v12 }
  0x62   :  { %450 = vmatmul.bf16.gmra.mxu1 %v666_v13 }
  0x6a   :  { %785 = vmatmul.msk.bf16.gmra.mxu2 %vm19_vm0, %v694_v16 }
  0x71   :  { %406 = vmatmul.bf16.gmra.mxu0 %v674_v21 }
  0x72   :  { %455 = vmatmul.bf16.gmra.mxu1 %v678_v22 }
  0x7a   :  { %786 = vmatmul.msk.bf16.gmra.mxu2 %vm19_vm0, %v706_v25  ;;  %v42_v25 = vld [vmem:[#allocation2 + $0x30] sm:$0xff] }
  0x8d   :  { %v480_v27 = vpop.f32.mrf.mxu2 }
  0x95   :  { %v482_v28 = vpop.f32.mrf.mxu2 }
  0x9d   :  { %v485_v29 = vpop.f32.mrf.mxu2 }
  0x9e   :  { %v382_v30 = vpop.f32.mrf.mxu0 }
  0x9f   :  { %v431_v31 = vpop.f32.mrf.mxu1 }
  0xa0   :  { %v432_v32 = vadd.f32 %v431_v31, %v382_v30 }
  0xa2   :  { %v481_v34 = vadd.f32 %v480_v27, %v432_v32 }
  0xa4   :  { %v520_v35 = vadd.f32 %v481_v34, %v36_v33 }
  0xa5   :  { %v487_v36 = vpop.f32.mrf.mxu2  ;;  %v1108_v61 = vpop.f32.mrf.mxu3 }
  0xa6   :  { %536 = vst.msk [vmem:[#allocation2] sm:$0xff] %vm19_vm0, %v520_v35  ;;  %v384_v37 = vpop.f32.mrf.mxu0  ;;  %v43_v35 = vld [vmem:[#allocation2 + $0x38] sm:$0xff] }
  0xa7   :  { %v433_v38 = vpop.f32.mrf.mxu1 }
  0xa8   :  { %v434_v39 = vadd.f32 %v433_v38, %v384_v37 }
  0xaa   :  { %v483_v42 = vadd.f32 %v482_v28, %v434_v39 }
  0xac   :  { %v521_v43 = vadd.f32 %v483_v42, %v37_v40 }
  0xad   :  { %v555_v44 = vld [vmem:[#allocation2] sm:$0xff]  ;;  %v490_v45 = vpop.f32.mrf.mxu2  ;;  %v1116_v8 = vpop.f32.mrf.mxu3 }
  0xae   :  { %v575_v46 = vadd.f32 %v1094_v41, %v555_v44  ;;  %537 = vst.msk [vmem:[#allocation2 + $0x8] sm:$0xff] %vm19_vm0, %v521_v43  ;;  %v387_v47 = vpop.f32.mrf.mxu0 }
  0xaf   :  { %v436_v48 = vpop.f32.mrf.mxu1 }
  0xb0   :  { %591 = vst.msk [vmem:[%s1206_s3] sm:$0xff] %vm19_vm0, %v575_v46  ;;  %v437_v49 = vadd.f32 %v436_v48, %v387_v47 }
  0xb2   :  { %v486_v51 = vadd.f32 %v485_v29, %v437_v49 }
  0xb4   :  { %v522_v52 = vadd.f32 %v486_v51, %v38_v50 }
  0xb5   :  { %v556_v53 = vld [vmem:[#allocation2 + $0x8] sm:$0xff]  ;;  %v492_v54 = vpop.f32.mrf.mxu2  ;;  %v1126_v22 = vpop.f32.mrf.mxu3 }
  0xb6   :  { %v576_v55 = vadd.f32 %v1094_v41, %v556_v53  ;;  %538 = vst.msk [vmem:[#allocation2 + $0x10] sm:$0xff] %vm19_vm0, %v522_v52  ;;  %v389_v56 = vpop.f32.mrf.mxu0 }
  0xb7   :  { %v438_v57 = vpop.f32.mrf.mxu1 }
  0xb8   :  { %592 = vst.msk [vmem:[%s1206_s3 + $0x8] sm:$0xff] %vm19_vm0, %v576_v55  ;;  %v439_v58 = vadd.f32 %v438_v57, %v389_v56  ;;  %v45_v55 = vld [vmem:[#allocation2 + $0x48] sm:$0xff] }
  0xba   :  { %v488_v60 = vadd.f32 %v487_v36, %v439_v58 }
  0xbc   :  { %v523_v62 = vadd.f32 %v488_v60, %v39_v59 }
  0xbd   :  { %v557_v63 = vld [vmem:[#allocation2 + $0x10] sm:$0xff]  ;;  %v495_v0 = vpop.f32.mrf.mxu2  ;;  %v1138_v34 = vpop.f32.mrf.mxu3 }
  0xbe   :  { %v577_v1 = vadd.f32 %v1094_v41, %v557_v63  ;;  %539 = vst.msk [vmem:[#allocation2 + $0x18] sm:$0xff] %vm19_vm0, %v523_v62  ;;  %v392_v2 = vpop.f32.mrf.mxu0  ;;  %v48_v62 = vld [vmem:[#allocation2 + $0x60] sm:$0xff] }
  0xbf   :  { %v441_v3 = vpop.f32.mrf.mxu1 }
  0xc0   :  { %593 = vst.msk [vmem:[%s1206_s3 + $0x10] sm:$0xff] %vm19_vm0, %v577_v1  ;;  %v442_v4 = vadd.f32 %v441_v3, %v392_v2 }
  0xc2   :  { %v491_v6 = vadd.f32 %v490_v45, %v442_v4  ;;  %v44_v45 = vld [vmem:[#allocation2 + $0x40] sm:$0xff] }
  0xc4   :  { %v524_v7 = vadd.f32 %v491_v6, %v40_v5 }
  0xc5   :  { %v558_v9 = vld [vmem:[#allocation2 + $0x18] sm:$0xff]  ;;  %v497_v10 = vpop.f32.mrf.mxu2  ;;  %v461_v47 = vpop.f32.mrf.mxu3 }
  0xc6   :  { %v578_v11 = vadd.f32 %v1094_v41, %v558_v9  ;;  %540 = vst.msk [vmem:[#allocation2 + $0x20] sm:$0xff] %vm19_vm0, %v524_v7  ;;  %v394_v12 = vpop.f32.mrf.mxu0  ;;  %v462_v57 = vadd.f32 %v461_v47, %v1108_v61  ;;  %v46_v61 = vld [vmem:[#allocation2 + $0x50] sm:$0xff] }
  0xc7   :  { %v443_v13 = vpop.f32.mrf.mxu1 }
  0xc8   :  { %594 = vst.msk [vmem:[%s1206_s3 + $0x18] sm:$0xff] %vm19_vm0, %v578_v11  ;;  %v444_v14 = vadd.f32 %v443_v13, %v394_v12  ;;  %v49_v11 = vld [vmem:[#allocation2 + $0x68] sm:$0xff] }
  0xca   :  { %v493_v16 = vadd.f32 %v492_v54, %v444_v14 }
  0xcc   :  { %v525_v17 = vadd.f32 %v493_v16, %v41_v15 }
  0xcd   :  { %v559_v18 = vld [vmem:[#allocation2 + $0x20] sm:$0xff]  ;;  %v500_v19 = vpop.f32.mrf.mxu2  ;;  %v463_v59 = vpop.f32.mrf.mxu3 }
  0xce   :  { %v579_v20 = vadd.f32 %v1094_v41, %v559_v18  ;;  %541 = vst.msk [vmem:[#allocation2 + $0x28] sm:$0xff] %vm19_vm0, %v525_v17  ;;  %v397_v21 = vpop.f32.mrf.mxu0  ;;  %v464_v7 = vadd.f32 %v463_v59, %v1116_v8 }
  0xcf   :  { %v446_v23 = vpop.f32.mrf.mxu1 }
  0xd0   :  { %595 = vst.msk [vmem:[%s1206_s3 + $0x20] sm:$0xff] %vm19_vm0, %v579_v20  ;;  %v447_v24 = vadd.f32 %v446_v23, %v397_v21  ;;  %v47_v20 = vld [vmem:[#allocation2 + $0x58] sm:$0xff] }
  0xd2   :  { %v496_v26 = vadd.f32 %v495_v0, %v447_v24 }
  0xd4   :  { %v526_v27 = vadd.f32 %v496_v26, %v42_v25 }
  0xd5   :  { %v560_v28 = vld [vmem:[#allocation2 + $0x28] sm:$0xff]  ;;  %v502_v29 = vpop.f32.mrf.mxu2  ;;  %v466_v16 = vpop.f32.mrf.mxu3 }
  0xd6   :  { %v580_v30 = vadd.f32 %v1094_v41, %v560_v28  ;;  %542 = vst.msk [vmem:[#allocation2 + $0x30] sm:$0xff] %vm19_vm0, %v526_v27  ;;  %v399_v31 = vpop.f32.mrf.mxu0  ;;  %v467_v24 = vadd.f32 %v466_v16, %v1126_v22  ;;  %v50_v27 = vld [vmem:[#allocation2 + $0x70] sm:$0xff] }
  0xd7   :  { %v448_v32 = vpop.f32.mrf.mxu1 }
  0xd8   :  { %596 = vst.msk [vmem:[%s1206_s3 + $0x28] sm:$0xff] %vm19_vm0, %v580_v30  ;;  %v449_v33 = vadd.f32 %v448_v32, %v399_v31 }
  0xda   :  { %v498_v36 = vadd.f32 %v497_v10, %v449_v33 }
  0xdc   :  { %v527_v37 = vadd.f32 %v498_v36, %v43_v35 }
  0xdd   :  { %v561_v38 = vld [vmem:[#allocation2 + $0x30] sm:$0xff]  ;;  %v505_v39 = vpop.f32.mrf.mxu2  ;;  %v468_v31 = vpop.f32.mrf.mxu3 }
  0xde   :  { %v581_v40 = vadd.f32 %v1094_v41, %v561_v38  ;;  %543 = vst.msk [vmem:[#allocation2 + $0x38] sm:$0xff] %vm19_vm0, %v527_v37  ;;  %v402_v42 = vpop.f32.mrf.mxu0  ;;  %v469_v35 = vadd.f32 %v468_v31, %v1138_v34  ;;  %v51_v37 = vld [vmem:[#allocation2 + $0x78] sm:$0xff] }
  0xdf   :  { %v451_v43 = vpop.f32.mrf.mxu1 }
  0xe0   :  { %597 = vst.msk [vmem:[%s1206_s3 + $0x30] sm:$0xff] %vm19_vm0, %v581_v40  ;;  %v452_v44 = vadd.f32 %v451_v43, %v402_v42 }
  0xe2   :  { %v501_v46 = vadd.f32 %v500_v19, %v452_v44 }
  0xe4   :  { %v528_v48 = vadd.f32 %v501_v46, %v44_v45 }
  0xe5   :  { %v562_v49 = vld [vmem:[#allocation2 + $0x38] sm:$0xff]  ;;  %v507_v50 = vpop.f32.mrf.mxu2 }
  0xe6   :  { %v582_v51 = vadd.f32 %v1094_v41, %v562_v49  ;;  %544 = vst.msk [vmem:[#allocation2 + $0x40] sm:$0xff] %vm19_vm0, %v528_v48  ;;  %v404_v52 = vpop.f32.mrf.mxu0 }
  0xe7   :  { %v453_v53 = vpop.f32.mrf.mxu1 }
  0xe8   :  { %598 = vst.msk [vmem:[%s1206_s3 + $0x38] sm:$0xff] %vm19_vm0, %v582_v51  ;;  %v454_v54 = vadd.f32 %v453_v53, %v404_v52 }
  0xea   :  { %v503_v56 = vadd.f32 %v502_v29, %v454_v54 }
  0xec   :  { %v529_v58 = vadd.f32 %v503_v56, %v45_v55 }
  0xed   :  { %v563_v60 = vld [vmem:[#allocation2 + $0x40] sm:$0xff]  ;;  %v510_v63 = vpop.f32.mrf.mxu2 }
  0xee   :  { %v583_v0 = vadd.f32 %v1094_v41, %v563_v60  ;;  %545 = vst.msk [vmem:[#allocation2 + $0x48] sm:$0xff] %vm19_vm0, %v529_v58  ;;  %v511_v1 = vadd.f32 %v510_v63, %v462_v57  ;;  %v407_v2 = vpop.f32.mrf.mxu0 }
  0xef   :  { %v456_v3 = vpop.f32.mrf.mxu1 }
  0xf0   :  { %599 = vst.msk [vmem:[%s1206_s3 + $0x40] sm:$0xff] %vm19_vm0, %v583_v0  ;;  %v532_v4 = vadd.f32 %v511_v1, %v48_v62  ;;  %v457_v5 = vadd.f32 %v456_v3, %v407_v2 }
  0xf2   :  { %548 = vst.msk [vmem:[#allocation2 + $0x60] sm:$0xff] %vm19_vm0, %v532_v4  ;;  %v506_v6 = vadd.f32 %v505_v39, %v457_v5 }
  0xf4   :  { %v530_v9 = vadd.f32 %v506_v6, %v46_v61 }
  0xf5   :  { %v564_v10 = vld [vmem:[#allocation2 + $0x48] sm:$0xff]  ;;  %v512_v12 = vpop.f32.mrf.mxu2 }
  0xf6   :  { %v584_v13 = vadd.f32 %v1094_v41, %v564_v10  ;;  %546 = vst.msk [vmem:[#allocation2 + $0x50] sm:$0xff] %vm19_vm0, %v530_v9  ;;  %v513_v14 = vadd.f32 %v512_v12, %v464_v7  ;;  %v409_v15 = vpop.f32.mrf.mxu0 }
  0xf7   :  { %v458_v17 = vpop.f32.mrf.mxu1 }
  0xf8   :  { %600 = vst.msk [vmem:[%s1206_s3 + $0x48] sm:$0xff] %vm19_vm0, %v584_v13  ;;  %v533_v18 = vadd.f32 %v513_v14, %v49_v11  ;;  %v459_v19 = vadd.f32 %v458_v17, %v409_v15 }
  0xf9   :  { %v567_v8 = vld [vmem:[#allocation2 + $0x60] sm:$0xff] }
  0xfa   :  { %v587_v21 = vadd.f32 %v1094_v41, %v567_v8  ;;  %549 = vst.msk [vmem:[#allocation2 + $0x68] sm:$0xff] %vm19_vm0, %v533_v18  ;;  %v508_v23 = vadd.f32 %v507_v50, %v459_v19 }
  0xfc   :  { %603 = vst.msk [vmem:[%s1206_s3 + $0x60] sm:$0xff] %vm19_vm0, %v587_v21  ;;  %v531_v25 = vadd.f32 %v508_v23, %v47_v20 }
  0xfd   :  { %v565_v26 = vld [vmem:[#allocation2 + $0x50] sm:$0xff]  ;;  %v515_v28 = vpop.f32.mrf.mxu2 }
  0xfe   :  { %v585_v29 = vadd.f32 %v1094_v41, %v565_v26  ;;  %547 = vst.msk [vmem:[#allocation2 + $0x58] sm:$0xff] %vm19_vm0, %v531_v25  ;;  %v516_v30 = vadd.f32 %v515_v28, %v467_v24 }
 0x100   :  { %601 = vst.msk [vmem:[%s1206_s3 + $0x50] sm:$0xff] %vm19_vm0, %v585_v29  ;;  %v534_v22 = vadd.f32 %v516_v30, %v50_v27 }
 0x101   :  { %v568_v32 = vld [vmem:[#allocation2 + $0x68] sm:$0xff] }
 0x102   :  { %v588_v33 = vadd.f32 %v1094_v41, %v568_v32  ;;  %550 = vst.msk [vmem:[#allocation2 + $0x70] sm:$0xff] %vm19_vm0, %v534_v22 }
 0x104   :  { %604 = vst.msk [vmem:[%s1206_s3 + $0x68] sm:$0xff] %vm19_vm0, %v588_v33 }
 0x105   :  { %v566_v36 = vld [vmem:[#allocation2 + $0x58] sm:$0xff]  ;;  %v517_v38 = vpop.f32.mrf.mxu2 }
 0x106   :  { %v586_v39 = vadd.f32 %v1094_v41, %v566_v36  ;;  %v518_v40 = vadd.f32 %v517_v38, %v469_v35 }
 0x108   :  { %602 = vst.msk [vmem:[%s1206_s3 + $0x58] sm:$0xff] %vm19_vm0, %v586_v39  ;;  %v535_v42 = vadd.f32 %v518_v40, %v51_v37 }
 0x109   :  { %v569_v43 = vld [vmem:[#allocation2 + $0x70] sm:$0xff] }
 0x10a   :  { %v589_v34 = vadd.f32 %v1094_v41, %v569_v43  ;;  %551 = vst.msk [vmem:[#allocation2 + $0x78] sm:$0xff] %vm19_vm0, %v535_v42 }
 0x10c   :  { %605 = vst.msk [vmem:[%s1206_s3 + $0x70] sm:$0xff] %vm19_vm0, %v589_v34 }
 0x111   :  { %v570_v44 = vld [vmem:[#allocation2 + $0x78] sm:$0xff] }
 0x112   :  { %v590_v45 = vadd.f32 %v1094_v41, %v570_v44 }
 0x114   :  { %606 = vst.msk [vmem:[%s1206_s3 + $0x78] sm:$0xff] %vm19_vm0, %v590_v45 }

// kernel: _lambda_.32
= control target key start
LH: loop header
LB: loop body
LE: loop exit
PB: predicated region body
PF: predicated region fallthrough
CT: control target
= control target key end

     0   :  { %vm214_vm0 = vcmask 64512   ;;  %s894_s0 = inlined_call_operand.vmem [shape: f32[512,8], index: 0, kind: input, shape index: {}]   ;;  %s895_s1 = inlined_call_operand.vmem [shape: f32[1,8], index: 1, kind: input, shape index: {}]   ;;  %s896_s2 = inlined_call_operand.vmem [shape: f32[1,8], index: 2, kind: input, shape index: {}]   ;;  %s897_s3 = inlined_call_operand.vmem [shape: f32[512,8], index: 3, kind: output, shape index: {}]  }
   0x1   :  { %v14_v0 = vld [vmem:[%s894_s0] sm:$0xff]  ;;  %v15_v3 = vld [vmem:[%s894_s0 + $0x8] sm:$0xff]  ;;  %v16_v6 = vld [vmem:[%s894_s0 + $0x10] sm:$0xff] }
   0x2   :  { %v311_v1 = vld [vmem:[%s895_s1] ss:$0 sm:$0xff]  ;;  %v17_v7 = vld [vmem:[%s894_s0 + $0x18] sm:$0xff]  ;;  %v19_v12 = vld [vmem:[%s894_s0 + $0x28] sm:$0xff] }
   0x3   :  { %v316_v2 = vld [vmem:[%s896_s2] ss:$0 sm:$0xff]  ;;  %v82_v4 = vmul.f32 %v311_v1, %v14_v0  ;;  %v83_v5 = vmul.f32 %v311_v1, %v15_v3  ;;  %v84_v9 = vmul.f32 %v311_v1, %v16_v6  ;;  %v85_v10 = vmul.f32 %v311_v1, %v17_v7  ;;  %v20_v13 = vld [vmem:[%s894_s0 + $0x30] sm:$0xff]  ;;  %v21_v14 = vld [vmem:[%s894_s0 + $0x38] sm:$0xff] }
   0x4   :  { %v18_v8 = vld [vmem:[%s894_s0 + $0x20] sm:$0xff]  ;;  %v87_v17 = vmul.f32 %v311_v1, %v19_v12  ;;  %v88_v18 = vmul.f32 %v311_v1, %v20_v13  ;;  %v23_v20 = vld [vmem:[%s894_s0 + $0x48] sm:$0xff]  ;;  %v89_v23 = vmul.f32 %v311_v1, %v21_v14  ;;  %v24_v24 = vld [vmem:[%s894_s0 + $0x50] sm:$0xff] }
   0x5   :  { %v86_v11 = vmul.f32 %v311_v1, %v18_v8  ;;  %v150_v15 = vadd.f32 %v316_v2, %v82_v4  ;;  %v151_v16 = vadd.f32 %v316_v2, %v83_v5  ;;  %v22_v19 = vld [vmem:[%s894_s0 + $0x40] sm:$0xff]  ;;  %v152_v21 = vadd.f32 %v316_v2, %v84_v9  ;;  %v25_v27 = vld [vmem:[%s894_s0 + $0x58] sm:$0xff]  ;;  %v27_v33 = vld [vmem:[%s894_s0 + $0x68] sm:$0xff] }
   0x6   :  { %v153_v22 = vadd.f32 %v316_v2, %v85_v10  ;;  %v90_v26 = vmul.f32 %v311_v1, %v22_v19  ;;  %v155_v28 = vadd.f32 %v316_v2, %v87_v17  ;;  %v91_v29 = vmul.f32 %v311_v1, %v23_v20  ;;  %v26_v30 = vld [vmem:[%s894_s0 + $0x60] sm:$0xff]  ;;  %v28_v36 = vld [vmem:[%s894_s0 + $0x70] sm:$0xff]  ;;  %v29_v39 = vld [vmem:[%s894_s0 + $0x78] sm:$0xff] }
   0x7   :  { %215 = vst.msk [vmem:[%s897_s3] sm:$0xff] %vm214_vm0, %v150_v15  ;;  %v154_v25 = vadd.f32 %v316_v2, %v86_v11  ;;  %v156_v31 = vadd.f32 %v316_v2, %v88_v18  ;;  %v92_v32 = vmul.f32 %v311_v1, %v24_v24  ;;  %v157_v34 = vadd.f32 %v316_v2, %v89_v23  ;;  %v30_v42 = vld [vmem:[%s894_s0 + $0x80] sm:$0xff]  ;;  %v31_v45 = vld [vmem:[%s894_s0 + $0x88] sm:$0xff]  ;;  %v32_v48 = vld [vmem:[%s894_s0 + $0x90] sm:$0xff] }
   0x8   :  { %216 = vst.msk [vmem:[%s897_s3 + $0x8] sm:$0xff] %vm214_vm0, %v151_v16  ;;  %v93_v35 = vmul.f32 %v311_v1, %v25_v27  ;;  %v158_v37 = vadd.f32 %v316_v2, %v90_v26  ;;  %v94_v38 = vmul.f32 %v311_v1, %v26_v30  ;;  %v159_v40 = vadd.f32 %v316_v2, %v91_v29  ;;  %v33_v51 = vld [vmem:[%s894_s0 + $0x98] sm:$0xff]  ;;  %v34_v54 = vld [vmem:[%s894_s0 + $0xa0] sm:$0xff]  ;;  %v35_v57 = vld [vmem:[%s894_s0 + $0xa8] sm:$0xff] }
   0x9   :  { %217 = vst.msk [vmem:[%s897_s3 + $0x10] sm:$0xff] %vm214_vm0, %v152_v21  ;;  %v95_v41 = vmul.f32 %v311_v1, %v27_v33  ;;  %v160_v43 = vadd.f32 %v316_v2, %v92_v32  ;;  %v96_v44 = vmul.f32 %v311_v1, %v28_v36  ;;  %v97_v47 = vmul.f32 %v311_v1, %v29_v39  ;;  %v36_v60 = vld [vmem:[%s894_s0 + $0xb0] sm:$0xff]  ;;  %v37_v63 = vld [vmem:[%s894_s0 + $0xb8] sm:$0xff]  ;;  %v38_v4 = vld [vmem:[%s894_s0 + $0xc0] sm:$0xff] }
   0xa   :  { %218 = vst.msk [vmem:[%s897_s3 + $0x18] sm:$0xff] %vm214_vm0, %v153_v22  ;;  %v161_v46 = vadd.f32 %v316_v2, %v93_v35  ;;  %v162_v49 = vadd.f32 %v316_v2, %v94_v38  ;;  %v98_v50 = vmul.f32 %v311_v1, %v30_v42  ;;  %v99_v53 = vmul.f32 %v311_v1, %v31_v45  ;;  %v39_v7 = vld [vmem:[%s894_s0 + $0xc8] sm:$0xff]  ;;  %v40_v10 = vld [vmem:[%s894_s0 + $0xd0] sm:$0xff]  ;;  %v41_v13 = vld [vmem:[%s894_s0 + $0xd8] sm:$0xff] }
   0xb   :  { %219 = vst.msk [vmem:[%s897_s3 + $0x20] sm:$0xff] %vm214_vm0, %v154_v25  ;;  %v163_v52 = vadd.f32 %v316_v2, %v95_v41  ;;  %v164_v55 = vadd.f32 %v316_v2, %v96_v44  ;;  %v100_v56 = vmul.f32 %v311_v1, %v32_v48  ;;  %v165_v58 = vadd.f32 %v316_v2, %v97_v47  ;;  %v42_v16 = vld [vmem:[%s894_s0 + $0xe0] sm:$0xff]  ;;  %v43_v19 = vld [vmem:[%s894_s0 + $0xe8] sm:$0xff]  ;;  %v44_v22 = vld [vmem:[%s894_s0 + $0xf0] sm:$0xff] }
   0xc   :  { %220 = vst.msk [vmem:[%s897_s3 + $0x28] sm:$0xff] %vm214_vm0, %v155_v28  ;;  %v101_v59 = vmul.f32 %v311_v1, %v33_v51  ;;  %v166_v61 = vadd.f32 %v316_v2, %v98_v50  ;;  %v102_v62 = vmul.f32 %v311_v1, %v34_v54  ;;  %v167_v0 = vadd.f32 %v316_v2, %v99_v53  ;;  %v45_v25 = vld [vmem:[%s894_s0 + $0xf8] sm:$0xff]  ;;  %v46_v28 = vld [vmem:[%s894_s0 + $0x100] sm:$0xff]  ;;  %v51_v44 = vld [vmem:[%s894_s0 + $0x128] sm:$0xff] }
   0xd   :  { %221 = vst.msk [vmem:[%s897_s3 + $0x30] sm:$0xff] %vm214_vm0, %v156_v31  ;;  %v103_v3 = vmul.f32 %v311_v1, %v35_v57  ;;  %v168_v5 = vadd.f32 %v316_v2, %v100_v56  ;;  %v104_v6 = vmul.f32 %v311_v1, %v36_v60  ;;  %v105_v9 = vmul.f32 %v311_v1, %v37_v63  ;;  %v47_v31 = vld [vmem:[%s894_s0 + $0x108] sm:$0xff]  ;;  %v77_v41 = vld [vmem:[%s894_s0 + $0x1f8] sm:$0xff]  ;;  %v52_v47 = vld [vmem:[%s894_s0 + $0x130] sm:$0xff] }
   0xe   :  { %222 = vst.msk [vmem:[%s897_s3 + $0x38] sm:$0xff] %vm214_vm0, %v157_v34  ;;  %v169_v8 = vadd.f32 %v316_v2, %v101_v59  ;;  %v170_v11 = vadd.f32 %v316_v2, %v102_v62  ;;  %v106_v12 = vmul.f32 %v311_v1, %v38_v4  ;;  %v107_v15 = vmul.f32 %v311_v1, %v39_v7  ;;  %v48_v34 = vld [vmem:[%s894_s0 + $0x110] sm:$0xff]  ;;  %v53_v51 = vld [vmem:[%s894_s0 + $0x138] sm:$0xff]  ;;  %v54_v54 = vld [vmem:[%s894_s0 + $0x140] sm:$0xff] }
   0xf   :  { %223 = vst.msk [vmem:[%s897_s3 + $0x40] sm:$0xff] %vm214_vm0, %v158_v37  ;;  %v171_v14 = vadd.f32 %v316_v2, %v103_v3  ;;  %v172_v17 = vadd.f32 %v316_v2, %v104_v6  ;;  %v108_v18 = vmul.f32 %v311_v1, %v40_v10  ;;  %v173_v20 = vadd.f32 %v316_v2, %v105_v9  ;;  %v49_v37 = vld [vmem:[%s894_s0 + $0x118] sm:$0xff] }
  0x10   :  { %224 = vst.msk [vmem:[%s897_s3 + $0x48] sm:$0xff] %vm214_vm0, %v159_v40  ;;  %v109_v21 = vmul.f32 %v311_v1, %v41_v13  ;;  %v174_v23 = vadd.f32 %v316_v2, %v106_v12  ;;  %v110_v24 = vmul.f32 %v311_v1, %v42_v16  ;;  %v175_v26 = vadd.f32 %v316_v2, %v107_v15  ;;  %v50_v40 = vld [vmem:[%s894_s0 + $0x120] sm:$0xff] }
  0x11   :  { %225 = vst.msk [vmem:[%s897_s3 + $0x50] sm:$0xff] %vm214_vm0, %v160_v43  ;;  %v111_v27 = vmul.f32 %v311_v1, %v43_v19  ;;  %v176_v29 = vadd.f32 %v316_v2, %v108_v18  ;;  %v112_v30 = vmul.f32 %v311_v1, %v44_v22  ;;  %v113_v33 = vmul.f32 %v311_v1, %v45_v25 }
  0x12   :  { %226 = vst.msk [vmem:[%s897_s3 + $0x58] sm:$0xff] %vm214_vm0, %v161_v46  ;;  %v177_v32 = vadd.f32 %v316_v2, %v109_v21  ;;  %v178_v35 = vadd.f32 %v316_v2, %v110_v24  ;;  %v114_v36 = vmul.f32 %v311_v1, %v46_v28  ;;  %v115_v39 = vmul.f32 %v311_v1, %v47_v31 }
  0x13   :  { %227 = vst.msk [vmem:[%s897_s3 + $0x60] sm:$0xff] %vm214_vm0, %v162_v49  ;;  %v179_v38 = vadd.f32 %v316_v2, %v111_v27  ;;  %v180_v42 = vadd.f32 %v316_v2, %v112_v30  ;;  %v116_v43 = vmul.f32 %v311_v1, %v48_v34  ;;  %v181_v45 = vadd.f32 %v316_v2, %v113_v33 }
  0x14   :  { %228 = vst.msk [vmem:[%s897_s3 + $0x68] sm:$0xff] %vm214_vm0, %v163_v52  ;;  %v117_v46 = vmul.f32 %v311_v1, %v49_v37  ;;  %v145_v48 = vmul.f32 %v311_v1, %v77_v41  ;;  %v182_v49 = vadd.f32 %v316_v2, %v114_v36  ;;  %v118_v50 = vmul.f32 %v311_v1, %v50_v40  ;;  %v70_v41 = vld [vmem:[%s894_s0 + $0x1c0] sm:$0xff] }
  0x15   :  { %229 = vst.msk [vmem:[%s897_s3 + $0x70] sm:$0xff] %vm214_vm0, %v164_v55  ;;  %v183_v52 = vadd.f32 %v316_v2, %v115_v39  ;;  %v119_v53 = vmul.f32 %v311_v1, %v51_v44  ;;  %v184_v56 = vadd.f32 %v316_v2, %v116_v43  ;;  %v120_v57 = vmul.f32 %v311_v1, %v52_v47  ;;  %v71_v44 = vld [vmem:[%s894_s0 + $0x1c8] sm:$0xff]  ;;  %v72_v47 = vld [vmem:[%s894_s0 + $0x1d0] sm:$0xff] }
  0x16   :  { %230 = vst.msk [vmem:[%s897_s3 + $0x78] sm:$0xff] %vm214_vm0, %v165_v58  ;;  %v635_v55 = vadd.f32 %v316_v2, %v145_v48  ;;  %v55_v58 = vld [vmem:[%s894_s0 + $0x148] sm:$0xff]  ;;  %v185_v59 = vadd.f32 %v316_v2, %v117_v46  ;;  %v121_v60 = vmul.f32 %v311_v1, %v53_v51  ;;  %v186_v62 = vadd.f32 %v316_v2, %v118_v50  ;;  %v73_v50 = vld [vmem:[%s894_s0 + $0x1d8] sm:$0xff] }
  0x17   :  { %231 = vst.msk [vmem:[%s897_s3 + $0x80] sm:$0xff] %vm214_vm0, %v166_v61  ;;  %v56_v61 = vld [vmem:[%s894_s0 + $0x150] sm:$0xff]  ;;  %v122_v63 = vmul.f32 %v311_v1, %v54_v54  ;;  %v187_v3 = vadd.f32 %v316_v2, %v119_v53  ;;  %v123_v4 = vmul.f32 %v311_v1, %v55_v58  ;;  %v188_v6 = vadd.f32 %v316_v2, %v120_v57  ;;  %v74_v53 = vld [vmem:[%s894_s0 + $0x1e0] sm:$0xff]  ;;  %v75_v57 = vld [vmem:[%s894_s0 + $0x1e8] sm:$0xff] }
  0x18   :  { %232 = vst.msk [vmem:[%s897_s3 + $0x88] sm:$0xff] %vm214_vm0, %v167_v0  ;;  %v57_v0 = vld [vmem:[%s894_s0 + $0x158] sm:$0xff]  ;;  %v124_v7 = vmul.f32 %v311_v1, %v56_v61  ;;  %v189_v9 = vadd.f32 %v316_v2, %v121_v60  ;;  %v76_v60 = vld [vmem:[%s894_s0 + $0x1f0] sm:$0xff] }
  0x19   :  { %233 = vst.msk [vmem:[%s897_s3 + $0x90] sm:$0xff] %vm214_vm0, %v168_v5  ;;  %v58_v5 = vld [vmem:[%s894_s0 + $0x160] sm:$0xff]  ;;  %v125_v10 = vmul.f32 %v311_v1, %v57_v0  ;;  %v190_v12 = vadd.f32 %v316_v2, %v122_v63  ;;  %v191_v15 = vadd.f32 %v316_v2, %v123_v4  ;;  %v143_v0 = vmul.f32 %v311_v1, %v75_v57 }
  0x1a   :  { %234 = vst.msk [vmem:[%s897_s3 + $0x98] sm:$0xff] %vm214_vm0, %v169_v8  ;;  %v59_v8 = vld [vmem:[%s894_s0 + $0x168] sm:$0xff]  ;;  %v126_v13 = vmul.f32 %v311_v1, %v58_v5  ;;  %v192_v18 = vadd.f32 %v316_v2, %v124_v7  ;;  %v144_v4 = vmul.f32 %v311_v1, %v76_v60 }
  0x1b   :  { %235 = vst.msk [vmem:[%s897_s3 + $0xa0] sm:$0xff] %vm214_vm0, %v170_v11  ;;  %v60_v11 = vld [vmem:[%s894_s0 + $0x170] sm:$0xff]  ;;  %v127_v16 = vmul.f32 %v311_v1, %v59_v8  ;;  %v193_v21 = vadd.f32 %v316_v2, %v125_v10 }
  0x1c   :  { %236 = vst.msk [vmem:[%s897_s3 + $0xa8] sm:$0xff] %vm214_vm0, %v171_v14  ;;  %v61_v14 = vld [vmem:[%s894_s0 + $0x178] sm:$0xff]  ;;  %v128_v19 = vmul.f32 %v311_v1, %v60_v11  ;;  %v194_v24 = vadd.f32 %v316_v2, %v126_v13  ;;  %v212_v7 = vadd.f32 %v316_v2, %v144_v4 }
  0x1d   :  { %237 = vst.msk [vmem:[%s897_s3 + $0xb0] sm:$0xff] %vm214_vm0, %v172_v17  ;;  %v62_v17 = vld [vmem:[%s894_s0 + $0x180] sm:$0xff]  ;;  %v129_v22 = vmul.f32 %v311_v1, %v61_v14  ;;  %v195_v27 = vadd.f32 %v316_v2, %v127_v16 }
  0x1e   :  { %238 = vst.msk [vmem:[%s897_s3 + $0xb8] sm:$0xff] %vm214_vm0, %v173_v20  ;;  %v63_v20 = vld [vmem:[%s894_s0 + $0x188] sm:$0xff]  ;;  %v130_v25 = vmul.f32 %v311_v1, %v62_v17  ;;  %v196_v30 = vadd.f32 %v316_v2, %v128_v19 }
  0x1f   :  { %239 = vst.msk [vmem:[%s897_s3 + $0xc0] sm:$0xff] %vm214_vm0, %v174_v23  ;;  %v64_v23 = vld [vmem:[%s894_s0 + $0x190] sm:$0xff]  ;;  %v131_v28 = vmul.f32 %v311_v1, %v63_v20  ;;  %v197_v33 = vadd.f32 %v316_v2, %v129_v22 }
  0x20   :  { %240 = vst.msk [vmem:[%s897_s3 + $0xc8] sm:$0xff] %vm214_vm0, %v175_v26  ;;  %v65_v26 = vld [vmem:[%s894_s0 + $0x198] sm:$0xff]  ;;  %v132_v31 = vmul.f32 %v311_v1, %v64_v23  ;;  %v198_v36 = vadd.f32 %v316_v2, %v130_v25 }
  0x21   :  { %241 = vst.msk [vmem:[%s897_s3 + $0xd0] sm:$0xff] %vm214_vm0, %v176_v29  ;;  %v66_v29 = vld [vmem:[%s894_s0 + $0x1a0] sm:$0xff]  ;;  %v133_v34 = vmul.f32 %v311_v1, %v65_v26  ;;  %v199_v39 = vadd.f32 %v316_v2, %v131_v28 }
  0x22   :  { %242 = vst.msk [vmem:[%s897_s3 + $0xd8] sm:$0xff] %vm214_vm0, %v177_v32  ;;  %v67_v32 = vld [vmem:[%s894_s0 + $0x1a8] sm:$0xff]  ;;  %v134_v37 = vmul.f32 %v311_v1, %v66_v29 }
  0x23   :  { %243 = vst.msk [vmem:[%s897_s3 + $0xe0] sm:$0xff] %vm214_vm0, %v178_v35  ;;  %v68_v35 = vld [vmem:[%s894_s0 + $0x1b0] sm:$0xff]  ;;  %v135_v40 = vmul.f32 %v311_v1, %v67_v32 }
  0x24   :  { %244 = vst.msk [vmem:[%s897_s3 + $0xe8] sm:$0xff] %vm214_vm0, %v179_v38  ;;  %v69_v38 = vld [vmem:[%s894_s0 + $0x1b8] sm:$0xff]  ;;  %v136_v43 = vmul.f32 %v311_v1, %v68_v35  ;;  %v202_v48 = vadd.f32 %v316_v2, %v134_v37 }
  0x25   :  { %245 = vst.msk [vmem:[%s897_s3 + $0xf0] sm:$0xff] %vm214_vm0, %v180_v42  ;;  %v200_v42 = vadd.f32 %v316_v2, %v132_v31  ;;  %v137_v46 = vmul.f32 %v311_v1, %v69_v38  ;;  %v203_v51 = vadd.f32 %v316_v2, %v135_v40 }
  0x26   :  { %246 = vst.msk [vmem:[%s897_s3 + $0xf8] sm:$0xff] %vm214_vm0, %v181_v45  ;;  %v201_v45 = vadd.f32 %v316_v2, %v133_v34  ;;  %v204_v54 = vadd.f32 %v316_v2, %v136_v43 }
  0x27   :  { %247 = vst.msk [vmem:[%s897_s3 + $0x100] sm:$0xff] %vm214_vm0, %v182_v49  ;;  %v138_v49 = vmul.f32 %v311_v1, %v70_v41  ;;  %v205_v58 = vadd.f32 %v316_v2, %v137_v46 }
  0x28   :  { %248 = vst.msk [vmem:[%s897_s3 + $0x108] sm:$0xff] %vm214_vm0, %v183_v52  ;;  %v139_v52 = vmul.f32 %v311_v1, %v71_v44 }
  0x29   :  { %249 = vst.msk [vmem:[%s897_s3 + $0x110] sm:$0xff] %vm214_vm0, %v184_v56  ;;  %v140_v56 = vmul.f32 %v311_v1, %v72_v47  ;;  %v206_v61 = vadd.f32 %v316_v2, %v138_v49 }
  0x2a   :  { %250 = vst.msk [vmem:[%s897_s3 + $0x118] sm:$0xff] %vm214_vm0, %v185_v59  ;;  %v141_v59 = vmul.f32 %v311_v1, %v73_v50  ;;  %v207_v63 = vadd.f32 %v316_v2, %v139_v52 }
  0x2b   :  { %251 = vst.msk [vmem:[%s897_s3 + $0x120] sm:$0xff] %vm214_vm0, %v186_v62  ;;  %v142_v62 = vmul.f32 %v311_v1, %v74_v53  ;;  %v211_v1 = vadd.f32 %v316_v2, %v143_v0 }
  0x2c   :  { %252 = vst.msk [vmem:[%s897_s3 + $0x128] sm:$0xff] %vm214_vm0, %v187_v3  ;;  %v208_v3 = vadd.f32 %v316_v2, %v140_v56  ;;  %v209_v5 = vadd.f32 %v316_v2, %v141_v59 }
  0x2d   :  { %253 = vst.msk [vmem:[%s897_s3 + $0x130] sm:$0xff] %vm214_vm0, %v188_v6  ;;  %v210_v6 = vadd.f32 %v316_v2, %v142_v62 }
  0x2e   :  { %254 = vst.msk [vmem:[%s897_s3 + $0x138] sm:$0xff] %vm214_vm0, %v189_v9 }
  0x2f   :  { %255 = vst.msk [vmem:[%s897_s3 + $0x140] sm:$0xff] %vm214_vm0, %v190_v12 }
  0x30   :  { %256 = vst.msk [vmem:[%s897_s3 + $0x148] sm:$0xff] %vm214_vm0, %v191_v15 }
  0x31   :  { %257 = vst.msk [vmem:[%s897_s3 + $0x150] sm:$0xff] %vm214_vm0, %v192_v18 }
  0x32   :  { %258 = vst.msk [vmem:[%s897_s3 + $0x158] sm:$0xff] %vm214_vm0, %v193_v21 }
  0x33   :  { %259 = vst.msk [vmem:[%s897_s3 + $0x160] sm:$0xff] %vm214_vm0, %v194_v24 }
  0x34   :  { %260 = vst.msk [vmem:[%s897_s3 + $0x168] sm:$0xff] %vm214_vm0, %v195_v27 }
  0x35   :  { %261 = vst.msk [vmem:[%s897_s3 + $0x170] sm:$0xff] %vm214_vm0, %v196_v30 }
  0x36   :  { %262 = vst.msk [vmem:[%s897_s3 + $0x178] sm:$0xff] %vm214_vm0, %v197_v33 }
  0x37   :  { %263 = vst.msk [vmem:[%s897_s3 + $0x180] sm:$0xff] %vm214_vm0, %v198_v36 }
  0x38   :  { %264 = vst.msk [vmem:[%s897_s3 + $0x188] sm:$0xff] %vm214_vm0, %v199_v39 }
  0x39   :  { %265 = vst.msk [vmem:[%s897_s3 + $0x190] sm:$0xff] %vm214_vm0, %v200_v42 }
  0x3a   :  { %266 = vst.msk [vmem:[%s897_s3 + $0x198] sm:$0xff] %vm214_vm0, %v201_v45 }
  0x3b   :  { %267 = vst.msk [vmem:[%s897_s3 + $0x1a0] sm:$0xff] %vm214_vm0, %v202_v48 }
  0x3c   :  { %268 = vst.msk [vmem:[%s897_s3 + $0x1a8] sm:$0xff] %vm214_vm0, %v203_v51 }
  0x3d   :  { %269 = vst.msk [vmem:[%s897_s3 + $0x1b0] sm:$0xff] %vm214_vm0, %v204_v54 }
  0x3e   :  { %270 = vst.msk [vmem:[%s897_s3 + $0x1b8] sm:$0xff] %vm214_vm0, %v205_v58 }
  0x3f   :  { %271 = vst.msk [vmem:[%s897_s3 + $0x1c0] sm:$0xff] %vm214_vm0, %v206_v61 }
  0x40   :  { %272 = vst.msk [vmem:[%s897_s3 + $0x1c8] sm:$0xff] %vm214_vm0, %v207_v63 }
  0x41   :  { %273 = vst.msk [vmem:[%s897_s3 + $0x1d0] sm:$0xff] %vm214_vm0, %v208_v3 }
  0x42   :  { %274 = vst.msk [vmem:[%s897_s3 + $0x1d8] sm:$0xff] %vm214_vm0, %v209_v5 }
  0x43   :  { %275 = vst.msk [vmem:[%s897_s3 + $0x1e0] sm:$0xff] %vm214_vm0, %v210_v6 }
  0x44   :  { %276 = vst.msk [vmem:[%s897_s3 + $0x1e8] sm:$0xff] %vm214_vm0, %v211_v1 }
  0x45   :  { %277 = vst.msk [vmem:[%s897_s3 + $0x1f0] sm:$0xff] %vm214_vm0, %v212_v7 }
  0x46   :  { %278 = vst.msk [vmem:[%s897_s3 + $0x1f8] sm:$0xff] %vm214_vm0, %v635_v55 }

// kernel: _lambda_.33
= control target key start
LH: loop header
LB: loop body
LE: loop exit
PB: predicated region body
PF: predicated region fallthrough
CT: control target
= control target key end

     0   :  { %s1506_s12 = smov 0   ;;  %s1508_s13 = smov 0   ;;  %s1852_s0 = inlined_call_operand.vmem [shape: bf16[512,144], index: 0, kind: input, shape index: {}]   ;;  %s1853_s1 = inlined_call_operand.vmem [shape: bf16[144,12], index: 1, kind: input, shape index: {}]   ;;  %s1854_s2 = inlined_call_operand.vmem [shape: f32[1,12], index: 2, kind: input, shape index: {}]   ;;  %s1855_s3 = inlined_call_operand.vmem [shape: f32[512,12], index: 3, kind: output, shape index: {}]  }
   0x1   :  { %s1510_s14 = smov 0  }
   0x2 LB: > { %s32_s15 = sadd.s32 1, %s1479_s13  ;;  %p1132_p0 = scmp.ge.s32.totalorder %s1483_s14, 1  ;;  %s1483_s14 = sphi %s1510_s14, %s13_s14   ;;  %s1479_s13 = sphi %s1508_s13, %s1857_s13   ;;  %s1475_s12 = sphi %s1506_s12, %s1856_s12  }
   0x3   : > { %p34_p1 = scmp.ge.s32.totalorder %s32_s15, 2  ;;  %p191_p2 = scmp.lt.s32.totalorder %s1483_s14, 3 }
   0x5   : > { %s1859_s15 = smov (%p34_p1, %s32_s15), 0  ;;  %p192_p3 = pnand %p1132_p0, %p191_p2 }
   0x6   : > { %s1133_s20 = sshll.u32 (!%p192_p3), %s1475_s12, 5 }
   0x7   : > { %195 = sbr.rel (%p192_p3) target bundleno = 318 (0x13e), region = 32  ;;  %p236_p4 = scmp.lt.s32.totalorder (!%p192_p3), %s1133_s20, 63 }
   0xc   : > { %v1360_v0 = vld [vmem:[%s1853_s1 + $0x38] sm:$0xff]  ;;  %v1361_v1 = vld [vmem:[%s1853_s1 + $0x40] sm:$0xff]  ;;  %v1359_v2 = vld [vmem:[%s1853_s1 + $0x30] sm:$0xff]  ;;  %s1861_s20 = smov (!%p236_p4, %s1133_s20), 63  ;;  %vm585_vm0 = vcmask 130048   ;;  %vm272_vm1 = vcmask 97280  }
   0xd   : > { %634 = vmatpush.bf16.msra.mxu0 %v1360_v0  ;;  %1362 = vmatpush.bf16.msra.mxu2 %v1360_v0  ;;  %s1320_s23 = sshll.u32 %s1861_s20, 3  ;;  %v1358_v3 = vld [vmem:[%s1853_s1 + $0x28] sm:$0xff]  ;;  %v1357_v7 = vld [vmem:[%s1853_s1 + $0x20] sm:$0xff]  ;;  %v1356_v11 = vld [vmem:[%s1853_s1 + $0x18] sm:$0xff] }
   0xe   : > { %730 = vmatpush.bf16.msra.mxu1 %v1361_v1  ;;  %1370 = vmatpush.bf16.msra.mxu3 %v1361_v1  ;;  %s1541_s26 = scalar_lea.vmem %s1852_s0, %s1320_s23  ;;  %v1355_v12 = vld [vmem:[%s1853_s1 + $0x10] sm:$0xff]  ;;  %v1354_v16 = vld [vmem:[%s1853_s1 + $0x8] sm:$0xff]  ;;  %v1353_v20 = vld [vmem:[%s1853_s1] sm:$0xff]  ;;  %s1690_s19 = scalar_lea.vmem %s1855_s3, %s1320_s23 }
   0xf   : > { %v1321_v4 = vld [vmem:[%s1541_s26 + $0x4] sm:$0xf]  ;;  %v1142_v5 = vld [vmem:[%s1541_s26 + $0x8] sm:$0xf0]  ;;  %v1339_v8 = vld [vmem:[%s1541_s26 + $0x94] sm:$0xf] }
  0x10   : > { %v1145_v6 = vor.u32 %v1321_v4, %v1142_v5  ;;  %v1214_v9 = vld [vmem:[%s1541_s26 + $0x98] sm:$0xf0]  ;;  %v1323_v13 = vld [vmem:[%s1541_s26 + $0x14] sm:$0xf]  ;;  %v1341_v17 = vld [vmem:[%s1541_s26 + $0xa4] sm:$0xf] }
  0x11   : > { %635 = vmatpush.bf16.msra.mxu0 %v1359_v2  ;;  %1363 = vmatpush.bf16.msra.mxu2 %v1359_v2  ;;  %v1217_v10 = vor.u32 %v1339_v8, %v1214_v9  ;;  %v1150_v14 = vld [vmem:[%s1541_s26 + $0x18] sm:$0xf0]  ;;  %v1222_v18 = vld [vmem:[%s1541_s26 + $0xa8] sm:$0xf0]  ;;  %v1140_v21 = vld [vmem:[%s1541_s26] sm:$0xf] }
  0x12   : > { %1302 = vmatmul.msk.bf16.vlgmr.msra.gmra.mxu1 %vm585_vm0, %v1145_v6  ;;  %v1153_v15 = vor.u32 %v1323_v13, %v1150_v14  ;;  %v1225_v19 = vor.u32 %v1341_v17, %v1222_v18  ;;  %v1322_v22 = vld [vmem:[%s1541_s26 + $0x4] sm:$0xf0]  ;;  %v1204_v23 = vld [vmem:[%s1541_s26 + $0x80] sm:$0xf]  ;;  %v1325_v27 = vld [vmem:[%s1541_s26 + $0x24] sm:$0xf] }
  0x13   : > { %1311 = vmatmul.msk.bf16.vlgmr.msra.gmra.mxu3 %vm585_vm0, %v1217_v10  ;;  %v1338_v24 = vld [vmem:[%s1541_s26 + $0x84] sm:$0xf0]  ;;  %v1141_v25 = vor.u32 %v1322_v22, %v1140_v21  ;;  %v1158_v28 = vld [vmem:[%s1541_s26 + $0x28] sm:$0xf0]  ;;  %v1343_v30 = vld [vmem:[%s1541_s26 + $0xb4] sm:$0xf] }
  0x14   : > { %v1205_v26 = vor.u32 %v1338_v24, %v1204_v23  ;;  %v1161_v29 = vor.u32 %v1325_v27, %v1158_v28  ;;  %v1230_v31 = vld [vmem:[%s1541_s26 + $0xb8] sm:$0xf0]  ;;  %v1148_v33 = vld [vmem:[%s1541_s26 + $0x10] sm:$0xf]  ;;  %v1324_v34 = vld [vmem:[%s1541_s26 + $0x14] sm:$0xf0] }
  0x15   : > { %636 = vmatpush.bf16.msra.mxu0 %v1358_v3  ;;  %1364 = vmatpush.bf16.msra.mxu2 %v1358_v3  ;;  %v1233_v32 = vor.u32 %v1343_v30, %v1230_v31  ;;  %v1212_v35 = vld [vmem:[%s1541_s26 + $0x90] sm:$0xf]  ;;  %v1340_v36 = vld [vmem:[%s1541_s26 + $0x94] sm:$0xf0]  ;;  %v1149_v37 = vor.u32 %v1324_v34, %v1148_v33  ;;  %v1327_v39 = vld [vmem:[%s1541_s26 + $0x34] sm:$0xf] }
  0x16   : > { %v1213_v38 = vor.u32 %v1340_v36, %v1212_v35  ;;  %v1166_v40 = vld [vmem:[%s1541_s26 + $0x38] sm:$0xf0]  ;;  %v1345_v42 = vld [vmem:[%s1541_s26 + $0xc4] sm:$0xf]  ;;  %v1238_v43 = vld [vmem:[%s1541_s26 + $0xc8] sm:$0xf0] }
  0x17   : > { %v1169_v41 = vor.u32 %v1327_v39, %v1166_v40  ;;  %v1241_v44 = vor.u32 %v1345_v42, %v1238_v43  ;;  %v1156_v45 = vld [vmem:[%s1541_s26 + $0x20] sm:$0xf]  ;;  %v1326_v46 = vld [vmem:[%s1541_s26 + $0x24] sm:$0xf0]  ;;  %v1329_v51 = vld [vmem:[%s1541_s26 + $0x44] sm:$0xf] }
  0x18   : > { %v1220_v47 = vld [vmem:[%s1541_s26 + $0xa0] sm:$0xf]  ;;  %v1342_v48 = vld [vmem:[%s1541_s26 + $0xa4] sm:$0xf0]  ;;  %v1157_v49 = vor.u32 %v1326_v46, %v1156_v45  ;;  %v1174_v52 = vld [vmem:[%s1541_s26 + $0x48] sm:$0xf0] }
  0x19   : > { %637 = vmatpush.bf16.msra.mxu0 %v1357_v7  ;;  %1365 = vmatpush.bf16.msra.mxu2 %v1357_v7  ;;  %v1221_v50 = vor.u32 %v1342_v48, %v1220_v47  ;;  %v1177_v53 = vor.u32 %v1329_v51, %v1174_v52  ;;  %v1347_v54 = vld [vmem:[%s1541_s26 + $0xd4] sm:$0xf]  ;;  %v1246_v55 = vld [vmem:[%s1541_s26 + $0xd8] sm:$0xf0]  ;;  %v1164_v57 = vld [vmem:[%s1541_s26 + $0x30] sm:$0xf] }
  0x1a   : > { %v1249_v56 = vor.u32 %v1347_v54, %v1246_v55  ;;  %v1328_v58 = vld [vmem:[%s1541_s26 + $0x34] sm:$0xf0]  ;;  %v1228_v59 = vld [vmem:[%s1541_s26 + $0xb0] sm:$0xf]  ;;  %v1331_v63 = vld [vmem:[%s1541_s26 + $0x54] sm:$0xf] }
  0x1b   : > { %v1344_v60 = vld [vmem:[%s1541_s26 + $0xb4] sm:$0xf0]  ;;  %v1165_v61 = vor.u32 %v1328_v58, %v1164_v57  ;;  %v1182_v0 = vld [vmem:[%s1541_s26 + $0x58] sm:$0xf0]  ;;  %v1349_v2 = vld [vmem:[%s1541_s26 + $0xe4] sm:$0xf] }
  0x1c   : > { %v1229_v62 = vor.u32 %v1344_v60, %v1228_v59  ;;  %v1185_v1 = vor.u32 %v1331_v63, %v1182_v0  ;;  %v1254_v3 = vld [vmem:[%s1541_s26 + $0xe8] sm:$0xf0]  ;;  %v1172_v5 = vld [vmem:[%s1541_s26 + $0x40] sm:$0xf]  ;;  %v1330_v6 = vld [vmem:[%s1541_s26 + $0x44] sm:$0xf0] }
  0x1d   : > { %638 = vmatpush.bf16.msra.mxu0 %v1356_v11  ;;  %1366 = vmatpush.bf16.msra.mxu2 %v1356_v11  ;;  %v1257_v4 = vor.u32 %v1349_v2, %v1254_v3  ;;  %v1236_v7 = vld [vmem:[%s1541_s26 + $0xc0] sm:$0xf]  ;;  %v1346_v8 = vld [vmem:[%s1541_s26 + $0xc4] sm:$0xf0]  ;;  %v1173_v9 = vor.u32 %v1330_v6, %v1172_v5  ;;  %v1333_v11 = vld [vmem:[%s1541_s26 + $0x64] sm:$0xf] }
  0x1e   : > { %v1237_v10 = vor.u32 %v1346_v8, %v1236_v7  ;;  %v1351_v14 = vld [vmem:[%s1541_s26 + $0xf4] sm:$0xf]  ;;  %v1180_v17 = vld [vmem:[%s1541_s26 + $0x50] sm:$0xf]  ;;  %v1332_v18 = vld [vmem:[%s1541_s26 + $0x54] sm:$0xf0] }
  0x1f   : > { %v1181_v21 = vor.u32 %v1332_v18, %v1180_v17  ;;  %v1335_v23 = vld [vmem:[%s1541_s26 + $0x74] sm:$0xf]  ;;  %v1198_v24 = vld [vmem:[%s1541_s26 + $0x78] sm:$0xf0]  ;;  %v1188_v27 = vld [vmem:[%s1541_s26 + $0x60] sm:$0xf] }
  0x20   : > { %v1334_v28 = vld [vmem:[%s1541_s26 + $0x64] sm:$0xf0]  ;;  %v1337_v33 = vld [vmem:[%s1541_s26 + $0x84] sm:$0xf]  ;;  %v1206_v34 = vld [vmem:[%s1541_s26 + $0x88] sm:$0xf0] }
  0x21   : > { %639 = vmatpush.bf16.msra.mxu0 %v1355_v12  ;;  %1367 = vmatpush.bf16.msra.mxu2 %v1355_v12  ;;  %v1190_v12 = vld [vmem:[%s1541_s26 + $0x68] sm:$0xf0]  ;;  %v1350_v30 = vld [vmem:[%s1541_s26 + $0xe4] sm:$0xf0]  ;;  %v1189_v31 = vor.u32 %v1334_v28, %v1188_v27  ;;  %v1209_v35 = vor.u32 %v1337_v33, %v1206_v34  ;;  %v1260_v39 = vld [vmem:[%s1541_s26 + $0xf0] sm:$0xf] }
  0x22   : > { %1303 = vmatmul.msk.bf16.gmra.mxu1 %vm585_vm0, %v1153_v15  ;;  %v1193_v13 = vor.u32 %v1333_v11, %v1190_v12  ;;  %v1262_v15 = vld [vmem:[%s1541_s26 + $0xf8] sm:$0xf0]  ;;  %v1352_v40 = vld [vmem:[%s1541_s26 + $0xf4] sm:$0xf0]  ;;  %v1679_v55 = vld [vmem:[%s1854_s2] ss:$0 sm:$0xff] }
  0x23   : > { %1312 = vmatmul.msk.bf16.gmra.mxu3 %vm585_vm0, %v1225_v19  ;;  %v1244_v19 = vld [vmem:[%s1541_s26 + $0xd0] sm:$0xf]  ;;  %v1261_v42 = vor.u32 %v1352_v40, %v1260_v39 }
  0x25   : > { %640 = vmatpush.bf16.msra.mxu0 %v1354_v16  ;;  %1368 = vmatpush.bf16.msra.mxu2 %v1354_v16  ;;  %v1265_v16 = vor.u32 %v1351_v14, %v1262_v15 }
  0x29   : > { %641 = vmatpush.bf16.msra.mxu0 %v1353_v20  ;;  %1369 = vmatpush.bf16.msra.mxu2 %v1353_v20  ;;  %v1348_v20 = vld [vmem:[%s1541_s26 + $0xd4] sm:$0xf0] }
  0x2a   : > { %v1245_v22 = vor.u32 %v1348_v20, %v1244_v19 }
  0x2c   : > { %642 = vmatmul.bf16.vlgmr.msra.gmra.mxu0 %v1141_v25  ;;  %682 = vmatmul.bf16.vlgmr.msra.gmra.mxu2 %v1205_v26  ;;  %v1201_v25 = vor.u32 %v1335_v23, %v1198_v24  ;;  %v1485_v26 = vmov 0.0  }
  0x2d   : > { %273 = vst.msk [vmem:[#allocation2] sm:$0xff] %vm272_vm1, %v1485_v26 }
  0x2e   : > { %274 = vst.msk [vmem:[#allocation2 + $0x8] sm:$0xff] %vm272_vm1, %v1485_v26 }
  0x2f   : > { %275 = vst.msk [vmem:[#allocation2 + $0x10] sm:$0xff] %vm272_vm1, %v1485_v26 }
  0x30   : > { %276 = vst.msk [vmem:[#allocation2 + $0x18] sm:$0xff] %vm272_vm1, %v1485_v26 }
  0x31   : > { %277 = vst.msk [vmem:[#allocation2 + $0x20] sm:$0xff] %vm272_vm1, %v1485_v26 }
  0x32   : > { %1304 = vmatmul.msk.bf16.gmra.mxu1 %vm585_vm0, %v1161_v29  ;;  %v1252_v29 = vld [vmem:[%s1541_s26 + $0xe0] sm:$0xf]  ;;  %278 = vst.msk [vmem:[#allocation2 + $0x28] sm:$0xff] %vm272_vm1, %v1485_v26 }
  0x33   : > { %1313 = vmatmul.msk.bf16.gmra.mxu3 %vm585_vm0, %v1233_v32  ;;  %v1253_v32 = vor.u32 %v1350_v30, %v1252_v29  ;;  %279 = vst.msk [vmem:[#allocation2 + $0x30] sm:$0xff] %vm272_vm1, %v1485_v26 }
  0x34   : > { %280 = vst.msk [vmem:[#allocation2 + $0x38] sm:$0xff] %vm272_vm1, %v1485_v26  ;;  %v305_v46 = vld [vmem:[#allocation2] sm:$0xff] }
  0x35   : > { %281 = vst.msk [vmem:[#allocation2 + $0x40] sm:$0xff] %vm272_vm1, %v1485_v26 }
  0x36   : > { %282 = vst.msk [vmem:[#allocation2 + $0x48] sm:$0xff] %vm272_vm1, %v1485_v26 }
  0x37   : > { %283 = vst.msk [vmem:[#allocation2 + $0x50] sm:$0xff] %vm272_vm1, %v1485_v26 }
  0x38   : > { %284 = vst.msk [vmem:[#allocation2 + $0x58] sm:$0xff] %vm272_vm1, %v1485_v26  ;;  %v309_v23 = vld [vmem:[#allocation2 + $0x20] sm:$0xff] }
  0x39   : > { %285 = vst.msk [vmem:[#allocation2 + $0x60] sm:$0xff] %vm272_vm1, %v1485_v26 }
  0x3a   : > { %286 = vst.msk [vmem:[#allocation2 + $0x68] sm:$0xff] %vm272_vm1, %v1485_v26 }
  0x3b   : > { %287 = vst.msk [vmem:[#allocation2 + $0x70] sm:$0xff] %vm272_vm1, %v1485_v26 }
  0x3c   : > { %647 = vmatmul.bf16.gmra.mxu0 %v1149_v37  ;;  %687 = vmatmul.bf16.gmra.mxu2 %v1213_v38  ;;  %288 = vst.msk [vmem:[#allocation2 + $0x78] sm:$0xff] %vm272_vm1, %v1485_v26  ;;  %v1196_v37 = vld [vmem:[%s1541_s26 + $0x70] sm:$0xf]  ;;  %v1336_v38 = vld [vmem:[%s1541_s26 + $0x74] sm:$0xf0] }
  0x3d   : > { %289 = vst.msk [vmem:[#allocation2 + $0x80] sm:$0xff] %vm272_vm1, %v1485_v26 }
  0x3e   : > { %290 = vst.msk [vmem:[#allocation2 + $0x88] sm:$0xff] %vm272_vm1, %v1485_v26 }
  0x3f   : > { %291 = vst.msk [vmem:[#allocation2 + $0x90] sm:$0xff] %vm272_vm1, %v1485_v26 }
  0x40   : > { %292 = vst.msk [vmem:[#allocation2 + $0x98] sm:$0xff] %vm272_vm1, %v1485_v26 }
  0x41   : > { %293 = vst.msk [vmem:[#allocation2 + $0xa0] sm:$0xff] %vm272_vm1, %v1485_v26 }
  0x42   : > { %1305 = vmatmul.msk.bf16.gmra.mxu1 %vm585_vm0, %v1169_v41  ;;  %v1197_v41 = vor.u32 %v1336_v38, %v1196_v37  ;;  %294 = vst.msk [vmem:[#allocation2 + $0xa8] sm:$0xff] %vm272_vm1, %v1485_v26  ;;  %v310_v38 = vld [vmem:[#allocation2 + $0x28] sm:$0xff] }
  0x43   : > { %1314 = vmatmul.msk.bf16.gmra.mxu3 %vm585_vm0, %v1241_v44  ;;  %295 = vst.msk [vmem:[#allocation2 + $0xb0] sm:$0xff] %vm272_vm1, %v1485_v26 }
  0x44   : > { %296 = vst.msk [vmem:[#allocation2 + $0xb8] sm:$0xff] %vm272_vm1, %v1485_v26 }
  0x45   : > { %297 = vst.msk [vmem:[#allocation2 + $0xc0] sm:$0xff] %vm272_vm1, %v1485_v26 }
  0x46   : > { %298 = vst.msk [vmem:[#allocation2 + $0xc8] sm:$0xff] %vm272_vm1, %v1485_v26  ;;  %v323_v7 = vld [vmem:[#allocation2 + $0x90] sm:$0xff] }
  0x47   : > { %299 = vst.msk [vmem:[#allocation2 + $0xd0] sm:$0xff] %vm272_vm1, %v1485_v26  ;;  %v324_v20 = vld [vmem:[#allocation2 + $0x98] sm:$0xff] }
  0x48   : > { %300 = vst.msk [vmem:[#allocation2 + $0xd8] sm:$0xff] %vm272_vm1, %v1485_v26 }
  0x49   : > { %301 = vst.msk [vmem:[#allocation2 + $0xe0] sm:$0xff] %vm272_vm1, %v1485_v26 }
  0x4a   : > { %302 = vst.msk [vmem:[#allocation2 + $0xe8] sm:$0xff] %vm272_vm1, %v1485_v26 }
  0x4b   : > { %303 = vst.msk [vmem:[#allocation2 + $0xf0] sm:$0xff] %vm272_vm1, %v1485_v26 }
  0x4c   : > { %652 = vmatmul.bf16.gmra.mxu0 %v1157_v49  ;;  %692 = vmatmul.bf16.gmra.mxu2 %v1221_v50  ;;  %304 = vst.msk [vmem:[#allocation2 + $0xf8] sm:$0xff] %vm272_vm1, %v1485_v26 }
  0x52   : > { %1306 = vmatmul.msk.bf16.gmra.mxu1 %vm585_vm0, %v1177_v53  ;;  %v306_v53 = vld [vmem:[#allocation2 + $0x8] sm:$0xff] }
  0x53   : > { %1315 = vmatmul.msk.bf16.gmra.mxu3 %vm585_vm0, %v1249_v56 }
  0x5c   : > { %657 = vmatmul.bf16.gmra.mxu0 %v1165_v61  ;;  %697 = vmatmul.bf16.gmra.mxu2 %v1229_v62  ;;  %v307_v62 = vld [vmem:[#allocation2 + $0x10] sm:$0xff] }
  0x62   : > { %1307 = vmatmul.msk.bf16.gmra.mxu1 %vm585_vm0, %v1185_v1 }
  0x63   : > { %1316 = vmatmul.msk.bf16.gmra.mxu3 %vm585_vm0, %v1257_v4 }
  0x6c   : > { %662 = vmatmul.bf16.gmra.mxu0 %v1173_v9  ;;  %702 = vmatmul.bf16.gmra.mxu2 %v1237_v10  ;;  %v308_v10 = vld [vmem:[#allocation2 + $0x18] sm:$0xff] }
  0x72   : > { %1308 = vmatmul.msk.bf16.gmra.mxu1 %vm585_vm0, %v1193_v13 }
  0x73   : > { %1317 = vmatmul.msk.bf16.gmra.mxu3 %vm585_vm0, %v1265_v16 }
  0x7c   : > { %667 = vmatmul.bf16.gmra.mxu0 %v1181_v21  ;;  %707 = vmatmul.bf16.gmra.mxu2 %v1245_v22 }
  0x82   : > { %1309 = vmatmul.msk.bf16.gmra.mxu1 %vm585_vm0, %v1201_v25 }
  0x8c   : > { %672 = vmatmul.bf16.gmra.mxu0 %v1189_v31  ;;  %712 = vmatmul.bf16.gmra.mxu2 %v1253_v32 }
  0x8f   : > { %v732_v36 = vpop.f32.mrf.mxu1 }
  0x92   : > { %1310 = vmatmul.msk.bf16.gmra.mxu1 %vm585_vm0, %v1209_v35  ;;  %v325_v35 = vld [vmem:[#allocation2 + $0xa0] sm:$0xff] }
  0x96   : > { %v777_v45 = vpop.f32.mrf.mxu3 }
  0x97   : > { %v734_v43 = vpop.f32.mrf.mxu1 }
  0x9c   : > { %677 = vmatmul.bf16.gmra.mxu0 %v1197_v41  ;;  %717 = vmatmul.bf16.gmra.mxu2 %v1261_v42 }
  0x9e   : > { %v779_v52 = vpop.f32.mrf.mxu3 }
  0x9f   : > { %v737_v44 = vpop.f32.mrf.mxu1 }
  0xa6   : > { %v782_v2 = vpop.f32.mrf.mxu3 }
  0xa7   : > { %v739_v49 = vpop.f32.mrf.mxu1 }
  0xa9   : > { %v643_v47 = vpop.f32.mrf.mxu0 }
  0xaa   : > { %v733_v48 = vadd.f32 %v732_v36, %v643_v47 }
  0xac   : > { %v812_v50 = vadd.f32 %v733_v48, %v305_v46 }
  0xae   : > { %845 = vst.msk [vmem:[#allocation2] sm:$0xff] %vm272_vm1, %v812_v50  ;;  %v784_v16 = vpop.f32.mrf.mxu3  ;;  %v326_v50 = vld [vmem:[#allocation2 + $0xa8] sm:$0xff] }
  0xaf   : > { %v1674_v51 = vpop.f32.mrf.mxu2  ;;  %v742_v57 = vpop.f32.mrf.mxu1 }
  0xb1   : > { %v645_v54 = vpop.f32.mrf.mxu0 }
  0xb2   : > { %v735_v56 = vadd.f32 %v734_v43, %v645_v54 }
  0xb4   : > { %v813_v58 = vadd.f32 %v735_v56, %v306_v53  ;;  %v311_v56 = vld [vmem:[#allocation2 + $0x30] sm:$0xff] }
  0xb5   : > { %v880_v59 = vld [vmem:[#allocation2] sm:$0xff] }
  0xb6   : > { %v916_v60 = vadd.f32 %v1679_v55, %v880_v59  ;;  %846 = vst.msk [vmem:[#allocation2 + $0x8] sm:$0xff] %vm272_vm1, %v813_v58  ;;  %v787_v34 = vpop.f32.mrf.mxu3 }
  0xb7   : > { %v1683_v61 = vpop.f32.mrf.mxu2  ;;  %v744_v1 = vpop.f32.mrf.mxu1 }
  0xb8   : > { %1397 = vtanh.f32 %v916_v60 }
  0xb9   : > { %v648_v63 = vpop.f32.mrf.mxu0 }
  0xba   : > { %v738_v0 = vadd.f32 %v737_v44, %v648_v63 }
  0xbc   : > { %v814_v3 = vadd.f32 %v738_v0, %v307_v62 }
  0xbd   : > { %v881_v4 = vld [vmem:[#allocation2 + $0x8] sm:$0xff] }
  0xbe   : > { %v1398_v5 = vpop.eup %1397  ;;  %v917_v6 = vadd.f32 %v1679_v55, %v881_v4  ;;  %847 = vst.msk [vmem:[#allocation2 + $0x10] sm:$0xff] %vm272_vm1, %v814_v3  ;;  %v789_v53 = vpop.f32.mrf.mxu3 }
  0xbf   : > { %980 = vst.msk [vmem:[%s1690_s19] sm:$0xff] %vm272_vm1, %v1398_v5  ;;  %v688_v8 = vpop.f32.mrf.mxu2  ;;  %v747_v13 = vpop.f32.mrf.mxu1  ;;  %v327_v5 = vld [vmem:[#allocation2 + $0xb0] sm:$0xff] }
  0xc0   : > { %1399 = vtanh.f32 %v917_v6  ;;  %v778_v9 = vadd.f32 %v777_v45, %v688_v8  ;;  %v312_v8 = vld [vmem:[#allocation2 + $0x38] sm:$0xff] }
  0xc1   : > { %v650_v11 = vpop.f32.mrf.mxu0 }
  0xc2   : > { %v740_v12 = vadd.f32 %v739_v49, %v650_v11  ;;  %v830_v14 = vadd.f32 %v778_v9, %v323_v7 }
  0xc4   : > { %v815_v15 = vadd.f32 %v740_v12, %v308_v10  ;;  %863 = vst.msk [vmem:[#allocation2 + $0x90] sm:$0xff] %vm272_vm1, %v830_v14 }
  0xc5   : > { %v882_v17 = vld [vmem:[#allocation2 + $0x10] sm:$0xff] }
  0xc6   : > { %v1400_v18 = vpop.eup %1399  ;;  %v918_v19 = vadd.f32 %v1679_v55, %v882_v17  ;;  %848 = vst.msk [vmem:[#allocation2 + $0x18] sm:$0xff] %vm272_vm1, %v815_v15  ;;  %v792_v12 = vpop.f32.mrf.mxu3 }
  0xc7   : > { %981 = vst.msk [vmem:[%s1690_s19 + $0x8] sm:$0xff] %vm272_vm1, %v1400_v18  ;;  %v690_v21 = vpop.f32.mrf.mxu2  ;;  %v749_v26 = vpop.f32.mrf.mxu1 }
  0xc8   : > { %1401 = vtanh.f32 %v918_v19  ;;  %v780_v22 = vadd.f32 %v779_v52, %v690_v21  ;;  %v328_v21 = vld [vmem:[#allocation2 + $0xb8] sm:$0xff] }
  0xc9   : > { %v653_v24 = vpop.f32.mrf.mxu0 }
  0xca   : > { %v743_v25 = vadd.f32 %v742_v57, %v653_v24  ;;  %v831_v27 = vadd.f32 %v780_v22, %v324_v20  ;;  %v313_v24 = vld [vmem:[#allocation2 + $0x40] sm:$0xff] }
  0xcb   : > { %v898_v28 = vld [vmem:[#allocation2 + $0x90] sm:$0xff] }
  0xcc   : > { %v816_v29 = vadd.f32 %v743_v25, %v309_v23  ;;  %v934_v30 = vadd.f32 %v1679_v55, %v898_v28  ;;  %864 = vst.msk [vmem:[#allocation2 + $0x98] sm:$0xff] %vm272_vm1, %v831_v27 }
  0xcd   : > { %v883_v31 = vld [vmem:[#allocation2 + $0x18] sm:$0xff] }
  0xce   : > { %v1402_v32 = vpop.eup %1401  ;;  %v919_v33 = vadd.f32 %v1679_v55, %v883_v31  ;;  %849 = vst.msk [vmem:[#allocation2 + $0x20] sm:$0xff] %vm272_vm1, %v816_v29  ;;  %1403 = vtanh.f32 %v934_v30  ;;  %v794_v31 = vpop.f32.mrf.mxu3 }
  0xcf   : > { %982 = vst.msk [vmem:[%s1690_s19 + $0x10] sm:$0xff] %vm272_vm1, %v1402_v32  ;;  %v693_v36 = vpop.f32.mrf.mxu2  ;;  %v1707_v41 = vpop.f32.mrf.mxu1 }
  0xd0   : > { %1405 = vtanh.f32 %v919_v33  ;;  %v783_v37 = vadd.f32 %v782_v2, %v693_v36 }
  0xd1   : > { %v655_v39 = vpop.f32.mrf.mxu0 }
  0xd2   : > { %v745_v40 = vadd.f32 %v744_v1, %v655_v39  ;;  %v832_v42 = vadd.f32 %v783_v37, %v325_v35  ;;  %v329_v37 = vld [vmem:[#allocation2 + $0xc0] sm:$0xff] }
  0xd3   : > { %v899_v43 = vld [vmem:[#allocation2 + $0x98] sm:$0xff] }
  0xd4   : > { %v817_v44 = vadd.f32 %v745_v40, %v310_v38  ;;  %v1404_v45 = vpop.eup %1403  ;;  %v935_v46 = vadd.f32 %v1679_v55, %v899_v43  ;;  %865 = vst.msk [vmem:[#allocation2 + $0xa0] sm:$0xff] %vm272_vm1, %v832_v42  ;;  %v314_v40 = vld [vmem:[#allocation2 + $0x48] sm:$0xff] }
  0xd5   : > { %v884_v47 = vld [vmem:[#allocation2 + $0x20] sm:$0xff]  ;;  %998 = vst.msk [vmem:[%s1690_s19 + $0x90] sm:$0xff] %vm272_vm1, %v1404_v45 }
  0xd6   : > { %v1406_v48 = vpop.eup %1405  ;;  %v920_v49 = vadd.f32 %v1679_v55, %v884_v47  ;;  %1407 = vtanh.f32 %v935_v46  ;;  %850 = vst.msk [vmem:[#allocation2 + $0x28] sm:$0xff] %vm272_vm1, %v817_v44 }
  0xd7   : > { %983 = vst.msk [vmem:[%s1690_s19 + $0x18] sm:$0xff] %vm272_vm1, %v1406_v48  ;;  %v695_v52 = vpop.f32.mrf.mxu2  ;;  %v1717_v59 = vpop.f32.mrf.mxu1 }
  0xd8   : > { %1409 = vtanh.f32 %v920_v49  ;;  %v785_v54 = vadd.f32 %v784_v16, %v695_v52 }
  0xd9   : > { %v658_v57 = vpop.f32.mrf.mxu0 }
  0xda   : > { %v748_v58 = vadd.f32 %v747_v13, %v658_v57  ;;  %v833_v60 = vadd.f32 %v785_v54, %v326_v50  ;;  %v797_v50 = vpop.f32.mrf.mxu3  ;;  %v330_v54 = vld [vmem:[#allocation2 + $0xc8] sm:$0xff] }
  0xdb   : > { %v900_v62 = vld [vmem:[#allocation2 + $0xa0] sm:$0xff] }
  0xdc   : > { %v818_v63 = vadd.f32 %v748_v58, %v311_v56  ;;  %v1408_v0 = vpop.eup %1407  ;;  %v936_v1 = vadd.f32 %v1679_v55, %v900_v62  ;;  %866 = vst.msk [vmem:[#allocation2 + $0xa8] sm:$0xff] %vm272_vm1, %v833_v60  ;;  %v315_v58 = vld [vmem:[#allocation2 + $0x50] sm:$0xff] }
  0xdd   : > { %999 = vst.msk [vmem:[%s1690_s19 + $0x98] sm:$0xff] %vm272_vm1, %v1408_v0  ;;  %v885_v3 = vld [vmem:[#allocation2 + $0x28] sm:$0xff] }
  0xde   : > { %v1410_v2 = vpop.eup %1409  ;;  %1411 = vtanh.f32 %v936_v1  ;;  %v921_v4 = vadd.f32 %v1679_v55, %v885_v3  ;;  %851 = vst.msk [vmem:[#allocation2 + $0x30] sm:$0xff] %vm272_vm1, %v818_v63 }
  0xdf   : > { %984 = vst.msk [vmem:[%s1690_s19 + $0x20] sm:$0xff] %vm272_vm1, %v1410_v2  ;;  %v698_v6 = vpop.f32.mrf.mxu2  ;;  %v1727_v11 = vpop.f32.mrf.mxu1 }
  0xe0   : > { %v788_v7 = vadd.f32 %v787_v34, %v698_v6  ;;  %1413 = vtanh.f32 %v921_v4 }
  0xe1   : > { %v660_v9 = vpop.f32.mrf.mxu0 }
  0xe2   : > { %v750_v10 = vadd.f32 %v749_v26, %v660_v9  ;;  %v834_v13 = vadd.f32 %v788_v7, %v327_v5  ;;  %v331_v7 = vld [vmem:[#allocation2 + $0xd0] sm:$0xff]  ;;  %v799_v9 = vpop.f32.mrf.mxu3 }
  0xe3   : > { %v901_v14 = vld [vmem:[#allocation2 + $0xa8] sm:$0xff] }
  0xe4   : > { %v819_v15 = vadd.f32 %v750_v10, %v312_v8  ;;  %v1412_v16 = vpop.eup %1411  ;;  %v937_v17 = vadd.f32 %v1679_v55, %v901_v14  ;;  %867 = vst.msk [vmem:[#allocation2 + $0xb0] sm:$0xff] %vm272_vm1, %v834_v13 }
  0xe5   : > { %1000 = vst.msk [vmem:[%s1690_s19 + $0xa0] sm:$0xff] %vm272_vm1, %v1412_v16  ;;  %v886_v18 = vld [vmem:[#allocation2 + $0x30] sm:$0xff] }
  0xe6   : > { %1415 = vtanh.f32 %v937_v17  ;;  %852 = vst.msk [vmem:[#allocation2 + $0x38] sm:$0xff] %vm272_vm1, %v819_v15  ;;  %v1414_v19 = vpop.eup %1413  ;;  %v922_v20 = vadd.f32 %v1679_v55, %v886_v18 }
  0xe7   : > { %v700_v22 = vpop.f32.mrf.mxu2  ;;  %985 = vst.msk [vmem:[%s1690_s19 + $0x28] sm:$0xff] %vm272_vm1, %v1414_v19  ;;  %v1738_v27 = vpop.f32.mrf.mxu1 }
  0xe8   : > { %v790_v23 = vadd.f32 %v789_v53, %v700_v22  ;;  %1417 = vtanh.f32 %v922_v20 }
  0xe9   : > { %v663_v25 = vpop.f32.mrf.mxu0 }
  0xea   : > { %v753_v26 = vadd.f32 %v1707_v41, %v663_v25  ;;  %v835_v28 = vadd.f32 %v790_v23, %v328_v21  ;;  %v332_v23 = vld [vmem:[#allocation2 + $0xd8] sm:$0xff] }
  0xeb   : > { %v902_v29 = vld [vmem:[#allocation2 + $0xb0] sm:$0xff] }
  0xec   : > { %v820_v30 = vadd.f32 %v753_v26, %v313_v24  ;;  %v1416_v32 = vpop.eup %1415  ;;  %v938_v33 = vadd.f32 %v1679_v55, %v902_v29  ;;  %868 = vst.msk [vmem:[#allocation2 + $0xb8] sm:$0xff] %vm272_vm1, %v835_v28  ;;  %v317_v26 = vld [vmem:[#allocation2 + $0x60] sm:$0xff]  ;;  %v802_v28 = vpop.f32.mrf.mxu3 }
  0xed   : > { %1001 = vst.msk [vmem:[%s1690_s19 + $0xa8] sm:$0xff] %vm272_vm1, %v1416_v32  ;;  %v887_v34 = vld [vmem:[#allocation2 + $0x38] sm:$0xff] }
  0xee   : > { %1419 = vtanh.f32 %v938_v33  ;;  %v923_v35 = vadd.f32 %v1679_v55, %v887_v34  ;;  %853 = vst.msk [vmem:[#allocation2 + $0x40] sm:$0xff] %vm272_vm1, %v820_v30  ;;  %v1418_v36 = vpop.eup %1417 }
  0xef   : > { %v703_v38 = vpop.f32.mrf.mxu2  ;;  %986 = vst.msk [vmem:[%s1690_s19 + $0x30] sm:$0xff] %vm272_vm1, %v1418_v36  ;;  %v1749_v43 = vpop.f32.mrf.mxu1 }
  0xf0   : > { %1421 = vtanh.f32 %v923_v35  ;;  %v793_v39 = vadd.f32 %v792_v12, %v703_v38 }
  0xf1   : > { %v665_v41 = vpop.f32.mrf.mxu0 }
  0xf2   : > { %v755_v42 = vadd.f32 %v1717_v59, %v665_v41  ;;  %v836_v44 = vadd.f32 %v793_v39, %v329_v37  ;;  %v333_v39 = vld [vmem:[#allocation2 + $0xe0] sm:$0xff] }
  0xf3   : > { %v903_v45 = vld [vmem:[#allocation2 + $0xb8] sm:$0xff] }
  0xf4   : > { %v821_v46 = vadd.f32 %v755_v42, %v314_v40  ;;  %v1420_v47 = vpop.eup %1419  ;;  %v939_v48 = vadd.f32 %v1679_v55, %v903_v45  ;;  %869 = vst.msk [vmem:[#allocation2 + $0xc0] sm:$0xff] %vm272_vm1, %v836_v44  ;;  %v318_v42 = vld [vmem:[#allocation2 + $0x68] sm:$0xff]  ;;  %v321_v45 = vld [vmem:[#allocation2 + $0x80] sm:$0xff] }
  0xf5   : > { %1002 = vst.msk [vmem:[%s1690_s19 + $0xb0] sm:$0xff] %vm272_vm1, %v1420_v47  ;;  %v888_v49 = vld [vmem:[#allocation2 + $0x40] sm:$0xff] }
  0xf6   : > { %v1422_v52 = vpop.eup %1421  ;;  %1423 = vtanh.f32 %v939_v48  ;;  %v924_v53 = vadd.f32 %v1679_v55, %v888_v49  ;;  %854 = vst.msk [vmem:[#allocation2 + $0x48] sm:$0xff] %vm272_vm1, %v821_v46 }
  0xf7   : > { %987 = vst.msk [vmem:[%s1690_s19 + $0x38] sm:$0xff] %vm272_vm1, %v1422_v52  ;;  %v705_v56 = vpop.f32.mrf.mxu2  ;;  %v1760_v62 = vpop.f32.mrf.mxu1 }
  0xf8   : > { %1425 = vtanh.f32 %v924_v53  ;;  %v795_v57 = vadd.f32 %v794_v31, %v705_v56 }
  0xf9   : > { %v668_v59 = vpop.f32.mrf.mxu0 }
  0xfa   : > { %v758_v60 = vadd.f32 %v1727_v11, %v668_v59  ;;  %v837_v63 = vadd.f32 %v795_v57, %v330_v54  ;;  %v316_v11 = vld [vmem:[#allocation2 + $0x58] sm:$0xff] }
  0xfb   : > { %v904_v0 = vld [vmem:[#allocation2 + $0xc0] sm:$0xff] }
  0xfc   : > { %v822_v1 = vadd.f32 %v758_v60, %v315_v58  ;;  %v1424_v2 = vpop.eup %1423  ;;  %v940_v3 = vadd.f32 %v1679_v55, %v904_v0  ;;  %870 = vst.msk [vmem:[#allocation2 + $0xc8] sm:$0xff] %vm272_vm1, %v837_v63  ;;  %v319_v63 = vld [vmem:[#allocation2 + $0x70] sm:$0xff] }
  0xfd   : > { %1003 = vst.msk [vmem:[%s1690_s19 + $0xb8] sm:$0xff] %vm272_vm1, %v1424_v2  ;;  %v889_v4 = vld [vmem:[#allocation2 + $0x48] sm:$0xff] }
  0xfe   : > { %v1426_v5 = vpop.eup %1425  ;;  %1427 = vtanh.f32 %v940_v3  ;;  %v925_v6 = vadd.f32 %v1679_v55, %v889_v4  ;;  %855 = vst.msk [vmem:[#allocation2 + $0x50] sm:$0xff] %vm272_vm1, %v822_v1  ;;  %v322_v2 = vld [vmem:[#allocation2 + $0x88] sm:$0xff] }
  0xff   : > { %988 = vst.msk [vmem:[%s1690_s19 + $0x40] sm:$0xff] %vm272_vm1, %v1426_v5  ;;  %v708_v8 = vpop.f32.mrf.mxu2  ;;  %v1771_v14 = vpop.f32.mrf.mxu1 }
 0x100   : > { %1429 = vtanh.f32 %v925_v6  ;;  %v798_v10 = vadd.f32 %v797_v50, %v708_v8  ;;  %v804_v50 = vpop.f32.mrf.mxu3 }
 0x101   : > { %v670_v12 = vpop.f32.mrf.mxu0 }
 0x102   : > { %v760_v13 = vadd.f32 %v1738_v27, %v670_v12  ;;  %v838_v15 = vadd.f32 %v798_v10, %v331_v7 }
 0x103   : > { %v905_v16 = vld [vmem:[#allocation2 + $0xc8] sm:$0xff] }
 0x104   : > { %v823_v17 = vadd.f32 %v760_v13, %v316_v11  ;;  %v1428_v18 = vpop.eup %1427  ;;  %v941_v19 = vadd.f32 %v1679_v55, %v905_v16  ;;  %871 = vst.msk [vmem:[#allocation2 + $0xd0] sm:$0xff] %vm272_vm1, %v838_v15  ;;  %v335_v15 = vld [vmem:[#allocation2 + $0xf0] sm:$0xff] }
 0x105   : > { %1004 = vst.msk [vmem:[%s1690_s19 + $0xc0] sm:$0xff] %vm272_vm1, %v1428_v18  ;;  %v890_v20 = vld [vmem:[#allocation2 + $0x50] sm:$0xff] }
 0x106   : > { %v1430_v21 = vpop.eup %1429  ;;  %1431 = vtanh.f32 %v941_v19  ;;  %v926_v22 = vadd.f32 %v1679_v55, %v890_v20  ;;  %856 = vst.msk [vmem:[#allocation2 + $0x58] sm:$0xff] %vm272_vm1, %v823_v17  ;;  %v320_v19 = vld [vmem:[#allocation2 + $0x78] sm:$0xff] }
 0x107   : > { %989 = vst.msk [vmem:[%s1690_s19 + $0x48] sm:$0xff] %vm272_vm1, %v1430_v21  ;;  %v710_v24 = vpop.f32.mrf.mxu2  ;;  %v1782_v30 = vpop.f32.mrf.mxu1 }
 0x108   : > { %1433 = vtanh.f32 %v926_v22  ;;  %v800_v25 = vadd.f32 %v799_v9, %v710_v24  ;;  %v807_v12 = vpop.f32.mrf.mxu3 }
 0x109   : > { %v673_v27 = vpop.f32.mrf.mxu0 }
 0x10a   : > { %v763_v29 = vadd.f32 %v1749_v43, %v673_v27  ;;  %v839_v31 = vadd.f32 %v800_v25, %v332_v23 }
 0x10b   : > { %v906_v32 = vld [vmem:[#allocation2 + $0xd0] sm:$0xff] }
 0x10c   : > { %v824_v33 = vadd.f32 %v763_v29, %v317_v26  ;;  %v1432_v34 = vpop.eup %1431  ;;  %v942_v35 = vadd.f32 %v1679_v55, %v906_v32  ;;  %872 = vst.msk [vmem:[#allocation2 + $0xd8] sm:$0xff] %vm272_vm1, %v839_v31  ;;  %v336_v32 = vld [vmem:[#allocation2 + $0xf8] sm:$0xff] }
 0x10d   : > { %1005 = vst.msk [vmem:[%s1690_s19 + $0xc8] sm:$0xff] %vm272_vm1, %v1432_v34  ;;  %v891_v36 = vld [vmem:[#allocation2 + $0x58] sm:$0xff] }
 0x10e   : > { %v1434_v37 = vpop.eup %1433  ;;  %1435 = vtanh.f32 %v942_v35  ;;  %v927_v38 = vadd.f32 %v1679_v55, %v891_v36  ;;  %857 = vst.msk [vmem:[#allocation2 + $0x60] sm:$0xff] %vm272_vm1, %v824_v33 }
 0x10f   : > { %990 = vst.msk [vmem:[%s1690_s19 + $0x50] sm:$0xff] %vm272_vm1, %v1434_v37  ;;  %v713_v40 = vpop.f32.mrf.mxu2  ;;  %v772_v46 = vpop.f32.mrf.mxu1 }
 0x110   : > { %1437 = vtanh.f32 %v927_v38  ;;  %v803_v41 = vadd.f32 %v802_v28, %v713_v40  ;;  %v773_v48 = vadd.f32 %v772_v46, %v1674_v51  ;;  %v334_v51 = vld [vmem:[#allocation2 + $0xe8] sm:$0xff]  ;;  %v809_v31 = vpop.f32.mrf.mxu3 }
 0x111   : > { %v675_v43 = vpop.f32.mrf.mxu0 }
 0x112   : > { %v765_v44 = vadd.f32 %v1760_v62, %v675_v43  ;;  %v840_v47 = vadd.f32 %v803_v41, %v333_v39  ;;  %v828_v56 = vadd.f32 %v773_v48, %v321_v45 }
 0x113   : > { %v907_v49 = vld [vmem:[#allocation2 + $0xd8] sm:$0xff] }
 0x114   : > { %v825_v52 = vadd.f32 %v765_v44, %v318_v42  ;;  %v1436_v53 = vpop.eup %1435  ;;  %v943_v54 = vadd.f32 %v1679_v55, %v907_v49  ;;  %873 = vst.msk [vmem:[#allocation2 + $0xe0] sm:$0xff] %vm272_vm1, %v840_v47 }
 0x115   : > { %1006 = vst.msk [vmem:[%s1690_s19 + $0xd0] sm:$0xff] %vm272_vm1, %v1436_v53  ;;  %v892_v57 = vld [vmem:[#allocation2 + $0x60] sm:$0xff] }
 0x116   : > { %v1438_v58 = vpop.eup %1437  ;;  %1439 = vtanh.f32 %v943_v54  ;;  %v928_v59 = vadd.f32 %v1679_v55, %v892_v57  ;;  %858 = vst.msk [vmem:[#allocation2 + $0x68] sm:$0xff] %vm272_vm1, %v825_v52 }
 0x117   : > { %991 = vst.msk [vmem:[%s1690_s19 + $0x58] sm:$0xff] %vm272_vm1, %v1438_v58  ;;  %v715_v60 = vpop.f32.mrf.mxu2  ;;  %v774_v3 = vpop.f32.mrf.mxu1 }
 0x118   : > { %1441 = vtanh.f32 %v928_v59  ;;  %861 = vst.msk [vmem:[#allocation2 + $0x80] sm:$0xff] %vm272_vm1, %v828_v56  ;;  %v805_v62 = vadd.f32 %v804_v50, %v715_v60  ;;  %v775_v5 = vadd.f32 %v774_v3, %v1683_v61 }
 0x119   : > { %v678_v0 = vpop.f32.mrf.mxu0 }
 0x11a   : > { %v768_v1 = vadd.f32 %v1771_v14, %v678_v0  ;;  %v841_v4 = vadd.f32 %v805_v62, %v334_v51  ;;  %v829_v10 = vadd.f32 %v775_v5, %v322_v2 }
 0x11b   : > { %v908_v6 = vld [vmem:[#allocation2 + $0xe0] sm:$0xff] }
 0x11c   : > { %v826_v7 = vadd.f32 %v768_v1, %v319_v63  ;;  %v1440_v8 = vpop.eup %1439  ;;  %v944_v9 = vadd.f32 %v1679_v55, %v908_v6  ;;  %874 = vst.msk [vmem:[#allocation2 + $0xe8] sm:$0xff] %vm272_vm1, %v841_v4 }
 0x11d   : > { %1007 = vst.msk [vmem:[%s1690_s19 + $0xd8] sm:$0xff] %vm272_vm1, %v1440_v8  ;;  %v893_v11 = vld [vmem:[#allocation2 + $0x68] sm:$0xff] }
 0x11e   : > { %v1442_v13 = vpop.eup %1441  ;;  %1443 = vtanh.f32 %v944_v9  ;;  %v929_v14 = vadd.f32 %v1679_v55, %v893_v11  ;;  %859 = vst.msk [vmem:[#allocation2 + $0x70] sm:$0xff] %vm272_vm1, %v826_v7 }
 0x11f   : > { %992 = vst.msk [vmem:[%s1690_s19 + $0x60] sm:$0xff] %vm272_vm1, %v1442_v13  ;;  %v896_v61 = vld [vmem:[#allocation2 + $0x80] sm:$0xff]  ;;  %v718_v16 = vpop.f32.mrf.mxu2 }
 0x120   : > { %1445 = vtanh.f32 %v929_v14  ;;  %v932_v17 = vadd.f32 %v1679_v55, %v896_v61  ;;  %862 = vst.msk [vmem:[#allocation2 + $0x88] sm:$0xff] %vm272_vm1, %v829_v10  ;;  %v808_v18 = vadd.f32 %v807_v12, %v718_v16 }
 0x121   : > { %v680_v20 = vpop.f32.mrf.mxu0 }
 0x122   : > { %v770_v21 = vadd.f32 %v1782_v30, %v680_v20  ;;  %1447 = vtanh.f32 %v932_v17  ;;  %v842_v22 = vadd.f32 %v808_v18, %v335_v15 }
 0x123   : > { %v909_v23 = vld [vmem:[#allocation2 + $0xe8] sm:$0xff] }
 0x124   : > { %v827_v24 = vadd.f32 %v770_v21, %v320_v19  ;;  %v1444_v25 = vpop.eup %1443  ;;  %v945_v26 = vadd.f32 %v1679_v55, %v909_v23  ;;  %875 = vst.msk [vmem:[#allocation2 + $0xf0] sm:$0xff] %vm272_vm1, %v842_v22 }
 0x125   : > { %1008 = vst.msk [vmem:[%s1690_s19 + $0xe0] sm:$0xff] %vm272_vm1, %v1444_v25  ;;  %v894_v27 = vld [vmem:[#allocation2 + $0x70] sm:$0xff] }
 0x126   : > { %v1446_v28 = vpop.eup %1445  ;;  %1449 = vtanh.f32 %v945_v26  ;;  %v930_v29 = vadd.f32 %v1679_v55, %v894_v27  ;;  %860 = vst.msk [vmem:[#allocation2 + $0x78] sm:$0xff] %vm272_vm1, %v827_v24 }
 0x127   : > { %993 = vst.msk [vmem:[%s1690_s19 + $0x68] sm:$0xff] %vm272_vm1, %v1446_v28  ;;  %v897_v30 = vld [vmem:[#allocation2 + $0x88] sm:$0xff]  ;;  %v720_v33 = vpop.f32.mrf.mxu2 }
 0x128   : > { %v1448_v34 = vpop.eup %1447  ;;  %1451 = vtanh.f32 %v930_v29  ;;  %v933_v35 = vadd.f32 %v1679_v55, %v897_v30  ;;  %v810_v36 = vadd.f32 %v809_v31, %v720_v33 }
 0x129   : > { %996 = vst.msk [vmem:[%s1690_s19 + $0x80] sm:$0xff] %vm272_vm1, %v1448_v34 }
 0x12a   : > { %1453 = vtanh.f32 %v933_v35  ;;  %v843_v37 = vadd.f32 %v810_v36, %v336_v32 }
 0x12b   : > { %v910_v38 = vld [vmem:[#allocation2 + $0xf0] sm:$0xff] }
 0x12c   : > { %v1450_v39 = vpop.eup %1449  ;;  %v946_v40 = vadd.f32 %v1679_v55, %v910_v38  ;;  %876 = vst.msk [vmem:[#allocation2 + $0xf8] sm:$0xff] %vm272_vm1, %v843_v37 }
 0x12d   : > { %1009 = vst.msk [vmem:[%s1690_s19 + $0xe8] sm:$0xff] %vm272_vm1, %v1450_v39  ;;  %v895_v41 = vld [vmem:[#allocation2 + $0x78] sm:$0xff] }
 0x12e   : > { %v1452_v42 = vpop.eup %1451  ;;  %1455 = vtanh.f32 %v946_v40  ;;  %v931_v43 = vadd.f32 %v1679_v55, %v895_v41 }
 0x12f   : > { %994 = vst.msk [vmem:[%s1690_s19 + $0x70] sm:$0xff] %vm272_vm1, %v1452_v42 }
 0x130   : > { %v1454_v44 = vpop.eup %1453  ;;  %1457 = vtanh.f32 %v931_v43 }
 0x131   : > { %997 = vst.msk [vmem:[%s1690_s19 + $0x88] sm:$0xff] %vm272_vm1, %v1454_v44 }
 0x133   : > { %v911_v45 = vld [vmem:[#allocation2 + $0xf8] sm:$0xff] }
 0x134   : > { %v1456_v46 = vpop.eup %1455  ;;  %v947_v47 = vadd.f32 %v1679_v55, %v911_v45 }
 0x135   : > { %1010 = vst.msk [vmem:[%s1690_s19 + $0xf0] sm:$0xff] %vm272_vm1, %v1456_v46 }
 0x136   : > { %v1458_v48 = vpop.eup %1457  ;;  %1459 = vtanh.f32 %v947_v47 }
 0x137   : > { %995 = vst.msk [vmem:[%s1690_s19 + $0x78] sm:$0xff] %vm272_vm1, %v1458_v48 }
 0x13c   : > { %v1460_v49 = vpop.eup %1459 }
 0x13d   : > { %1011 = vst.msk [vmem:[%s1690_s19 + $0xf8] sm:$0xff] %vm272_vm1, %v1460_v49 }
 0x13e PF: > { %s13_s14 = sadd.s32 1, %s1483_s14   ;;  %s1856_s12 = smov %s1479_s13 }
 0x13f   : > { %p10_p5 = scmp.ge.s32.totalorder %s13_s14, 4   ;;  %s1857_s13 = smov %s1859_s15 }
 0x141   :  { %12 = sbr.rel (!%p10_p5) target bundleno = 2 (0x2), region = 76 }

</bundles_post_ra>
